<compile_context>
chip_gen: v7x
topology: tpu7x:2x2x1
jax: 0.10.0
libtpu: 0.0.40
codegen_flags: <defaults>
</compile_context>

<pallas_src>
import math
from functools import partial

import jax
import jax.numpy as jnp
from jax import lax
from jax.experimental import pallas as pl
from jax.experimental.pallas import tpu as pltpu


# ----------------------------------------------------------------------------
# Whole-encoder kernel: grid over layers, activations resident in VMEM.
# ----------------------------------------------------------------------------
def _encoder_stack_kernel(
    # constant-index inputs (DMA'd once, resident across the whole grid)
    fx_ref, px_ref, attn_bias_ref, sim_bias_ref, smooth_row_ref, nosmooth_eye_ref,
    # per-layer weights (leading L axis sliced by the grid index)
    wqkv_ref, wo_ref, w1_ref, w2_ref, wsim_ref, slab_ref,
    # output (resident accumulator across layers)
    px_out_ref,
    # scratch
    fx_scr, o_scr,
    *, num_heads, feat_dim, ff_dim, param_dim,
):
    l = pl.program_id(0)
    F = feat_dim
    P = param_dim
    H = num_heads
    dk = F // H
    eps = 1e-6

    # Initialize resident activations from the kernel inputs at layer 0.
    @pl.when(l == 0)
    def _():
        fx_scr[...] = fx_ref[...]
        px_out_ref[...] = px_ref[...]

    x = fx_scr[...]          # (N, F) f32  feature_x carried across layers
    p = px_out_ref[...]      # (N, P) f32  param_x  carried across layers

    # Single packed slab of all small per-layer params (one DMA per step).
    slab = slab_ref[0]       # (ROWS, W) f32
    n1a, n1b = slab[0:1, :F], slab[1:2, :F]
    n2a, n2b = slab[2:3, :F], slab[3:4, :F]
    bq, bk, bv, bo = slab[4:5, :F], slab[5:6, :F], slab[6:7, :F], slab[7:8, :F]
    b1, b2 = slab[8:9, :ff_dim], slab[9:10, :F]
    wt, bp = slab[10:11, :F], slab[11:12, :P]
    wpf = slab[12:12 + P, :F]               # (P, F) param_update weight[:, :F]
    wpp = slab[12 + P:12 + 2 * P, :P]       # (P, P) param_update weight[:, F:]

    def layer_norm(v, alpha, bias):
        # NormLayer: alpha*(v-mean)/(std+eps)+bias; torch.std is unbiased (ddof=1).
        mean = jnp.mean(v, axis=-1, keepdims=True)
        c = v - mean
        var = jnp.sum(c * c, axis=-1, keepdims=True) * (1.0 / (F - 1))
        return alpha * (c / (jnp.sqrt(var) + eps)) + bias

    def softmax_last(s):
        m = jnp.max(s, axis=-1, keepdims=True)
        e = jnp.exp(s - m)
        return e / jnp.sum(e, axis=-1, keepdims=True)

    attn_bias = attn_bias_ref[...]           # (N, N) 0 / -1e30 block-diagonal
    tb = (((1,), (1,)), ((), ()))            # contract last dims (trans_b form)

    # ---- norm_1 + fused QKV projection (single (N,F)x(F,3F) bf16 matmul) ----
    xn = layer_norm(x, n1a, n1b)
    xnb = xn.astype(jnp.bfloat16)
    qkv = jnp.dot(xnb, wqkv_ref[0], preferred_element_type=jnp.float32)   # (N, 3F)
    qf = qkv[:, 0 * F:1 * F] + bq
    kf = qkv[:, 1 * F:2 * F] + bk
    vf = qkv[:, 2 * F:3 * F] + bv

    # ---- multi-head attention over the whole flattened batch ----
    scale = 1.0 / math.sqrt(dk)
    for h in range(H):                       # static unroll; 128-lane head slices
        c = slice(h * dk, (h + 1) * dk)
        qh = qf[:, c].astype(jnp.bfloat16)
        kh = kf[:, c].astype(jnp.bfloat16)
        vh = vf[:, c].astype(jnp.bfloat16)
        s = lax.dot_general(qh, kh, tb, preferred_element_type=jnp.float32)
        s = softmax_last(s * scale + attn_bias)          # dropout_1 = identity (eval)
        o_scr[:, c] = jnp.dot(s.astype(jnp.bfloat16), vh,
                              preferred_element_type=jnp.float32)

    attn = jnp.dot(o_scr[...].astype(jnp.bfloat16), wo_ref[0],
                   preferred_element_type=jnp.float32) + bo
    x1 = xn + attn       # residual onto the *normalized* activations (as in PyTorch)

    # ---- feed forward (dropouts = identity in eval) ----
    x2 = layer_norm(x1, n2a, n2b)
    h1 = jnp.maximum(
        jnp.dot(x2.astype(jnp.bfloat16), w1_ref[0],
                preferred_element_type=jnp.float32) + b1, 0.0)
    x3 = x1 + jnp.dot(h1.astype(jnp.bfloat16), w2_ref[0],
                      preferred_element_type=jnp.float32) + b2

    # ---- param_update on cat([feature_x, param_x], -1) (weight split) ----
    pn = (lax.dot_general(x3, wpf, tb, preferred_element_type=jnp.float32)
          + lax.dot_general(p, wpp, tb, preferred_element_type=jnp.float32)
          + bp)                                                       # (N, P)

    # ---- FullyVectorizedSimilaritySmoothing (Q and K share the JL matrix) ----
    temps = jnp.maximum(jnp.sum(x3 * wt, axis=-1, keepdims=True), 0.0) + 0.01
    qs = jnp.dot(x3.astype(jnp.bfloat16), wsim_ref[0],
                 preferred_element_type=jnp.float32)                  # (N, F)
    qsb = qs.astype(jnp.bfloat16)
    sc = lax.dot_general(qsb, qsb, tb, preferred_element_type=jnp.float32)  # (N, N)
    sc = sc / temps + sim_bias_ref[...]     # per-row temperature; question+batch mask
    aw = softmax_last(sc)                   # smoothing dropout = identity (eval)
    aw = aw * smooth_row_ref[...] + nosmooth_eye_ref[...]
    sp = jnp.dot(aw, pn, preferred_element_type=jnp.float32)          # (N, P)

    # carry activations to the next layer (HBM writeback of px happens only
    # once, after the final grid step, since the output block index is constant)
    fx_scr[...] = x3
    px_out_ref[...] = sp


# ----------------------------------------------------------------------------
# Full Encoder forward (positional encoder = plain-JAX glue, then one kernel)
# ----------------------------------------------------------------------------
def encoder_forward(x, annotators, questions, embeddings, params, num_heads):
    # Positional_Encoder (embedding gathers + concat)
    qe = params["question_embedding"][questions]                       # (B,S,E)
    ann = jnp.where(annotators < 0, params["num_annotator"], annotators)
    ae = params["annotator_embedding"][ann]                            # (B,S,E)
    if embeddings.ndim == 4:
        embeddings = embeddings[0]
    feature_x = jnp.concatenate([qe + ae, embeddings, x[:, :, 1:]], axis=-1)
    param_x = x[:, :, 1:]

    B, S, F = feature_x.shape
    P = param_x.shape[-1]
    N = B * S
    layers = params["layers"]
    L = len(layers)
    d_ff = layers[0]["w1"].shape[-1]
    W = max(F, d_ff)

    # ---- host-side precomputed masks (shared by every layer) ----
    mask_row = (x[:, :, 0] != 0).astype(jnp.float32).reshape(N, 1)     # rows that smooth
    batch_ids = jnp.repeat(jnp.arange(B), S)
    same_batch = batch_ids[:, None] == batch_ids[None, :]
    attn_bias = jnp.where(same_batch, 0.0, -1e30).astype(jnp.float32)  # (N,N)
    q_flat = questions.reshape(N)
    same_q = (q_flat[:, None] == q_flat[None, :]) & same_batch
    sim_bias = jnp.where(same_q, 0.0, -1e30).astype(jnp.float32)       # (N,N)
    nosmooth_eye = jnp.eye(N, dtype=jnp.float32) * (1.0 - mask_row)    # (N,N)

    fx2 = feature_x.reshape(N, F).astype(jnp.float32)
    px2 = param_x.reshape(N, P).astype(jnp.float32)

    # ---- big per-layer weights, stacked on a leading L axis (bf16) ----
    bf16 = jnp.bfloat16
    wqkv = jnp.stack([jnp.concatenate([lw["wq"], lw["wk"], lw["wv"]], axis=-1)
                      for lw in layers]).astype(bf16)                  # (L,F,3F)
    wo = jnp.stack([lw["wo"] for lw in layers]).astype(bf16)           # (L,F,F)
    w1 = jnp.stack([lw["w1"] for lw in layers]).astype(bf16)           # (L,F,d_ff)
    w2 = jnp.stack([lw["w2"] for lw in layers]).astype(bf16)           # (L,d_ff,F)
    wsim = jnp.stack([lw["wsim"] for lw in layers]).astype(bf16)       # (L,F,F)

    # ---- ONE padded (L, ROWS, W) f32 slab for every small per-layer param ----
    n_rows = 12 + 2 * P
    ROWS = ((n_rows + 7) // 8) * 8

    def pad_cols(m):
        m = jnp.asarray(m, jnp.float32).reshape(-1, m.shape[-1])
        return jnp.pad(m, ((0, 0), (0, W - m.shape[-1])))

    slabs = []
    for lw in layers:
        rows = jnp.concatenate([
            pad_cols(lw["n1a"]), pad_cols(lw["n1b"]),
            pad_cols(lw["n2a"]), pad_cols(lw["n2b"]),
            pad_cols(lw["bq"]), pad_cols(lw["bk"]), pad_cols(lw["bv"]), pad_cols(lw["bo"]),
            pad_cols(lw["b1"]), pad_cols(lw["b2"]),
            pad_cols(lw["wt"]), pad_cols(lw["bp"]),
            pad_cols(lw["wpf"]),            # (P, F) torch-layout param_update weight
            pad_cols(lw["wpp"]),            # (P, P)
        ], axis=0)
        slabs.append(jnp.pad(rows, ((0, ROWS - rows.shape[0]), (0, 0))))
    slab = jnp.stack(slabs)                                            # (L,ROWS,W)

    # ---- BlockSpecs ----
    def const_spec(a):
        nd = a.ndim
        return pl.BlockSpec(a.shape, lambda l, _n=nd: (0,) * _n)

    def layer_spec(a):
        nd = a.ndim
        return pl.BlockSpec((1,) + a.shape[1:], lambda l, _n=nd: (l,) + (0,) * (_n - 1))

    const_ins = [fx2, px2, attn_bias, sim_bias, mask_row, nosmooth_eye]
    layer_ins = [wqkv, wo, w1, w2, wsim, slab]
    in_specs = [const_spec(a) for a in const_ins] + [layer_spec(a) for a in layer_ins]

    px_out = pl.pallas_call(
        partial(_encoder_stack_kernel, num_heads=num_heads,
                feat_dim=F, ff_dim=d_ff, param_dim=P),
        grid=(L,),
        in_specs=in_specs,
        out_specs=pl.BlockSpec((N, P), lambda l: (0, 0)),
        out_shape=jax.ShapeDtypeStruct((N, P), jnp.float32),
        scratch_shapes=[pltpu.VMEM((N, F), jnp.float32),   # feature_x carry
                        pltpu.VMEM((N, F), jnp.float32)],  # per-head attention slab
        compiler_params=pltpu.CompilerParams(
            # Layers form a sequential carried loop.  A batch-parallel leading
            # axis (second v7x TensorCore) only pays off once N is large enough
            # to amortize streaming the weights twice -- skipped at this size.
            dimension_semantics=("arbitrary",),
            vmem_limit_bytes=48 * 1024 * 1024),
    )(*const_ins, *layer_ins)

    return px_out.reshape(B, S, P)


# ----------------------------------------------------------------------------
# Deterministic synthetic parameters
# ----------------------------------------------------------------------------
def init_params(key, question_num, max_choices, encoder_num, num_annotator, emb_dim):
    F = emb_dim + max_choices + 384
    P = max_choices
    d_ff = 512
    keys = jax.random.split(key, 2 + encoder_num)

    params = {
        "question_embedding": jax.random.normal(keys[0], (question_num, emb_dim), jnp.float32),
        "annotator_embedding": jax.random.normal(keys[1], (num_annotator + 1, emb_dim), jnp.float32),
        "num_annotator": num_annotator,
        "layers": [],
    }

    for li in range(encoder_num):
        lk = jax.random.split(keys[2 + li], 17)
        n = lambda k, shape, s: jax.random.normal(k, shape, jnp.float32) * s
        jl = jax.random.normal(lk[14], (F, F), jnp.float32) / math.sqrt(F)  # shared JL matrix
        lw = dict(
            n1a=jnp.ones((1, F), jnp.float32), n1b=jnp.zeros((1, F), jnp.float32),
            wq=n(lk[0], (F, F), 1 / math.sqrt(F)), bq=n(lk[1], (1, F), 0.01),
            wk=n(lk[2], (F, F), 1 / math.sqrt(F)), bk=n(lk[3], (1, F), 0.01),
            wv=n(lk[4], (F, F), 1 / math.sqrt(F)), bv=n(lk[5], (1, F), 0.01),
            wo=n(lk[6], (F, F), 1 / math.sqrt(F)), bo=n(lk[7], (1, F), 0.01),
            n2a=jnp.ones((1, F), jnp.float32), n2b=jnp.zeros((1, F), jnp.float32),
            w1=n(lk[8], (F, d_ff), 1 / math.sqrt(F)), b1=n(lk[9], (1, d_ff), 0.01),
            w2=n(lk[10], (d_ff, F), 1 / math.sqrt(d_ff)), b2=n(lk[11], (1, F), 0.01),
            wpf=n(lk[12], (P, F), 1 / math.sqrt(F + P)),   # param_update weight[:, :F]
            wpp=n(lk[13], (P, P), 1 / math.sqrt(F + P)),   # param_update weight[:, F:]
            bp=n(lk[15], (1, P), 0.01),
            wsim=jl.T,                                     # Q and K share the JL matrix
            wt=n(lk[16], (1, F), 0.01),                    # temp_projection ~ N(0, 0.01)
        )
        params["layers"].append(lw)
    return params


# ----------------------------------------------------------------------------
if __name__ == "__main__":
    # small, module-consistent shapes
    B, S = 2, 8
    question_num = 5
    max_choices = 4                       # param_dim
    encoder_num = 2
    attention_heads = 4
    num_annotator = 6
    annotator_embedding_dim = 124         # feature_dim = 124 + 4 + 384 = 512

    root = jax.random.PRNGKey(0)
    kp, kx, ka, kq, ke, km = jax.random.split(root, 6)

    params = init_params(kp, question_num, max_choices, encoder_num,
                         num_annotator, annotator_embedding_dim)

    mask_col = jax.random.bernoulli(km, 0.5, (B, S, 1)).astype(jnp.float32)
    x_rest = jax.random.normal(kx, (B, S, max_choices), jnp.float32)
    x = jnp.concatenate([mask_col, x_rest], axis=-1)                  # (B,S,1+P)
    annotators = jax.random.randint(ka, (B, S), -1, num_annotator)    # includes -1
    questions = jax.random.randint(kq, (B, S), 0, question_num)
    embeddings = jax.random.normal(ke, (B, S, 384), jnp.float32)

    out = encoder_forward(x, annotators, questions, embeddings, params,
                          attention_heads)
    out = jax.block_until_ready(out)
    assert out.shape == (B, S, max_choices)
    assert bool(jnp.all(jnp.isfinite(out)))
    print("KERNEL_OK")
</pallas_src>

<mosaic_0001>
module attributes {stable_mosaic.version = 11 : i64} {
  func.func @_encoder_stack_kernel(%arg0: i32, %arg1: memref<16x512xf32, #tpu.memory_space<vmem>>, %arg2: memref<16x4xf32, #tpu.memory_space<vmem>>, %arg3: memref<16x16xf32, #tpu.memory_space<vmem>>, %arg4: memref<16x16xf32, #tpu.memory_space<vmem>>, %arg5: memref<16x1xf32, #tpu.memory_space<vmem>>, %arg6: memref<16x16xf32, #tpu.memory_space<vmem>>, %arg7: memref<1x512x1536xbf16, #tpu.memory_space<vmem>>, %arg8: memref<1x512x512xbf16, #tpu.memory_space<vmem>>, %arg9: memref<1x512x512xbf16, #tpu.memory_space<vmem>>, %arg10: memref<1x512x512xbf16, #tpu.memory_space<vmem>>, %arg11: memref<1x512x512xbf16, #tpu.memory_space<vmem>>, %arg12: memref<1x24x512xf32, #tpu.memory_space<vmem>>, %arg13: memref<16x4xf32, #tpu.memory_space<vmem>>, %arg14: memref<16x512xf32, #tpu.memory_space<vmem>>, %arg15: memref<16x512xf32, #tpu.memory_space<vmem>>) attributes {dimension_semantics = [#tpu.dimension_semantics<arbitrary>], iteration_bounds = array<i64: 2>, scalar_prefetch = 0 : i64, scratch_operands = 2 : i64, tpu.core_type = #tpu.core_type<tc>, window_params = [{pipeline_mode = #tpu.pipeline_mode<synchronous>, transform_indices = @transform_0, window_bounds = array<i64: 16, 512>}, {pipeline_mode = #tpu.pipeline_mode<synchronous>, transform_indices = @transform_1, window_bounds = array<i64: 16, 4>}, {pipeline_mode = #tpu.pipeline_mode<synchronous>, transform_indices = @transform_2, window_bounds = array<i64: 16, 16>}, {pipeline_mode = #tpu.pipeline_mode<synchronous>, transform_indices = @transform_3, window_bounds = array<i64: 16, 16>}, {pipeline_mode = #tpu.pipeline_mode<synchronous>, transform_indices = @transform_4, window_bounds = array<i64: 16, 1>}, {pipeline_mode = #tpu.pipeline_mode<synchronous>, transform_indices = @transform_5, window_bounds = array<i64: 16, 16>}, {transform_indices = @transform_6, window_bounds = array<i64: 1, 512, 1536>}, {transform_indices = @transform_7, window_bounds = array<i64: 1, 512, 512>}, {transform_indices = @transform_8, window_bounds = array<i64: 1, 512, 512>}, {transform_indices = @transform_9, window_bounds = array<i64: 1, 512, 512>}, {transform_indices = @transform_10, window_bounds = array<i64: 1, 512, 512>}, {transform_indices = @transform_11, window_bounds = array<i64: 1, 24, 512>}, {pipeline_mode = #tpu.pipeline_mode<synchronous>, transform_indices = @transform_12, window_bounds = array<i64: 16, 4>}]} {
    %c0_i32 = arith.constant 0 : i32
    %0 = arith.cmpi eq, %arg0, %c0_i32 : i32
    %1 = arith.extui %0 : i1 to i32
    %c0_i32_0 = arith.constant 0 : i32
    %2 = arith.cmpi ne, %1, %c0_i32_0 : i32
    scf.if %2 {
      %c0_85 = arith.constant 0 : index
      %c0_86 = arith.constant 0 : index
      %226 = vector.load %arg1[%c0_85, %c0_86] : memref<16x512xf32, #tpu.memory_space<vmem>>, vector<16x512xf32>
      %c0_87 = arith.constant 0 : index
      %c0_88 = arith.constant 0 : index
      %227 = vector.load %arg14[%c0_87, %c0_88] : memref<16x512xf32, #tpu.memory_space<vmem>>, vector<16x512xf32>
      tpu.vector_store %arg14[%c0_87, %c0_88], %226 {strides = array<i32>} : memref<16x512xf32, #tpu.memory_space<vmem>>, vector<16x512xf32>,
      %c0_89 = arith.constant 0 : index
      %c0_90 = arith.constant 0 : index
      %228 = vector.load %arg2[%c0_89, %c0_90] : memref<16x4xf32, #tpu.memory_space<vmem>>, vector<16x4xf32>
      %c0_91 = arith.constant 0 : index
      %c0_92 = arith.constant 0 : index
      %229 = vector.load %arg13[%c0_91, %c0_92] : memref<16x4xf32, #tpu.memory_space<vmem>>, vector<16x4xf32>
      tpu.vector_store %arg13[%c0_91, %c0_92], %228 {strides = array<i32>} : memref<16x4xf32, #tpu.memory_space<vmem>>, vector<16x4xf32>,
    } else {
    }
    %c0 = arith.constant 0 : index
    %c0_1 = arith.constant 0 : index
    %3 = vector.load %arg14[%c0, %c0_1] : memref<16x512xf32, #tpu.memory_space<vmem>>, vector<16x512xf32>
    %c0_2 = arith.constant 0 : index
    %c0_3 = arith.constant 0 : index
    %4 = vector.load %arg13[%c0_2, %c0_3] : memref<16x4xf32, #tpu.memory_space<vmem>>, vector<16x4xf32>
    %c0_4 = arith.constant 0 : index
    %c0_5 = arith.constant 0 : index
    %c0_6 = arith.constant 0 : index
    %5 = vector.load %arg12[%c0_4, %c0_5, %c0_6] : memref<1x24x512xf32, #tpu.memory_space<vmem>>, vector<1x24x512xf32>
    %6 = vector.shape_cast %5 : vector<1x24x512xf32> to vector<24x512xf32>
    %7 = vector.extract_strided_slice %6 {offsets = [0, 0], sizes = [1, 512], strides = [1, 1]} : vector<24x512xf32> to vector<1x512xf32>
    %8 = vector.extract_strided_slice %6 {offsets = [1, 0], sizes = [1, 512], strides = [1, 1]} : vector<24x512xf32> to vector<1x512xf32>
    %9 = vector.extract_strided_slice %6 {offsets = [2, 0], sizes = [1, 512], strides = [1, 1]} : vector<24x512xf32> to vector<1x512xf32>
    %10 = vector.extract_strided_slice %6 {offsets = [3, 0], sizes = [1, 512], strides = [1, 1]} : vector<24x512xf32> to vector<1x512xf32>
    %11 = vector.extract_strided_slice %6 {offsets = [4, 0], sizes = [1, 512], strides = [1, 1]} : vector<24x512xf32> to vector<1x512xf32>
    %12 = vector.extract_strided_slice %6 {offsets = [5, 0], sizes = [1, 512], strides = [1, 1]} : vector<24x512xf32> to vector<1x512xf32>
    %13 = vector.extract_strided_slice %6 {offsets = [6, 0], sizes = [1, 512], strides = [1, 1]} : vector<24x512xf32> to vector<1x512xf32>
    %14 = vector.extract_strided_slice %6 {offsets = [7, 0], sizes = [1, 512], strides = [1, 1]} : vector<24x512xf32> to vector<1x512xf32>
    %15 = vector.extract_strided_slice %6 {offsets = [8, 0], sizes = [1, 512], strides = [1, 1]} : vector<24x512xf32> to vector<1x512xf32>
    %16 = vector.extract_strided_slice %6 {offsets = [9, 0], sizes = [1, 512], strides = [1, 1]} : vector<24x512xf32> to vector<1x512xf32>
    %17 = vector.extract_strided_slice %6 {offsets = [10, 0], sizes = [1, 512], strides = [1, 1]} : vector<24x512xf32> to vector<1x512xf32>
    %18 = vector.extract_strided_slice %6 {offsets = [11, 0], sizes = [1, 4], strides = [1, 1]} : vector<24x512xf32> to vector<1x4xf32>
    %19 = vector.extract_strided_slice %6 {offsets = [12, 0], sizes = [4, 512], strides = [1, 1]} : vector<24x512xf32> to vector<4x512xf32>
    %20 = vector.extract_strided_slice %6 {offsets = [16, 0], sizes = [4, 4], strides = [1, 1]} : vector<24x512xf32> to vector<4x4xf32>
    %c0_7 = arith.constant 0 : index
    %c0_8 = arith.constant 0 : index
    %21 = vector.load %arg3[%c0_7, %c0_8] : memref<16x16xf32, #tpu.memory_space<vmem>>, vector<16x16xf32>
    %cst = arith.constant dense<0.000000e+00> : vector<16xf32>
    %22 = vector.multi_reduction <add>, %3, %cst [1] : vector<16x512xf32> to vector<16xf32>
    %23 = vector.shape_cast %22 : vector<16xf32> to vector<16x1xf32>
    %cst_9 = arith.constant 5.120000e+02 : f32
    %24 = vector.broadcast %cst_9 : f32 to vector<16x1xf32>
    %25 = arith.divf %23, %24 : vector<16x1xf32>
    %26 = vector.broadcast %25 : vector<16x1xf32> to vector<16x512xf32>
    %27 = arith.subf %3, %26 : vector<16x512xf32>
    %28 = arith.mulf %27, %27 : vector<16x512xf32>
    %cst_10 = arith.constant dense<0.000000e+00> : vector<16xf32>
    %29 = vector.multi_reduction <add>, %28, %cst_10 [1] : vector<16x512xf32> to vector<16xf32>
    %30 = vector.shape_cast %29 : vector<16xf32> to vector<16x1xf32>
    %cst_11 = arith.constant 0.00195694715 : f32
    %31 = vector.broadcast %cst_11 : f32 to vector<16x1xf32>
    %32 = arith.mulf %30, %31 : vector<16x1xf32>
    %33 = math.sqrt %32 : vector<16x1xf32>
    %cst_12 = arith.constant 9.99999997E-7 : f32
    %34 = vector.broadcast %cst_12 : f32 to vector<16x1xf32>
    %35 = arith.addf %33, %34 : vector<16x1xf32>
    %36 = vector.broadcast %35 : vector<16x1xf32> to vector<16x512xf32>
    %37 = arith.divf %27, %36 : vector<16x512xf32>
    %38 = vector.broadcast %7 : vector<1x512xf32> to vector<16x512xf32>
    %39 = arith.mulf %38, %37 : vector<16x512xf32>
    %40 = vector.broadcast %8 : vector<1x512xf32> to vector<16x512xf32>
    %41 = arith.addf %39, %40 : vector<16x512xf32>
    %42 = arith.truncf %41 : vector<16x512xf32> to vector<16x512xbf16>
    %c0_13 = arith.constant 0 : index
    %c0_14 = arith.constant 0 : index
    %c0_15 = arith.constant 0 : index
    %43 = vector.load %arg7[%c0_13, %c0_14, %c0_15] : memref<1x512x1536xbf16, #tpu.memory_space<vmem>>, vector<1x512x1536xbf16>
    %44 = vector.shape_cast %43 : vector<1x512x1536xbf16> to vector<512x1536xbf16>
    %cst_16 = arith.constant dense<0.000000e+00> : vector<16x1536xf32>
    %45 = tpu.matmul %42, %44, %cst_16 {dimension_numbers = #tpu.dot_dimension_numbers<[1], [0], [0], [1], [0, 0, 1, 1], [], []>} : vector<16x512xbf16>, vector<512x1536xbf16>, vector<16x1536xf32> -> vector<16x1536xf32>
    %46 = vector.extract_strided_slice %45 {offsets = [0, 0], sizes = [16, 512], strides = [1, 1]} : vector<16x1536xf32> to vector<16x512xf32>
    %47 = vector.broadcast %11 : vector<1x512xf32> to vector<16x512xf32>
    %48 = arith.addf %46, %47 : vector<16x512xf32>
    %49 = vector.extract_strided_slice %45 {offsets = [0, 512], sizes = [16, 512], strides = [1, 1]} : vector<16x1536xf32> to vector<16x512xf32>
    %50 = vector.broadcast %12 : vector<1x512xf32> to vector<16x512xf32>
    %51 = arith.addf %49, %50 : vector<16x512xf32>
    %52 = vector.extract_strided_slice %45 {offsets = [0, 1024], sizes = [16, 512], strides = [1, 1]} : vector<16x1536xf32> to vector<16x512xf32>
    %53 = vector.broadcast %13 : vector<1x512xf32> to vector<16x512xf32>
    %54 = arith.addf %52, %53 : vector<16x512xf32>
    %55 = vector.extract_strided_slice %48 {offsets = [0, 0], sizes = [16, 128], strides = [1, 1]} : vector<16x512xf32> to vector<16x128xf32>
    %56 = arith.truncf %55 : vector<16x128xf32> to vector<16x128xbf16>
    %57 = vector.extract_strided_slice %51 {offsets = [0, 0], sizes = [16, 128], strides = [1, 1]} : vector<16x512xf32> to vector<16x128xf32>
    %58 = arith.truncf %57 : vector<16x128xf32> to vector<16x128xbf16>
    %59 = vector.extract_strided_slice %54 {offsets = [0, 0], sizes = [16, 128], strides = [1, 1]} : vector<16x512xf32> to vector<16x128xf32>
    %60 = arith.truncf %59 : vector<16x128xf32> to vector<16x128xbf16>
    %cst_17 = arith.constant dense<0.000000e+00> : vector<16x16xf32>
    %61 = tpu.matmul %56, %58, %cst_17 {dimension_numbers = #tpu.dot_dimension_numbers<[1], [1], [0], [0], [0, 0, 1, 0], [], []>} : vector<16x128xbf16>, vector<16x128xbf16>, vector<16x16xf32> -> vector<16x16xf32>
    %cst_18 = arith.constant 0.0883883461 : f32
    %62 = vector.broadcast %cst_18 : f32 to vector<16x16xf32>
    %63 = arith.mulf %61, %62 : vector<16x16xf32>
    %64 = arith.addf %63, %21 : vector<16x16xf32>
    %cst_19 = arith.constant dense<0xFF800000> : vector<16xf32>
    %65 = vector.multi_reduction <maximumf>, %64, %cst_19 [1] : vector<16x16xf32> to vector<16xf32>
    %66 = vector.shape_cast %65 : vector<16xf32> to vector<16x1xf32>
    %67 = vector.broadcast %66 : vector<16x1xf32> to vector<16x16xf32>
    %68 = arith.subf %64, %67 : vector<16x16xf32>
    %69 = math.exp %68 : vector<16x16xf32>
    %cst_20 = arith.constant dense<0.000000e+00> : vector<16xf32>
    %70 = vector.multi_reduction <add>, %69, %cst_20 [1] : vector<16x16xf32> to vector<16xf32>
    %71 = vector.shape_cast %70 : vector<16xf32> to vector<16x1xf32>
    %72 = vector.broadcast %71 : vector<16x1xf32> to vector<16x16xf32>
    %73 = arith.divf %69, %72 : vector<16x16xf32>
    %74 = arith.truncf %73 : vector<16x16xf32> to vector<16x16xbf16>
    %cst_21 = arith.constant dense<0.000000e+00> : vector<16x128xf32>
    %75 = tpu.matmul %74, %60, %cst_21 {dimension_numbers = #tpu.dot_dimension_numbers<[1], [0], [0], [1], [0, 0, 1, 1], [], []>} : vector<16x16xbf16>, vector<16x128xbf16>, vector<16x128xf32> -> vector<16x128xf32>
    %c0_22 = arith.constant 0 : index
    %c0_23 = arith.constant 0 : index
    %76 = vector.load %arg15[%c0_22, %c0_23] : memref<16x512xf32, #tpu.memory_space<vmem>>, vector<16x128xf32>
    tpu.vector_store %arg15[%c0_22, %c0_23], %75 {strides = array<i32>} : memref<16x512xf32, #tpu.memory_space<vmem>>, vector<16x128xf32>,
    %77 = vector.extract_strided_slice %48 {offsets = [0, 128], sizes = [16, 128], strides = [1, 1]} : vector<16x512xf32> to vector<16x128xf32>
    %78 = arith.truncf %77 : vector<16x128xf32> to vector<16x128xbf16>
    %79 = vector.extract_strided_slice %51 {offsets = [0, 128], sizes = [16, 128], strides = [1, 1]} : vector<16x512xf32> to vector<16x128xf32>
    %80 = arith.truncf %79 : vector<16x128xf32> to vector<16x128xbf16>
    %81 = vector.extract_strided_slice %54 {offsets = [0, 128], sizes = [16, 128], strides = [1, 1]} : vector<16x512xf32> to vector<16x128xf32>
    %82 = arith.truncf %81 : vector<16x128xf32> to vector<16x128xbf16>
    %cst_24 = arith.constant dense<0.000000e+00> : vector<16x16xf32>
    %83 = tpu.matmul %78, %80, %cst_24 {dimension_numbers = #tpu.dot_dimension_numbers<[1], [1], [0], [0], [0, 0, 1, 0], [], []>} : vector<16x128xbf16>, vector<16x128xbf16>, vector<16x16xf32> -> vector<16x16xf32>
    %cst_25 = arith.constant 0.0883883461 : f32
    %84 = vector.broadcast %cst_25 : f32 to vector<16x16xf32>
    %85 = arith.mulf %83, %84 : vector<16x16xf32>
    %86 = arith.addf %85, %21 : vector<16x16xf32>
    %cst_26 = arith.constant dense<0xFF800000> : vector<16xf32>
    %87 = vector.multi_reduction <maximumf>, %86, %cst_26 [1] : vector<16x16xf32> to vector<16xf32>
    %88 = vector.shape_cast %87 : vector<16xf32> to vector<16x1xf32>
    %89 = vector.broadcast %88 : vector<16x1xf32> to vector<16x16xf32>
    %90 = arith.subf %86, %89 : vector<16x16xf32>
    %91 = math.exp %90 : vector<16x16xf32>
    %cst_27 = arith.constant dense<0.000000e+00> : vector<16xf32>
    %92 = vector.multi_reduction <add>, %91, %cst_27 [1] : vector<16x16xf32> to vector<16xf32>
    %93 = vector.shape_cast %92 : vector<16xf32> to vector<16x1xf32>
    %94 = vector.broadcast %93 : vector<16x1xf32> to vector<16x16xf32>
    %95 = arith.divf %91, %94 : vector<16x16xf32>
    %96 = arith.truncf %95 : vector<16x16xf32> to vector<16x16xbf16>
    %cst_28 = arith.constant dense<0.000000e+00> : vector<16x128xf32>
    %97 = tpu.matmul %96, %82, %cst_28 {dimension_numbers = #tpu.dot_dimension_numbers<[1], [0], [0], [1], [0, 0, 1, 1], [], []>} : vector<16x16xbf16>, vector<16x128xbf16>, vector<16x128xf32> -> vector<16x128xf32>
    %c0_29 = arith.constant 0 : index
    %c128 = arith.constant 128 : index
    %98 = vector.load %arg15[%c0_29, %c128] : memref<16x512xf32, #tpu.memory_space<vmem>>, vector<16x128xf32>
    tpu.vector_store %arg15[%c0_29, %c128], %97 {strides = array<i32>} : memref<16x512xf32, #tpu.memory_space<vmem>>, vector<16x128xf32>,
    %99 = vector.extract_strided_slice %48 {offsets = [0, 256], sizes = [16, 128], strides = [1, 1]} : vector<16x512xf32> to vector<16x128xf32>
    %100 = arith.truncf %99 : vector<16x128xf32> to vector<16x128xbf16>
    %101 = vector.extract_strided_slice %51 {offsets = [0, 256], sizes = [16, 128], strides = [1, 1]} : vector<16x512xf32> to vector<16x128xf32>
    %102 = arith.truncf %101 : vector<16x128xf32> to vector<16x128xbf16>
    %103 = vector.extract_strided_slice %54 {offsets = [0, 256], sizes = [16, 128], strides = [1, 1]} : vector<16x512xf32> to vector<16x128xf32>
    %104 = arith.truncf %103 : vector<16x128xf32> to vector<16x128xbf16>
    %cst_30 = arith.constant dense<0.000000e+00> : vector<16x16xf32>
    %105 = tpu.matmul %100, %102, %cst_30 {dimension_numbers = #tpu.dot_dimension_numbers<[1], [1], [0], [0], [0, 0, 1, 0], [], []>} : vector<16x128xbf16>, vector<16x128xbf16>, vector<16x16xf32> -> vector<16x16xf32>
    %cst_31 = arith.constant 0.0883883461 : f32
    %106 = vector.broadcast %cst_31 : f32 to vector<16x16xf32>
    %107 = arith.mulf %105, %106 : vector<16x16xf32>
    %108 = arith.addf %107, %21 : vector<16x16xf32>
    %cst_32 = arith.constant dense<0xFF800000> : vector<16xf32>
    %109 = vector.multi_reduction <maximumf>, %108, %cst_32 [1] : vector<16x16xf32> to vector<16xf32>
    %110 = vector.shape_cast %109 : vector<16xf32> to vector<16x1xf32>
    %111 = vector.broadcast %110 : vector<16x1xf32> to vector<16x16xf32>
    %112 = arith.subf %108, %111 : vector<16x16xf32>
    %113 = math.exp %112 : vector<16x16xf32>
    %cst_33 = arith.constant dense<0.000000e+00> : vector<16xf32>
    %114 = vector.multi_reduction <add>, %113, %cst_33 [1] : vector<16x16xf32> to vector<16xf32>
    %115 = vector.shape_cast %114 : vector<16xf32> to vector<16x1xf32>
    %116 = vector.broadcast %115 : vector<16x1xf32> to vector<16x16xf32>
    %117 = arith.divf %113, %116 : vector<16x16xf32>
    %118 = arith.truncf %117 : vector<16x16xf32> to vector<16x16xbf16>
    %cst_34 = arith.constant dense<0.000000e+00> : vector<16x128xf32>
    %119 = tpu.matmul %118, %104, %cst_34 {dimension_numbers = #tpu.dot_dimension_numbers<[1], [0], [0], [1], [0, 0, 1, 1], [], []>} : vector<16x16xbf16>, vector<16x128xbf16>, vector<16x128xf32> -> vector<16x128xf32>
    %c0_35 = arith.constant 0 : index
    %c256 = arith.constant 256 : index
    %120 = vector.load %arg15[%c0_35, %c256] : memref<16x512xf32, #tpu.memory_space<vmem>>, vector<16x128xf32>
    tpu.vector_store %arg15[%c0_35, %c256], %119 {strides = array<i32>} : memref<16x512xf32, #tpu.memory_space<vmem>>, vector<16x128xf32>,
    %121 = vector.extract_strided_slice %48 {offsets = [0, 384], sizes = [16, 128], strides = [1, 1]} : vector<16x512xf32> to vector<16x128xf32>
    %122 = arith.truncf %121 : vector<16x128xf32> to vector<16x128xbf16>
    %123 = vector.extract_strided_slice %51 {offsets = [0, 384], sizes = [16, 128], strides = [1, 1]} : vector<16x512xf32> to vector<16x128xf32>
    %124 = arith.truncf %123 : vector<16x128xf32> to vector<16x128xbf16>
    %125 = vector.extract_strided_slice %54 {offsets = [0, 384], sizes = [16, 128], strides = [1, 1]} : vector<16x512xf32> to vector<16x128xf32>
    %126 = arith.truncf %125 : vector<16x128xf32> to vector<16x128xbf16>
    %cst_36 = arith.constant dense<0.000000e+00> : vector<16x16xf32>
    %127 = tpu.matmul %122, %124, %cst_36 {dimension_numbers = #tpu.dot_dimension_numbers<[1], [1], [0], [0], [0, 0, 1, 0], [], []>} : vector<16x128xbf16>, vector<16x128xbf16>, vector<16x16xf32> -> vector<16x16xf32>
    %cst_37 = arith.constant 0.0883883461 : f32
    %128 = vector.broadcast %cst_37 : f32 to vector<16x16xf32>
    %129 = arith.mulf %127, %128 : vector<16x16xf32>
    %130 = arith.addf %129, %21 : vector<16x16xf32>
    %cst_38 = arith.constant dense<0xFF800000> : vector<16xf32>
    %131 = vector.multi_reduction <maximumf>, %130, %cst_38 [1] : vector<16x16xf32> to vector<16xf32>
    %132 = vector.shape_cast %131 : vector<16xf32> to vector<16x1xf32>
    %133 = vector.broadcast %132 : vector<16x1xf32> to vector<16x16xf32>
    %134 = arith.subf %130, %133 : vector<16x16xf32>
    %135 = math.exp %134 : vector<16x16xf32>
    %cst_39 = arith.constant dense<0.000000e+00> : vector<16xf32>
    %136 = vector.multi_reduction <add>, %135, %cst_39 [1] : vector<16x16xf32> to vector<16xf32>
    %137 = vector.shape_cast %136 : vector<16xf32> to vector<16x1xf32>
    %138 = vector.broadcast %137 : vector<16x1xf32> to vector<16x16xf32>
    %139 = arith.divf %135, %138 : vector<16x16xf32>
    %140 = arith.truncf %139 : vector<16x16xf32> to vector<16x16xbf16>
    %cst_40 = arith.constant dense<0.000000e+00> : vector<16x128xf32>
    %141 = tpu.matmul %140, %126, %cst_40 {dimension_numbers = #tpu.dot_dimension_numbers<[1], [0], [0], [1], [0, 0, 1, 1], [], []>} : vector<16x16xbf16>, vector<16x128xbf16>, vector<16x128xf32> -> vector<16x128xf32>
    %c0_41 = arith.constant 0 : index
    %c384 = arith.constant 384 : index
    %142 = vector.load %arg15[%c0_41, %c384] : memref<16x512xf32, #tpu.memory_space<vmem>>, vector<16x128xf32>
    tpu.vector_store %arg15[%c0_41, %c384], %141 {strides = array<i32>} : memref<16x512xf32, #tpu.memory_space<vmem>>, vector<16x128xf32>,
    %c0_42 = arith.constant 0 : index
    %c0_43 = arith.constant 0 : index
    %143 = vector.load %arg15[%c0_42, %c0_43] : memref<16x512xf32, #tpu.memory_space<vmem>>, vector<16x512xf32>
    %144 = arith.truncf %143 : vector<16x512xf32> to vector<16x512xbf16>
    %c0_44 = arith.constant 0 : index
    %c0_45 = arith.constant 0 : index
    %c0_46 = arith.constant 0 : index
    %145 = vector.load %arg8[%c0_44, %c0_45, %c0_46] : memref<1x512x512xbf16, #tpu.memory_space<vmem>>, vector<1x512x512xbf16>
    %146 = vector.shape_cast %145 : vector<1x512x512xbf16> to vector<512x512xbf16>
    %cst_47 = arith.constant dense<0.000000e+00> : vector<16x512xf32>
    %147 = tpu.matmul %144, %146, %cst_47 {dimension_numbers = #tpu.dot_dimension_numbers<[1], [0], [0], [1], [0, 0, 1, 1], [], []>} : vector<16x512xbf16>, vector<512x512xbf16>, vector<16x512xf32> -> vector<16x512xf32>
    %148 = vector.broadcast %14 : vector<1x512xf32> to vector<16x512xf32>
    %149 = arith.addf %147, %148 : vector<16x512xf32>
    %150 = arith.addf %41, %149 : vector<16x512xf32>
    %cst_48 = arith.constant dense<0.000000e+00> : vector<16xf32>
    %151 = vector.multi_reduction <add>, %150, %cst_48 [1] : vector<16x512xf32> to vector<16xf32>
    %152 = vector.shape_cast %151 : vector<16xf32> to vector<16x1xf32>
    %cst_49 = arith.constant 5.120000e+02 : f32
    %153 = vector.broadcast %cst_49 : f32 to vector<16x1xf32>
    %154 = arith.divf %152, %153 : vector<16x1xf32>
    %155 = vector.broadcast %154 : vector<16x1xf32> to vector<16x512xf32>
    %156 = arith.subf %150, %155 : vector<16x512xf32>
    %157 = arith.mulf %156, %156 : vector<16x512xf32>
    %cst_50 = arith.constant dense<0.000000e+00> : vector<16xf32>
    %158 = vector.multi_reduction <add>, %157, %cst_50 [1] : vector<16x512xf32> to vector<16xf32>
    %159 = vector.shape_cast %158 : vector<16xf32> to vector<16x1xf32>
    %cst_51 = arith.constant 0.00195694715 : f32
    %160 = vector.broadcast %cst_51 : f32 to vector<16x1xf32>
    %161 = arith.mulf %159, %160 : vector<16x1xf32>
    %162 = math.sqrt %161 : vector<16x1xf32>
    %cst_52 = arith.constant 9.99999997E-7 : f32
    %163 = vector.broadcast %cst_52 : f32 to vector<16x1xf32>
    %164 = arith.addf %162, %163 : vector<16x1xf32>
    %165 = vector.broadcast %164 : vector<16x1xf32> to vector<16x512xf32>
    %166 = arith.divf %156, %165 : vector<16x512xf32>
    %167 = vector.broadcast %9 : vector<1x512xf32> to vector<16x512xf32>
    %168 = arith.mulf %167, %166 : vector<16x512xf32>
    %169 = vector.broadcast %10 : vector<1x512xf32> to vector<16x512xf32>
    %170 = arith.addf %168, %169 : vector<16x512xf32>
    %171 = arith.truncf %170 : vector<16x512xf32> to vector<16x512xbf16>
    %c0_53 = arith.constant 0 : index
    %c0_54 = arith.constant 0 : index
    %c0_55 = arith.constant 0 : index
    %172 = vector.load %arg9[%c0_53, %c0_54, %c0_55] : memref<1x512x512xbf16, #tpu.memory_space<vmem>>, vector<1x512x512xbf16>
    %173 = vector.shape_cast %172 : vector<1x512x512xbf16> to vector<512x512xbf16>
    %cst_56 = arith.constant dense<0.000000e+00> : vector<16x512xf32>
    %174 = tpu.matmul %171, %173, %cst_56 {dimension_numbers = #tpu.dot_dimension_numbers<[1], [0], [0], [1], [0, 0, 1, 1], [], []>} : vector<16x512xbf16>, vector<512x512xbf16>, vector<16x512xf32> -> vector<16x512xf32>
    %175 = vector.broadcast %15 : vector<1x512xf32> to vector<16x512xf32>
    %176 = arith.addf %174, %175 : vector<16x512xf32>
    %cst_57 = arith.constant 0.000000e+00 : f32
    %177 = vector.broadcast %cst_57 : f32 to vector<16x512xf32>
    %178 = arith.maximumf %176, %177 : vector<16x512xf32>
    %179 = arith.truncf %178 : vector<16x512xf32> to vector<16x512xbf16>
    %c0_58 = arith.constant 0 : index
    %c0_59 = arith.constant 0 : index
    %c0_60 = arith.constant 0 : index
    %180 = vector.load %arg10[%c0_58, %c0_59, %c0_60] : memref<1x512x512xbf16, #tpu.memory_space<vmem>>, vector<1x512x512xbf16>
    %181 = vector.shape_cast %180 : vector<1x512x512xbf16> to vector<512x512xbf16>
    %cst_61 = arith.constant dense<0.000000e+00> : vector<16x512xf32>
    %182 = tpu.matmul %179, %181, %cst_61 {dimension_numbers = #tpu.dot_dimension_numbers<[1], [0], [0], [1], [0, 0, 1, 1], [], []>} : vector<16x512xbf16>, vector<512x512xbf16>, vector<16x512xf32> -> vector<16x512xf32>
    %183 = arith.addf %150, %182 : vector<16x512xf32>
    %184 = vector.broadcast %16 : vector<1x512xf32> to vector<16x512xf32>
    %185 = arith.addf %183, %184 : vector<16x512xf32>
    %cst_62 = arith.constant dense<0.000000e+00> : vector<16x4xf32>
    %186 = tpu.matmul %185, %19, %cst_62 {dimension_numbers = #tpu.dot_dimension_numbers<[1], [1], [0], [0], [0, 0, 1, 0], [], []>} : vector<16x512xf32>, vector<4x512xf32>, vector<16x4xf32> -> vector<16x4xf32>
    %cst_63 = arith.constant dense<0.000000e+00> : vector<16x4xf32>
    %187 = tpu.matmul %4, %20, %cst_63 {dimension_numbers = #tpu.dot_dimension_numbers<[1], [1], [0], [0], [0, 0, 1, 0], [], []>} : vector<16x4xf32>, vector<4x4xf32>, vector<16x4xf32> -> vector<16x4xf32>
    %188 = arith.addf %186, %187 : vector<16x4xf32>
    %189 = vector.broadcast %18 : vector<1x4xf32> to vector<16x4xf32>
    %190 = arith.addf %188, %189 : vector<16x4xf32>
    %191 = vector.broadcast %17 : vector<1x512xf32> to vector<16x512xf32>
    %192 = arith.mulf %185, %191 : vector<16x512xf32>
    %cst_64 = arith.constant dense<0.000000e+00> : vector<16xf32>
    %193 = vector.multi_reduction <add>, %192, %cst_64 [1] : vector<16x512xf32> to vector<16xf32>
    %194 = vector.shape_cast %193 : vector<16xf32> to vector<16x1xf32>
    %cst_65 = arith.constant 0.000000e+00 : f32
    %195 = vector.broadcast %cst_65 : f32 to vector<16x1xf32>
    %196 = arith.maximumf %194, %195 : vector<16x1xf32>
    %cst_66 = arith.constant 0.00999999977 : f32
    %197 = vector.broadcast %cst_66 : f32 to vector<16x1xf32>
    %198 = arith.addf %196, %197 : vector<16x1xf32>
    %199 = arith.truncf %185 : vector<16x512xf32> to vector<16x512xbf16>
    %c0_67 = arith.constant 0 : index
    %c0_68 = arith.constant 0 : index
    %c0_69 = arith.constant 0 : index
    %200 = vector.load %arg11[%c0_67, %c0_68, %c0_69] : memref<1x512x512xbf16, #tpu.memory_space<vmem>>, vector<1x512x512xbf16>
    %201 = vector.shape_cast %200 : vector<1x512x512xbf16> to vector<512x512xbf16>
    %cst_70 = arith.constant dense<0.000000e+00> : vector<16x512xf32>
    %202 = tpu.matmul %199, %201, %cst_70 {dimension_numbers = #tpu.dot_dimension_numbers<[1], [0], [0], [1], [0, 0, 1, 1], [], []>} : vector<16x512xbf16>, vector<512x512xbf16>, vector<16x512xf32> -> vector<16x512xf32>
    %203 = arith.truncf %202 : vector<16x512xf32> to vector<16x512xbf16>
    %cst_71 = arith.constant dense<0.000000e+00> : vector<16x16xf32>
    %204 = tpu.matmul %203, %203, %cst_71 {dimension_numbers = #tpu.dot_dimension_numbers<[1], [1], [0], [0], [0, 0, 1, 0], [], []>} : vector<16x512xbf16>, vector<16x512xbf16>, vector<16x16xf32> -> vector<16x16xf32>
    %205 = vector.broadcast %198 : vector<16x1xf32> to vector<16x16xf32>
    %206 = arith.divf %204, %205 : vector<16x16xf32>
    %c0_72 = arith.constant 0 : index
    %c0_73 = arith.constant 0 : index
    %207 = vector.load %arg4[%c0_72, %c0_73] : memref<16x16xf32, #tpu.memory_space<vmem>>, vector<16x16xf32>
    %208 = arith.addf %206, %207 : vector<16x16xf32>
    %cst_74 = arith.constant dense<0xFF800000> : vector<16xf32>
    %209 = vector.multi_reduction <maximumf>, %208, %cst_74 [1] : vector<16x16xf32> to vector<16xf32>
    %210 = vector.shape_cast %209 : vector<16xf32> to vector<16x1xf32>
    %211 = vector.broadcast %210 : vector<16x1xf32> to vector<16x16xf32>
    %212 = arith.subf %208, %211 : vector<16x16xf32>
    %213 = math.exp %212 : vector<16x16xf32>
    %cst_75 = arith.constant dense<0.000000e+00> : vector<16xf32>
    %214 = vector.multi_reduction <add>, %213, %cst_75 [1] : vector<16x16xf32> to vector<16xf32>
    %215 = vector.shape_cast %214 : vector<16xf32> to vector<16x1xf32>
    %216 = vector.broadcast %215 : vector<16x1xf32> to vector<16x16xf32>
    %217 = arith.divf %213, %216 : vector<16x16xf32>
    %c0_76 = arith.constant 0 : index
    %c0_77 = arith.constant 0 : index
    %218 = vector.load %arg5[%c0_76, %c0_77] : memref<16x1xf32, #tpu.memory_space<vmem>>, vector<16x1xf32>
    %219 = vector.broadcast %218 : vector<16x1xf32> to vector<16x16xf32>
    %220 = arith.mulf %217, %219 : vector<16x16xf32>
    %c0_78 = arith.constant 0 : index
    %c0_79 = arith.constant 0 : index
    %221 = vector.load %arg6[%c0_78, %c0_79] : memref<16x16xf32, #tpu.memory_space<vmem>>, vector<16x16xf32>
    %222 = arith.addf %220, %221 : vector<16x16xf32>
    %cst_80 = arith.constant dense<0.000000e+00> : vector<16x4xf32>
    %223 = tpu.matmul %222, %190, %cst_80 {dimension_numbers = #tpu.dot_dimension_numbers<[1], [0], [0], [1], [0, 0, 1, 1], [], []>} : vector<16x16xf32>, vector<16x4xf32>, vector<16x4xf32> -> vector<16x4xf32>
    %c0_81 = arith.constant 0 : index
    %c0_82 = arith.constant 0 : index
    %224 = vector.load %arg14[%c0_81, %c0_82] : memref<16x512xf32, #tpu.memory_space<vmem>>, vector<16x512xf32>
    tpu.vector_store %arg14[%c0_81, %c0_82], %185 {strides = array<i32>} : memref<16x512xf32, #tpu.memory_space<vmem>>, vector<16x512xf32>,
    %c0_83 = arith.constant 0 : index
    %c0_84 = arith.constant 0 : index
    %225 = vector.load %arg13[%c0_83, %c0_84] : memref<16x4xf32, #tpu.memory_space<vmem>>, vector<16x4xf32>
    tpu.vector_store %arg13[%c0_83, %c0_84], %223 {strides = array<i32>} : memref<16x4xf32, #tpu.memory_space<vmem>>, vector<16x4xf32>,
    return
  }
  func.func @transform_0(%arg0: i32) -> (i32, i32) {
    %c0_i32 = arith.constant 0 : i32
    %c0_i32_0 = arith.constant 0 : i32
    %c0_i32_1 = arith.constant 0 : i32
    return %c0_i32, %c0_i32_0 : i32, i32
  }
  func.func @transform_1(%arg0: i32) -> (i32, i32) {
    %c0_i32 = arith.constant 0 : i32
    %c0_i32_0 = arith.constant 0 : i32
    %c0_i32_1 = arith.constant 0 : i32
    return %c0_i32, %c0_i32_0 : i32, i32
  }
  func.func @transform_2(%arg0: i32) -> (i32, i32) {
    %c0_i32 = arith.constant 0 : i32
    %c0_i32_0 = arith.constant 0 : i32
    %c0_i32_1 = arith.constant 0 : i32
    return %c0_i32, %c0_i32_0 : i32, i32
  }
  func.func @transform_3(%arg0: i32) -> (i32, i32) {
    %c0_i32 = arith.constant 0 : i32
    %c0_i32_0 = arith.constant 0 : i32
    %c0_i32_1 = arith.constant 0 : i32
    return %c0_i32, %c0_i32_0 : i32, i32
  }
  func.func @transform_4(%arg0: i32) -> (i32, i32) {
    %c0_i32 = arith.constant 0 : i32
    %c0_i32_0 = arith.constant 0 : i32
    %c0_i32_1 = arith.constant 0 : i32
    return %c0_i32, %c0_i32_0 : i32, i32
  }
  func.func @transform_5(%arg0: i32) -> (i32, i32) {
    %c0_i32 = arith.constant 0 : i32
    %c0_i32_0 = arith.constant 0 : i32
    %c0_i32_1 = arith.constant 0 : i32
    return %c0_i32, %c0_i32_0 : i32, i32
  }
  func.func @transform_6(%arg0: i32) -> (i32, i32, i32) {
    %c0_i32 = arith.constant 0 : i32
    %c0_i32_0 = arith.constant 0 : i32
    %c0_i32_1 = arith.constant 0 : i32
    return %arg0, %c0_i32, %c0_i32_0 : i32, i32, i32
  }
  func.func @transform_7(%arg0: i32) -> (i32, i32, i32) {
    %c0_i32 = arith.constant 0 : i32
    %c0_i32_0 = arith.constant 0 : i32
    %c0_i32_1 = arith.constant 0 : i32
    return %arg0, %c0_i32, %c0_i32_0 : i32, i32, i32
  }
  func.func @transform_8(%arg0: i32) -> (i32, i32, i32) {
    %c0_i32 = arith.constant 0 : i32
    %c0_i32_0 = arith.constant 0 : i32
    %c0_i32_1 = arith.constant 0 : i32
    return %arg0, %c0_i32, %c0_i32_0 : i32, i32, i32
  }
  func.func @transform_9(%arg0: i32) -> (i32, i32, i32) {
    %c0_i32 = arith.constant 0 : i32
    %c0_i32_0 = arith.constant 0 : i32
    %c0_i32_1 = arith.constant 0 : i32
    return %arg0, %c0_i32, %c0_i32_0 : i32, i32, i32
  }
  func.func @transform_10(%arg0: i32) -> (i32, i32, i32) {
    %c0_i32 = arith.constant 0 : i32
    %c0_i32_0 = arith.constant 0 : i32
    %c0_i32_1 = arith.constant 0 : i32
    return %arg0, %c0_i32, %c0_i32_0 : i32, i32, i32
  }
  func.func @transform_11(%arg0: i32) -> (i32, i32, i32) {
    %c0_i32 = arith.constant 0 : i32
    %c0_i32_0 = arith.constant 0 : i32
    %c0_i32_1 = arith.constant 0 : i32
    return %arg0, %c0_i32, %c0_i32_0 : i32, i32, i32
  }
  func.func @transform_12(%arg0: i32) -> (i32, i32) {
    %c0_i32 = arith.constant 0 : i32
    %c0_i32_0 = arith.constant 0 : i32
    %c0_i32_1 = arith.constant 0 : i32
    return %c0_i32, %c0_i32_0 : i32, i32
  }
}

</mosaic_0001>

<bundles_post_ra>
// kernel: tpu_custom_call.1
= control target key start
LH: loop header
LB: loop body
LE: loop exit
PB: predicated region body
PF: predicated region fallthrough
CT: control target
= control target key end

     0   :  { %s13809_s0 = inlined_call_operand.hbm [shape: f32[16,512], index: 0, kind: input, shape index: {}]   ;;  %s13810_s1 = inlined_call_operand.vmem [shape: f32[16,4], index: 1, kind: input, shape index: {}]   ;;  %s13811_s2 = inlined_call_operand.hbm [shape: f32[16,16], index: 2, kind: input, shape index: {}]   ;;  %s13812_s3 = inlined_call_operand.hbm [shape: f32[16,16], index: 3, kind: input, shape index: {}]   ;;  %s13813_s4 = inlined_call_operand.vmem [shape: f32[16,1], index: 4, kind: input, shape index: {}]   ;;  %s13814_s5 = inlined_call_operand.hbm [shape: f32[16,16], index: 5, kind: input, shape index: {}]   ;;  %s13815_s6 = inlined_call_operand.hbm [shape: bf16[2,512,1536], index: 6, kind: input, shape index: {}]   ;;  %s13816_s7 = inlined_call_operand.hbm [shape: bf16[2,512,512], index: 7, kind: input, shape index: {}]   ;;  %s13817_s8 = inlined_call_operand.hbm [shape: bf16[2,512,512], index: 8, kind: input, shape index: {}]   ;;  %s13818_s9 = inlined_call_operand.hbm [shape: bf16[2,512,512], index: 9, kind: input, shape index: {}]   ;;  %s13819_s10 = inlined_call_operand.hbm [shape: bf16[2,512,512], index: 10, kind: input, shape index: {}]   ;;  %s13820_s11 = inlined_call_operand.hbm [shape: f32[2,24,512], index: 11, kind: input, shape index: {}]   ;;  %s13821_s12 = inlined_call_operand.vmem [shape: f32[16,4], index: 12, kind: output, shape index: {}]  }
   0x1   :  { %13849 = sst [smem:[#allocation27_spill]] %s13809_s0 }
   0x2   :  { %13850 = sst [smem:[#allocation28_spill]] %s13810_s1 }
   0x3   :  { %13851 = sst [smem:[#allocation29_spill]] %s13813_s4 }
   0x4   :  { %13852 = sst [smem:[#allocation30_spill]] %s13815_s6 }
   0x5   :  { %13853 = sst [smem:[#allocation31_spill]] %s13816_s7 }
   0x6   :  { %13854 = sst [smem:[#allocation32_spill]] %s13817_s8 }
   0x7   :  { %13855 = sst [smem:[#allocation33_spill]] %s13821_s12 }
   0x8   :  { %17 = vsyncpa [#allocation5], 0 }
   0x9   :  { %18 = vsyncpa [#allocation7], 0 }
   0xa   :  { %19 = vsyncpa [#allocation10], 0  ;;  %s11927_s21 = smov 0   ;;  %s11929_s22 = smov 0  }
   0xb   :  { %s11931_s23 = smov 0   ;;  %s11933_s24 = smov 0  }
   0xc LB: > { %13856 = sst [smem:[#allocation21_spill]] %s11831_s22  ;;  %s11946_s25 = sadd.s32 4294967295, %s11839_s24   ;;  %s11839_s24 = sphi %s11933_s24, %s13897_s24   ;;  %s11835_s23 = sphi %s11931_s23, %s13900_s23   ;;  %s11831_s22 = sphi %s11929_s22, %s13899_s22   ;;  %s11827_s21 = sphi %s11927_s21, %s13898_s21  }
   0xd   : > { %13857 = sst [smem:[#allocation22_spill]] %s11835_s23  ;;  %p171_p0 = scmp.ne.s32.totalorder %s11831_s22, %s11827_s21 }
   0xe   : > { %13858 = sst [smem:[#allocation23_spill]] %s11946_s25  ;;  %p13823_p1 = scmp.eq.s32.totalorder %s11946_s25, 0 }
   0xf   : > { %p8859_p2 = scmp.ge.s32.totalorder %s11839_s24, 1  ;;  %p333_p3 = scmp.lt.s32.totalorder %s11839_s24, 3 }
  0x10   : > { %p11955_p5 = por %p13823_p1, %p171_p0  ;;  %s11841_s28 = smov [#allocation4]  }
  0x11   : > { %p11959_p6 = pnand %p8859_p2, %p333_p3  ;;  %s345_s29 = sshll.u32 %s11841_s28, 4  ;;  %s346_s29 = int_to_ptr.vmem [resolvable:$true] %s345_s29 }
  0x12   : > { %s13859_s26 = scalar_select %p11955_p5, 1, 0 }
  0x13   : > { %s13861_s27 = scalar_select %p11959_p6, 1, 0 }
  0x14   : > { %13860 = sst [smem:[#allocation24_spill]] %s13859_s26  ;;  %p9997_p7 = pneg %p11959_p6 }
  0x15   : > { %s11972_s13 = sadd.s32 1, %s11839_s24   ;;  %s158_s14 = sadd.s32 1, %s11835_s23 }
  0x16   : > { %p11967_p8 = pnand %p9997_p7, %p13823_p1  ;;  %13863 = sst [smem:[#allocation25_spill]] %s11972_s13 }
  0x17   : > { %s155_s15 = ssub.s32 %s11839_s24, %s11972_s13  ;;  %s13864_s0 = sld [smem:[#allocation27_spill]] }
  0x18   : > { %s13862_s30 = scalar_select %p11967_p8, 1, 0 }
  0x19   : > { %p11985_p10 = pneg %p11967_p8 }
  0x1b   : > { %s13865_s21 = scalar_select %p11985_p10, 1, 0 }
  0x1d   : > { %s11501_s18 = scalar_lea.hbm %s13864_s0, 1024 }
  0x1e   : > { %p11502_p9 = scmp.ne.s32.totalorder %s13864_s0, %s11501_s18  ;;  %p11508_p13 = scmp.lt.u32.totalorder %s11501_s18, %s13864_s0 }
  0x20   : > { %p11504_p11 = pnand %p11985_p10, %p11502_p9 }
  0x22   : > { %p11505_p12 = pneg %p11504_p11 }
  0x24   : > { %p11510_p0 = pnand %p11508_p13, %p11505_p12 }
  0x26   : > { %11513 = shalt.err (!%p11510_p0)
}
  0x27   : > { %s11514_s16 = scalar_lea.vmem %s346_s29, 1024  ;;  %p11522_p4 = scmp.lt.s32.totalorder %s346_s29, %s346_s29 }
  0x28   : > { %p11515_p2 = scmp.ne.s32.totalorder %s346_s29, %s11514_s16  ;;  %p11523_p1 = scmp.lt.s32.totalorder %s11514_s16, %s11514_s16 }
  0x2a   : > { %p11517_p3 = pnand %p11515_p2, %p11985_p10  ;;  %p11524_p5 = por %p11523_p1, %p11522_p4 }
  0x2c   : > { %p11518_p7 = pneg %p11517_p3 }
  0x2e   : > { %p11525_p6 = pnand %p11524_p5, %p11518_p7 }
  0x30   : > { %11528 = shalt.err (!%p11525_p6)
}
  0x31   : > { %s13831_s17 = smov 512   ;;  %s13832_s4 = smov 32  }
  0x32   : > { %10000 = dma.hbm_to_vmem [thread:$0]  (!%p11967_p8), %s13864_s0, 1024, %s346_s29, [#allocation5], %s13831_s17, %s13831_s17, %s13832_s4  }
  0x33   : > { %p156_p1 = scmp.eq.s32.totalorder %s155_s15, 0  ;;  %p165_p4 = scmp.ne.s32.totalorder %s11835_s23, %s11831_s22 }
  0x34   : > { %p166_p5 = scmp.eq.s32.totalorder %s11839_s24, 0  ;;  %p10033_p6 = scmp.lt.s32.totalorder %s11839_s24, 2 }
  0x35   : > { %s12009_s20 = scalar_select %p156_p1, %s11835_s23, %s158_s14  }
  0x36   : > { %p167_p9 = por %p166_p5, %p165_p4  ;;  %s404_s28 = sand.u32 1, %s11839_s24  }
  0x37   : > { %13866 = sst [smem:[#allocation26_spill]] %s12009_s20  ;;  %s12013_s16 = sand.u32 1, %s11835_s23  }
  0x38   : > { %s9963_s13 = smul.u32 3072, %s12013_s16  ;;  %p12016_p11 = pnand %p10033_p6, %p167_p9 }
  0x39   : > { %s9964_s1 = smul.u32 49152, %s11839_s24  ;;  %s13868_s6 = sld [smem:[#allocation30_spill]] }
  0x3a   : > { %s13867_s12 = scalar_select %p12016_p11, 1, 0 }
  0x3b   : > { %s408_s14 = scalar_lea.vmem [#allocation11], %s9963_s13  ;;  %s12028_s17 = scalar_lea.sflag [#allocation5], %s404_s28 }
  0x3c   : > { %s415_s19 = sshll.u32 %s408_s14, 4  ;;  %p12034_p13 = pneg %p12016_p11  ;;  %s12026_s19 = int_to_ptr.vmem [resolvable:$true] %s415_s19 }
  0x3e   : > { %s13869_s0 = scalar_select %p12034_p13, 1, 0 }
  0x3f   : > { %s12024_s15 = scalar_lea.hbm %s13868_s6, %s9964_s1  ;;  %s11534_s13 = scalar_lea.hbm %s13868_s6, 98304 }
  0x40   : > { %s11529_s4 = scalar_lea.hbm %s12024_s15, 49152  ;;  %p11535_p3 = scmp.lt.u32.totalorder %s12024_s15, %s13868_s6 }
  0x41   : > { %p11530_p12 = scmp.ne.s32.totalorder %s12024_s15, %s11529_s4  ;;  %p11536_p7 = scmp.lt.u32.totalorder %s11534_s13, %s11529_s4 }
  0x42   : > { %p11538_p4 = scmp.lt.u32.totalorder %s11529_s4, %s12024_s15 }
  0x43   : > { %p11532_p0 = pnand %p12034_p13, %p11530_p12  ;;  %p11537_p1 = por %p11536_p7, %p11535_p3 }
  0x45   : > { %p11533_p2 = pneg %p11532_p0  ;;  %p11539_p5 = por %p11538_p4, %p11537_p1 }
  0x47   : > { %p11540_p6 = pnand %p11539_p5, %p11533_p2 }
  0x49   : > { %11543 = shalt.err (!%p11540_p6)
}
  0x4a   : > { %s11544_s28 = scalar_lea.vmem %s12026_s19, 49152  ;;  %s11844_s1 = smov [#allocation11]  }
  0x4b   : > { %p11545_p9 = scmp.ne.s32.totalorder %s12026_s19, %s11544_s28  ;;  %s11549_s18 = sshll.u32 %s11844_s1, 4  ;;  %s11550_s18 = int_to_ptr.vmem [resolvable:$false] %s11549_s18 }
  0x4c   : > { %s11551_s29 = scalar_lea.vmem %s11550_s18, 98304  ;;  %p11552_p8 = scmp.lt.s32.totalorder %s12026_s19, %s11550_s18 }
  0x4d   : > { %p11547_p12 = pnand %p11545_p9, %p12034_p13  ;;  %p11553_p10 = scmp.lt.s32.totalorder %s11551_s29, %s11544_s28 }
  0x4f   : > { %p11548_p0 = pneg %p11547_p12  ;;  %p11554_p3 = por %p11553_p10, %p11552_p8 }
  0x51   : > { %p11555_p7 = pnand %p11554_p3, %p11548_p0 }
  0x53   : > { %11558 = shalt.err (!%p11555_p7)
}
  0x54   : > { %s11845_s4 = smov 768   ;;  %s11846_s13 = smov 48  }
  0x55   : > { %10013 = dma.hbm_to_vmem [thread:$0]  (!%p12016_p11), %s12024_s15, 49152, %s12026_s19, %s12028_s17, %s11845_s4, %s11845_s4, %s11846_s13  }
  0x56   : > { %s12059_s14 = sshll.u32 %s12013_s16, 10  ;;  %s12062_s1 = sshll.u32 %s11839_s24, 14 }
  0x57   : > { %s13870_s7 = sld [smem:[#allocation31_spill]]  ;;  %s429_s6 = scalar_lea.vmem [#allocation12], %s12059_s14 }
  0x58   : > { %s436_s20 = sshll.u32 %s429_s6, 4  ;;  %s12071_s20 = int_to_ptr.vmem [resolvable:$true] %s436_s20 }
  0x5d   : > { %s12068_s29 = scalar_lea.hbm %s13870_s7, %s12062_s1  ;;  %s11564_s13 = scalar_lea.hbm %s13870_s7, 32768 }
  0x5e   : > { %s11559_s15 = scalar_lea.hbm %s12068_s29, 16384  ;;  %p11565_p1 = scmp.lt.u32.totalorder %s12068_s29, %s13870_s7 }
  0x5f   : > { %p11560_p8 = scmp.ne.s32.totalorder %s12068_s29, %s11559_s15  ;;  %p11566_p4 = scmp.lt.u32.totalorder %s11564_s13, %s11559_s15 }
  0x60   : > { %p11568_p6 = scmp.lt.u32.totalorder %s11559_s15, %s12068_s29 }
  0x61   : > { %p11562_p10 = pnand %p11560_p8, %p12034_p13  ;;  %p11567_p5 = por %p11566_p4, %p11565_p1 }
  0x63   : > { %p11563_p2 = pneg %p11562_p10  ;;  %p11569_p9 = por %p11568_p6, %p11567_p5 }
  0x65   : > { %p11570_p12 = pnand %p11569_p9, %p11563_p2 }
  0x67   : > { %11573 = shalt.err (!%p11570_p12)
}
  0x68   : > { %s11574_s6 = scalar_lea.vmem %s12071_s20, 16384  ;;  %s11847_s19 = smov [#allocation12]  }
  0x69   : > { %p11575_p0 = scmp.ne.s32.totalorder %s12071_s20, %s11574_s6  ;;  %s11579_s4 = sshll.u32 %s11847_s19, 4  ;;  %s11580_s4 = int_to_ptr.vmem [resolvable:$false] %s11579_s4 }
  0x6a   : > { %s11581_s28 = scalar_lea.vmem %s11580_s4, 32768  ;;  %p11582_p8 = scmp.lt.s32.totalorder %s12071_s20, %s11580_s4 }
  0x6b   : > { %p11577_p3 = pnand %p11575_p0, %p12034_p13  ;;  %p11583_p10 = scmp.lt.s32.totalorder %s11581_s28, %s11574_s6 }
  0x6d   : > { %p11578_p7 = pneg %p11577_p3  ;;  %p11584_p1 = por %p11583_p10, %p11582_p8 }
  0x6f   : > { %p11585_p4 = pnand %p11584_p1, %p11578_p7 }
  0x71   : > { %11588 = shalt.err (!%p11585_p4)
}
  0x72   : > { %s13841_s15 = smov 256   ;;  %s11849_s13 = smov 16  }
  0x73   : > { %10016 = dma.hbm_to_vmem [thread:$0]  (!%p12016_p11), %s12068_s29, 16384, %s12071_s20, %s12028_s17, %s13841_s15, %s13841_s15, %s11849_s13  }
  0x74   : > { %s13871_s8 = sld [smem:[#allocation32_spill]]  ;;  %s450_s4 = scalar_lea.vmem [#allocation13], %s12059_s14 }
  0x75   : > { %s457_s28 = sshll.u32 %s450_s4, 4  ;;  %s12111_s26 = scalar_lea.hbm %s13818_s9, %s12062_s1  ;;  %s12105_s28 = int_to_ptr.vmem [resolvable:$true] %s457_s28 }
  0x7a   : > { %s12102_s19 = scalar_lea.hbm %s13871_s8, %s12062_s1  ;;  %s11594_s18 = scalar_lea.hbm %s13871_s8, 32768 }
  0x7b   : > { %s11589_s22 = scalar_lea.hbm %s12102_s19, 16384  ;;  %p11595_p9 = scmp.lt.u32.totalorder %s12102_s19, %s13871_s8 }
  0x7c   : > { %p11590_p2 = scmp.ne.s32.totalorder %s12102_s19, %s11589_s22  ;;  %p11596_p12 = scmp.lt.u32.totalorder %s11594_s18, %s11589_s22 }
  0x7d   : > { %p11598_p3 = scmp.lt.u32.totalorder %s11589_s22, %s12102_s19 }
  0x7e   : > { %p11592_p5 = pnand %p11590_p2, %p12034_p13  ;;  %p11597_p0 = por %p11596_p12, %p11595_p9 }
  0x80   : > { %p11593_p6 = pneg %p11592_p5  ;;  %p11599_p7 = por %p11598_p3, %p11597_p0 }
  0x82   : > { %p11600_p8 = pnand %p11599_p7, %p11593_p6 }
  0x84   : > { %11603 = shalt.err (!%p11600_p8)
}
  0x85   : > { %s11604_s7 = scalar_lea.vmem %s12105_s28, 16384  ;;  %s11850_s23 = smov [#allocation13]  }
  0x86   : > { %p11605_p10 = scmp.ne.s32.totalorder %s12105_s28, %s11604_s7  ;;  %s11609_s4 = sshll.u32 %s11850_s23, 4  ;;  %s11610_s4 = int_to_ptr.vmem [resolvable:$false] %s11609_s4 }
  0x87   : > { %s11611_s15 = scalar_lea.vmem %s11610_s4, 32768  ;;  %p11612_p2 = scmp.lt.s32.totalorder %s12105_s28, %s11610_s4 }
  0x88   : > { %p11607_p1 = pnand %p11605_p10, %p12034_p13  ;;  %p11613_p5 = scmp.lt.s32.totalorder %s11611_s15, %s11604_s7 }
  0x8a   : > { %p11608_p4 = pneg %p11607_p1  ;;  %p11614_p9 = por %p11613_p5, %p11612_p2 }
  0x8c   : > { %p11615_p12 = pnand %p11614_p9, %p11608_p4 }
  0x8e   : > { %11618 = shalt.err (!%p11615_p12)
}
  0x8f   : > { %s13872_s22 = smov 256   ;;  %s471_s20 = scalar_lea.vmem [#allocation14], %s12059_s14 }
  0x90   : > { %10019 = dma.hbm_to_vmem [thread:$0]  (!%p12016_p11), %s12102_s19, 16384, %s12105_s28, %s12028_s17, %s13872_s22, %s13872_s22, %s11849_s13  }
  0x91   : > { %s478_s29 = sshll.u32 %s471_s20, 4  ;;  %s11851_s18 = smov [#allocation6]   ;;  %s12139_s29 = int_to_ptr.vmem [resolvable:$true] %s478_s29 }
  0x92   : > { %s12141_s6 = sshll.u32 %s11851_s18, 4  ;;  %s11619_s7 = scalar_lea.hbm %s12111_s26, 16384  ;;  %s362_s6 = int_to_ptr.vmem [resolvable:$true] %s12141_s6 }
  0x93   : > { %p11620_p6 = scmp.ne.s32.totalorder %s12111_s26, %s11619_s7  ;;  %s11624_s15 = scalar_lea.hbm %s13818_s9, 32768 }
  0x94   : > { %p11625_p7 = scmp.lt.u32.totalorder %s12111_s26, %s13818_s9  ;;  %p11626_p8 = scmp.lt.u32.totalorder %s11624_s15, %s11619_s7 }
  0x95   : > { %p11622_p0 = pnand %p11620_p6, %p12034_p13  ;;  %p11628_p1 = scmp.lt.u32.totalorder %s11619_s7, %s12111_s26 }
  0x96   : > { %p11627_p10 = por %p11626_p8, %p11625_p7 }
  0x97   : > { %p11623_p3 = pneg %p11622_p0 }
  0x98   : > { %p11629_p4 = por %p11628_p1, %p11627_p10 }
  0x9a   : > { %p11630_p2 = pnand %p11629_p4, %p11623_p3 }
  0x9c   : > { %11633 = shalt.err (!%p11630_p2)
}
  0x9d   : > { %s11634_s19 = scalar_lea.vmem %s12139_s29, 16384  ;;  %s11852_s28 = smov [#allocation14]  }
  0x9e   : > { %p11635_p5 = scmp.ne.s32.totalorder %s12139_s29, %s11634_s19  ;;  %s11639_s20 = sshll.u32 %s11852_s28, 4  ;;  %s11640_s20 = int_to_ptr.vmem [resolvable:$false] %s11639_s20 }
  0x9f   : > { %s11641_s8 = scalar_lea.vmem %s11640_s20, 32768  ;;  %p11642_p6 = scmp.lt.s32.totalorder %s12139_s29, %s11640_s20 }
  0xa0   : > { %p11637_p9 = pnand %p11635_p5, %p12034_p13  ;;  %p11643_p0 = scmp.lt.s32.totalorder %s11641_s8, %s11634_s19 }
  0xa2   : > { %p11638_p12 = pneg %p11637_p9  ;;  %p11644_p7 = por %p11643_p0, %p11642_p6 }
  0xa4   : > { %p11645_p8 = pnand %p11644_p7, %p11638_p12 }
  0xa6   : > { %11648 = shalt.err (!%p11645_p8)
}
  0xa7   : > { %10022 = dma.hbm_to_vmem [thread:$0]  (!%p12016_p11), %s12111_s26, 16384, %s12139_s29, %s12028_s17, %s13872_s22, %s13872_s22, %s11849_s13  }
  0xa8   : > { %s11649_s7 = scalar_lea.hbm %s13811_s2, 256  ;;  %p13873_p10 = scmp.ne.s32.totalorder %s13865_s21, 0 }
  0xa9   : > { %p11650_p3 = scmp.ne.s32.totalorder %s13811_s2, %s11649_s7  ;;  %p11656_p2 = scmp.lt.u32.totalorder %s11649_s7, %s13811_s2 }
  0xab   : > { %p11652_p1 = pnand %p11650_p3, %p13873_p10 }
  0xad   : > { %p11653_p4 = pneg %p11652_p1 }
  0xaf   : > { %p11658_p5 = pnand %p11656_p2, %p11653_p4 }
  0xb1   : > { %11661 = shalt.err (!%p11658_p5)
}
  0xb2   : > { %s11662_s28 = scalar_lea.vmem %s362_s6, 256  ;;  %p11670_p0 = scmp.lt.s32.totalorder %s362_s6, %s362_s6 }
  0xb3   : > { %p11663_p9 = scmp.ne.s32.totalorder %s362_s6, %s11662_s28  ;;  %p11671_p7 = scmp.lt.s32.totalorder %s11662_s28, %s11662_s28 }
  0xb5   : > { %p11665_p12 = pnand %p11663_p9, %p13873_p10  ;;  %p11672_p8 = por %p11671_p7, %p11670_p0 }
  0xb7   : > { %p11666_p6 = pneg %p11665_p12 }
  0xb9   : > { %p11673_p11 = pnand %p11672_p8, %p11666_p6 }
  0xbb   : > { %11676 = shalt.err (!%p11673_p11)
}
  0xbc   : > { %s11853_s26 = smov 128   ;;  %s11854_s29 = smov 8  }
  0xbd   : > { %p13874_p3 = scmp.ne.s32.totalorder %s13862_s30, 0  ;;  %s12194_s7 = scalar_lea.hbm %s13819_s10, %s12062_s1 }
  0xbe   : > { %s492_s23 = scalar_lea.vmem [#allocation15], %s12059_s14  ;;  %s11677_s15 = scalar_lea.hbm %s12194_s7, 16384 }
  0xbf   : > { %10003 = dma.hbm_to_vmem [thread:$0]  (!%p13874_p3), %s13811_s2, 256, %s362_s6, [#allocation7], %s11853_s26, %s11853_s26, %s11854_s29  }
  0xc0   : > { %s499_s4 = sshll.u32 %s492_s23, 4  ;;  %p11678_p11 = scmp.ne.s32.totalorder %s12194_s7, %s11677_s15  ;;  %s12197_s4 = int_to_ptr.vmem [resolvable:$true] %s499_s4 }
  0xc1   : > { %s11682_s28 = scalar_lea.hbm %s13819_s10, 32768  ;;  %p11683_p2 = scmp.lt.u32.totalorder %s12194_s7, %s13819_s10 }
  0xc2   : > { %p11680_p1 = pnand %p11678_p11, %p12034_p13  ;;  %p11684_p5 = scmp.lt.u32.totalorder %s11682_s28, %s11677_s15 }
  0xc3   : > { %p11686_p12 = scmp.lt.u32.totalorder %s11677_s15, %s12194_s7 }
  0xc4   : > { %p11681_p4 = pneg %p11680_p1  ;;  %p11685_p9 = por %p11684_p5, %p11683_p2 }
  0xc6   : > { %p11687_p6 = por %p11686_p12, %p11685_p9 }
  0xc8   : > { %p11688_p0 = pnand %p11687_p6, %p11681_p4 }
  0xca   : > { %11691 = shalt.err (!%p11688_p0)
}
  0xcb   : > { %s11692_s14 = scalar_lea.vmem %s12197_s4, 16384  ;;  %s11855_s8 = smov [#allocation15]  }
  0xcc   : > { %p11693_p7 = scmp.ne.s32.totalorder %s12197_s4, %s11692_s14  ;;  %s11697_s25 = sshll.u32 %s11855_s8, 4  ;;  %s11698_s25 = int_to_ptr.vmem [resolvable:$false] %s11697_s25 }
  0xcd   : > { %s11699_s18 = scalar_lea.vmem %s11698_s25, 32768  ;;  %p11700_p1 = scmp.lt.s32.totalorder %s12197_s4, %s11698_s25 }
  0xce   : > { %p11695_p8 = pnand %p11693_p7, %p12034_p13  ;;  %p11701_p3 = scmp.lt.s32.totalorder %s11699_s18, %s11692_s14 }
  0xd0   : > { %p11696_p11 = pneg %p11695_p8  ;;  %p11702_p2 = por %p11701_p3, %p11700_p1 }
  0xd2   : > { %p11703_p5 = pnand %p11702_p2, %p11696_p11 }
  0xd4   : > { %11706 = shalt.err (!%p11703_p5)
}
  0xd5   : > { %p13875_p4 = scmp.ne.s32.totalorder %s13867_s12, 0  ;;  %s11856_s23 = smov [#allocation8]  }
  0xd6   : > { %s374_s15 = sshll.u32 %s11856_s23, 4  ;;  %s11857_s19 = smov [#allocation9]   ;;  %s375_s15 = int_to_ptr.vmem [resolvable:$true] %s374_s15 }
  0xd7   : > { %10025 = dma.hbm_to_vmem [thread:$0]  (!%p13875_p4), %s12194_s7, 16384, %s12197_s4, %s12028_s17, %s13872_s22, %s13872_s22, %s11849_s13  }
  0xd8   : > { %s390_s6 = sshll.u32 %s11857_s19, 4  ;;  %s11707_s1 = scalar_lea.hbm %s13812_s3, 256  ;;  %s391_s6 = int_to_ptr.vmem [resolvable:$true] %s390_s6 }
  0xd9   : > { %p11708_p3 = scmp.ne.s32.totalorder %s13812_s3, %s11707_s1  ;;  %p11714_p6 = scmp.lt.u32.totalorder %s11707_s1, %s13812_s3 }
  0xdb   : > { %p11710_p9 = pnand %p11708_p3, %p13873_p10 }
  0xdd   : > { %p11711_p12 = pneg %p11710_p9 }
  0xdf   : > { %p11716_p0 = pnand %p11714_p6, %p11711_p12 }
  0xe1   : > { %11719 = shalt.err (!%p11716_p0)
}
  0xe2   : > { %s11720_s13 = scalar_lea.vmem %s375_s15, 256  ;;  %p11728_p1 = scmp.lt.s32.totalorder %s375_s15, %s375_s15 }
  0xe3   : > { %p11721_p7 = scmp.ne.s32.totalorder %s375_s15, %s11720_s13  ;;  %p11729_p2 = scmp.lt.s32.totalorder %s11720_s13, %s11720_s13 }
  0xe5   : > { %p11723_p8 = pnand %p11721_p7, %p13873_p10  ;;  %p11730_p5 = por %p11729_p2, %p11728_p1 }
  0xe7   : > { %p11724_p11 = pneg %p11723_p8 }
  0xe9   : > { %p11731_p4 = pnand %p11730_p5, %p11724_p11 }
  0xeb   : > { %11734 = shalt.err (!%p11731_p4)
}
  0xec   : > { %p13876_p3 = scmp.ne.s32.totalorder %s13862_s30, 0  ;;  %s9965_s4 = smul.u32 96, %s12013_s16 }
  0xed   : > { %s11735_s28 = scalar_lea.hbm %s13814_s5, 256 }
  0xee   : > { %10006 = dma.hbm_to_vmem [thread:$0]  (!%p13876_p3), %s13812_s3, 256, %s375_s15, [#allocation7], %s11853_s26, %s11853_s26, %s11854_s29  }
  0xef   : > { %p11736_p4 = scmp.ne.s32.totalorder %s13814_s5, %s11735_s28  ;;  %p11742_p6 = scmp.lt.u32.totalorder %s11735_s28, %s13814_s5 }
  0xf1   : > { %p11738_p9 = pnand %p11736_p4, %p13873_p10 }
  0xf3   : > { %p11739_p12 = pneg %p11738_p9 }
  0xf5   : > { %p11744_p0 = pnand %p11742_p6, %p11739_p12 }
  0xf7   : > { %11747 = shalt.err (!%p11744_p0)
}
  0xf8   : > { %s11748_s15 = scalar_lea.vmem %s391_s6, 256  ;;  %p11756_p1 = scmp.lt.s32.totalorder %s391_s6, %s391_s6 }
  0xf9   : > { %p11749_p7 = scmp.ne.s32.totalorder %s391_s6, %s11748_s15  ;;  %p11757_p2 = scmp.lt.s32.totalorder %s11748_s15, %s11748_s15 }
  0xfb   : > { %p11751_p8 = pnand %p11749_p7, %p13873_p10  ;;  %p11758_p5 = por %p11757_p2, %p11756_p1 }
  0xfd   : > { %p11752_p11 = pneg %p11751_p8 }
  0xff   : > { %p11759_p13 = pnand %p11758_p5, %p11752_p11 }
 0x101   : > { %11762 = shalt.err (!%p11759_p13)
}
 0x102   : > { %10009 = dma.hbm_to_vmem [thread:$0]  (!%p13876_p3), %s13814_s5, 256, %s391_s6, [#allocation10], %s11853_s26, %s11853_s26, %s11854_s29  }
 0x103   : > { %s9966_s18 = smul.u32 1536, %s11839_s24  ;;  %s513_s21 = scalar_lea.vmem [#allocation16], %s9965_s4 }
 0x104   : > { %s520_s13 = sshll.u32 %s513_s21, 4  ;;  %p13877_p10 = scmp.ne.s32.totalorder %s13869_s0, 0  ;;  %s12273_s13 = int_to_ptr.vmem [resolvable:$true] %s520_s13 }
 0x105   : > { %s12271_s23 = scalar_lea.hbm %s13820_s11, %s9966_s18  ;;  %s11768_s29 = scalar_lea.hbm %s13820_s11, 3072 }
 0x106   : > { %s11763_s30 = scalar_lea.hbm %s12271_s23, 1536  ;;  %p11769_p3 = scmp.lt.u32.totalorder %s12271_s23, %s13820_s11 }
 0x107   : > { %p11764_p13 = scmp.ne.s32.totalorder %s12271_s23, %s11763_s30  ;;  %p11770_p12 = scmp.lt.u32.totalorder %s11768_s29, %s11763_s30 }
 0x108   : > { %p11772_p0 = scmp.lt.u32.totalorder %s11763_s30, %s12271_s23 }
 0x109   : > { %p11766_p4 = pnand %p11764_p13, %p13877_p10  ;;  %p11771_p6 = por %p11770_p12, %p11769_p3 }
 0x10b   : > { %p11767_p9 = pneg %p11766_p4  ;;  %p11773_p7 = por %p11772_p0, %p11771_p6 }
 0x10d   : > { %p11774_p8 = pnand %p11773_p7, %p11767_p9 }
 0x10f   : > { %11777 = shalt.err (!%p11774_p8)
}
 0x110   : > { %s11778_s19 = scalar_lea.vmem %s12273_s13, 1536  ;;  %s11858_s28 = smov [#allocation16]  }
 0x111   : > { %p11779_p11 = scmp.ne.s32.totalorder %s12273_s13, %s11778_s19  ;;  %s11783_s20 = sshll.u32 %s11858_s28, 4  ;;  %s11784_s20 = int_to_ptr.vmem [resolvable:$false] %s11783_s20 }
 0x112   : > { %s11785_s1 = scalar_lea.vmem %s11784_s20, 3072  ;;  %p11786_p5 = scmp.lt.s32.totalorder %s12273_s13, %s11784_s20 }
 0x113   : > { %p11781_p1 = pnand %p11779_p11, %p13877_p10  ;;  %p11787_p13 = scmp.lt.s32.totalorder %s11785_s1, %s11778_s19 }
 0x115   : > { %p11782_p2 = pneg %p11781_p1  ;;  %p11788_p4 = por %p11787_p13, %p11786_p5 }
 0x117   : > { %p11789_p3 = pnand %p11788_p4, %p11782_p2 }
 0x119   : > { %11792 = shalt.err (!%p11789_p3)
}
 0x11a   : > { %p13878_p9 = scmp.ne.s32.totalorder %s13867_s12, 0  ;;  %s13879_s14 = smov 32  }
 0x11b   : > { %s13880_s8 = smov 512   ;;  %p13881_p10 = scmp.ne.s32.totalorder %s13861_s27, 0 }
 0x11c   : > { %10028 = dma.hbm_to_vmem [thread:$0]  (!%p13878_p9), %s12271_s23, 1536, %s12273_s13, %s12028_s17, %s13880_s8, %s13880_s8, %s13879_s14  }
 0x11d   : > { %532 = sbr.rel (%p13881_p10) target bundleno = 4153 (0x1039), region = 68  ;;  %s13882_s0 = sld [smem:[#allocation23_spill]] (!%p13881_p10) }
 0x123   : > { %p13883_p12 = scmp.eq.s32.totalorder (!%p13881_p10), %s13882_s0, 0 }
 0x125   : > { %11810 = dma.done.wait (%p13883_p12), [#allocation5], 1024   ;;  %p13884_p6 = pmov %p13883_p12 }
 0x127   : > { %11812 = vsyncadd (%p13884_p6), [#allocation5], 4294966272  ;;  %p13885_p0 = pmov %p13884_p6 }
 0x129   : > { %11814 = dma.done.wait (%p13885_p0), [#allocation7], 512   ;;  %p13886_p7 = pmov %p13885_p0 }
 0x12a   : > { %p13887_p8 = pmov %p13885_p0 }
 0x12b   : > { %11816 = vsyncadd (%p13886_p7), [#allocation7], 4294966784 }
 0x12c   : > { %11818 = dma.done.wait (%p13887_p8), [#allocation10], 256   ;;  %p13888_p11 = pmov %p13885_p0 }
 0x12d   : > { %s13889_s12 = sld [smem:[#allocation21_spill]]  ;;  %s13890_s27 = sld [smem:[#allocation24_spill]] }
 0x12e   : > { %11820 = vsyncadd (%p13888_p11), [#allocation10], 4294967040  ;;  %s550_s17 = sand.u32 1, %s13882_s0  }
 0x12f   : > { %s551_s25 = scalar_lea.sflag [#allocation5], %s550_s17 }
 0x133   : > { %s552_s15 = sand.u32 1, %s13889_s12   ;;  %p13891_p1 = scmp.ne.s32.totalorder %s13890_s27, 0 }
 0x134   : > { %s9967_s16 = smul.u32 3072, %s552_s15 }
 0x136   : > { %s12316_s18 = scalar_lea.vmem [#allocation11], %s9967_s16 }
 0x137   : > { %11822 = dma.done.wait (%p13891_p1), %s551_s25, 116224  }
 0x138   : > { %11824 = vsyncadd (%p13891_p1), %s551_s25, 4294851072  ;;  %s8884_s21 = sshll.u32 %s552_s15, 10  ;;  %s9968_s13 = smul.u32 96, %s552_s15 }
 0x139   : > { %s12322_s22 = scalar_lea.vmem [#allocation12], %s8884_s21  ;;  %s12324_s7 = scalar_lea.vmem [#allocation13], %s8884_s21 }
 0x13a   : > { %s12326_s23 = scalar_lea.vmem [#allocation14], %s8884_s21  ;;  %s12328_s30 = scalar_lea.vmem [#allocation15], %s8884_s21 }
 0x13b   : > { %s12330_s26 = scalar_lea.vmem [#allocation16], %s9968_s13  ;;  %p13892_p2 = scmp.ne.s32.totalorder %s13882_s0, 0 }
 0x13c   : > { %v665_v0 = vld [vmem:[#allocation4] sm:$0xff] (!%p13892_p2)  ;;  %v666_v1 = vld [vmem:[#allocation4 + $0x8] sm:$0xff] (!%p13892_p2)  ;;  %v667_v2 = vld [vmem:[#allocation4 + $0x10] sm:$0xff] (!%p13892_p2)  ;;  %vm683_vm0 = vcmask (!%p13892_p2), 31744   ;;  %s13893_s6 = sld [smem:[#allocation28_spill]] (!%p13892_p2)  ;;  %s13894_s28 = sld [smem:[#allocation33_spill]] (!%p13892_p2) }
 0x13d   : > { %664 = sbr.rel (%p13892_p2) target bundleno = 324 (0x144), region = 112  ;;  %673 = vst [vmem:[#allocation2] sm:$0xff] (!%p13892_p2), %v665_v0  ;;  %674 = vst [vmem:[#allocation2 + $0x8] sm:$0xff] (!%p13892_p2), %v666_v1  ;;  %v668_v3 = vld [vmem:[#allocation4 + $0x18] sm:$0xff] (!%p13892_p2)  ;;  %v669_v4 = vld [vmem:[#allocation4 + $0x20] sm:$0xff] (!%p13892_p2) }
 0x13e   : > { %675 = vst [vmem:[#allocation2 + $0x10] sm:$0xff] (!%p13892_p2), %v667_v2  ;;  %v670_v5 = vld [vmem:[#allocation4 + $0x28] sm:$0xff] (!%p13892_p2)  ;;  %676 = vst [vmem:[#allocation2 + $0x18] sm:$0xff] (!%p13892_p2), %v668_v3  ;;  %v671_v6 = vld [vmem:[#allocation4 + $0x30] sm:$0xff] (!%p13892_p2) }
 0x13f   : > { %677 = vst [vmem:[#allocation2 + $0x20] sm:$0xff] (!%p13892_p2), %v669_v4  ;;  %678 = vst [vmem:[#allocation2 + $0x28] sm:$0xff] (!%p13892_p2), %v670_v5  ;;  %v672_v7 = vld [vmem:[#allocation4 + $0x38] sm:$0xff] (!%p13892_p2) }
 0x140   : > { %679 = vst [vmem:[#allocation2 + $0x30] sm:$0xff] (!%p13892_p2), %v671_v6  ;;  %680 = vst [vmem:[#allocation2 + $0x38] sm:$0xff] (!%p13892_p2), %v672_v7 }
 0x142   : > { %v681_v8 = vld [vmem:[%s13893_s6] sm:$0xff] (!%p13892_p2)  ;;  %v682_v9 = vld [vmem:[%s13893_s6 + $0x8] sm:$0xff] (!%p13892_p2) }
 0x143   : > { %684 = vst.msk [vmem:[%s13894_s28] sm:$0xff] (!%p13892_p2), %vm683_vm0, %v681_v8  ;;  %685 = vst.msk [vmem:[%s13894_s28 + $0x8] sm:$0xff] (!%p13892_p2), %vm683_vm0, %v682_v9 }
 0x144 PF: > { %v12348_v10 = vld [vmem:[#allocation2] sm:$0xff]  ;;  %v12350_v11 = vld [vmem:[#allocation2 + $0x8] sm:$0xff]  ;;  %vm11860_vm5 = vmmov 0   ;;  %vm3766_vm6 = vcmask 130048   ;;  %vm7221_vm11 = vcmask 31744   ;;  %s13895_s27 = sld [smem:[#allocation33_spill]] }
 0x145   : > { %v12352_v12 = vld [vmem:[#allocation2 + $0x10] sm:$0xff]  ;;  %v12354_v13 = vld [vmem:[#allocation2 + $0x18] sm:$0xff]  ;;  %v707_v14 = vadd.f32 %v12350_v11, %v12348_v10 }
 0x146   : > { %v12358_v15 = vld [vmem:[#allocation2 + $0x20] sm:$0xff]  ;;  %v12360_v16 = vld [vmem:[#allocation2 + $0x28] sm:$0xff] }
 0x147   : > { %v12362_v17 = vld [vmem:[#allocation2 + $0x30] sm:$0xff]  ;;  %v693_v18 = vld [vmem:[#allocation2 + $0x38] sm:$0xff]  ;;  %v712_v19 = vadd.f32 %v12360_v16, %v12358_v15  ;;  %v708_v20 = vadd.f32 %v707_v14, %v12352_v12 }
 0x148   : > { %v10087_v24 = vld [vmem:[%s12316_s18 + $0x4] ss:$48 sps:$4 sm:$0xff]   ;;  %v10089_v25 = vld [vmem:[%s12316_s18 + $0xc] ss:$48 sps:$4 sm:$0xff]   ;;  %v10091_v26 = vld [vmem:[%s12316_s18] ss:$48 sps:$4 sm:$0xff]  }
 0x149   : > { %v713_v21 = vadd.f32 %v712_v19, %v12362_v17  ;;  %v709_v22 = vadd.f32 %v708_v20, %v12354_v13  ;;  %v10092_v27 = vld [vmem:[%s12316_s18 + $0x8] ss:$48 sps:$4 sm:$0xff]   ;;  %v10093_v28 = vld [vmem:[%s12316_s18 + $0x64] ss:$48 sps:$4 sm:$0xff]   ;;  %v10095_v29 = vld [vmem:[%s12316_s18 + $0x6c] ss:$48 sps:$4 sm:$0xff]   ;;  %3130 = vmatprep.subr.bf16.mxu0 %v10087_v24  ;;  %3216 = vmatprep.subr.bf16.mxu1 %v10089_v25 }
 0x14a   : > { %3131 = vmatpush1.bf16.msra.mxu0 %v10091_v26  ;;  %3217 = vmatpush1.bf16.msra.mxu1 %v10092_v27  ;;  %v10097_v30 = vld [vmem:[%s12316_s18 + $0x60] ss:$48 sps:$4 sm:$0xff]   ;;  %v10098_v31 = vld [vmem:[%s12316_s18 + $0x68] ss:$48 sps:$4 sm:$0xff]   ;;  %v10099_v32 = vld [vmem:[%s12316_s18 + $0xc4] ss:$48 sps:$4 sm:$0xff]  }
 0x14b   : > { %710 = vadd.xlane.f32.xlu0 %v709_v22  ;;  %v714_v23 = vadd.f32 %v713_v21, %v693_v18  ;;  %3132 = vmatprep.subr.bf16.mxu0 %v10093_v28  ;;  %v10101_v33 = vld [vmem:[%s12316_s18 + $0xcc] ss:$48 sps:$4 sm:$0xff]   ;;  %v10103_v34 = vld [vmem:[%s12316_s18 + $0xc0] ss:$48 sps:$4 sm:$0xff]   ;;  %v10104_v35 = vld [vmem:[%s12316_s18 + $0xc8] ss:$48 sps:$4 sm:$0xff]  }
 0x14c   : > { %3218 = vmatprep.subr.bf16.mxu1 %v10095_v29  ;;  %v10105_v36 = vld [vmem:[%s12316_s18 + $0x124] ss:$48 sps:$4 sm:$0xff]   ;;  %v10107_v37 = vld [vmem:[%s12316_s18 + $0x12c] ss:$48 sps:$4 sm:$0xff]   ;;  %v10109_v38 = vld [vmem:[%s12316_s18 + $0x120] ss:$48 sps:$4 sm:$0xff]  }
 0x14d   : > { %v10110_v39 = vld [vmem:[%s12316_s18 + $0x128] ss:$48 sps:$4 sm:$0xff]   ;;  %v10111_v40 = vld [vmem:[%s12316_s18 + $0x184] ss:$48 sps:$4 sm:$0xff]   ;;  %v10113_v41 = vld [vmem:[%s12316_s18 + $0x18c] ss:$48 sps:$4 sm:$0xff]  }
 0x14e   : > { %3133 = vmatpush1.bf16.msra.mxu0 %v10097_v30  ;;  %3219 = vmatpush1.bf16.msra.mxu1 %v10098_v31  ;;  %v10115_v42 = vld [vmem:[%s12316_s18 + $0x180] ss:$48 sps:$4 sm:$0xff]   ;;  %v10116_v43 = vld [vmem:[%s12316_s18 + $0x188] ss:$48 sps:$4 sm:$0xff]   ;;  %v10117_v44 = vld [vmem:[%s12316_s18 + $0x1e4] ss:$48 sps:$4 sm:$0xff]  }
 0x14f   : > { %715 = vadd.xlane.f32.xlu0 %v714_v23  ;;  %3134 = vmatprep.subr.bf16.mxu0 %v10099_v32  ;;  %v10119_v45 = vld [vmem:[%s12316_s18 + $0x1ec] ss:$48 sps:$4 sm:$0xff]   ;;  %v10121_v46 = vld [vmem:[%s12316_s18 + $0x1e0] ss:$48 sps:$4 sm:$0xff]   ;;  %v10122_v47 = vld [vmem:[%s12316_s18 + $0x1e8] ss:$48 sps:$4 sm:$0xff]  }
 0x150   : > { %3220 = vmatprep.subr.bf16.mxu1 %v10101_v33  ;;  %v11491_v1 = vld [vmem:[#allocation2 + $0x38] sm:$0xff]  ;;  %v10135_v19 = vld [vmem:[%s12316_s18 + $0x304] ss:$48 sps:$4 sm:$0xff]   ;;  %v10139_v21 = vld [vmem:[%s12316_s18 + $0x300] ss:$48 sps:$4 sm:$0xff]  }
 0x151   : > { %v10128_v14 = vld [vmem:[%s12316_s18 + $0x248] ss:$48 sps:$4 sm:$0xff]   ;;  %v10137_v20 = vld [vmem:[%s12316_s18 + $0x30c] ss:$48 sps:$4 sm:$0xff]   ;;  %v10141_v23 = vld [vmem:[%s12316_s18 + $0x364] ss:$48 sps:$4 sm:$0xff]  }
 0x152   : > { %3135 = vmatpush1.bf16.msra.mxu0 %v10103_v34  ;;  %3221 = vmatpush1.bf16.msra.mxu1 %v10104_v35  ;;  %v10134_v18 = vld [vmem:[%s12316_s18 + $0x2a8] ss:$48 sps:$4 sm:$0xff]   ;;  %v10143_v24 = vld [vmem:[%s12316_s18 + $0x36c] ss:$48 sps:$4 sm:$0xff]   ;;  %v10145_v25 = vld [vmem:[%s12316_s18 + $0x360] ss:$48 sps:$4 sm:$0xff]  }
 0x153   : > { %3136 = vmatprep.subr.bf16.mxu0 %v10105_v36  ;;  %3222 = vmatprep.subr.bf16.mxu1 %v10107_v37  ;;  %v10140_v22 = vld [vmem:[%s12316_s18 + $0x308] ss:$48 sps:$4 sm:$0xff]   ;;  %v10147_v27 = vld [vmem:[%s12316_s18 + $0x3c4] ss:$48 sps:$4 sm:$0xff]   ;;  %v10149_v28 = vld [vmem:[%s12316_s18 + $0x3cc] ss:$48 sps:$4 sm:$0xff]  }
 0x154   : > { %v10146_v26 = vld [vmem:[%s12316_s18 + $0x368] ss:$48 sps:$4 sm:$0xff]   ;;  %v10151_v29 = vld [vmem:[%s12316_s18 + $0x3c0] ss:$48 sps:$4 sm:$0xff]   ;;  %v10153_v31 = vld [vmem:[%s12316_s18 + $0x424] ss:$48 sps:$4 sm:$0xff]  }
 0x155   : > { %v10152_v30 = vld [vmem:[%s12316_s18 + $0x3c8] ss:$48 sps:$4 sm:$0xff]   ;;  %v10155_v32 = vld [vmem:[%s12316_s18 + $0x42c] ss:$48 sps:$4 sm:$0xff]   ;;  %v10157_v33 = vld [vmem:[%s12316_s18 + $0x420] ss:$48 sps:$4 sm:$0xff]  }
 0x156   : > { %3137 = vmatpush1.bf16.msra.mxu0 %v10109_v38  ;;  %3223 = vmatpush1.bf16.msra.mxu1 %v10110_v39  ;;  %v10158_v34 = vld [vmem:[%s12316_s18 + $0x428] ss:$48 sps:$4 sm:$0xff]   ;;  %v10159_v35 = vld [vmem:[%s12316_s18 + $0x484] ss:$48 sps:$4 sm:$0xff]   ;;  %v10161_v36 = vld [vmem:[%s12316_s18 + $0x48c] ss:$48 sps:$4 sm:$0xff]  }
 0x157   : > { %3138 = vmatprep.subr.bf16.mxu0 %v10111_v40  ;;  %3224 = vmatprep.subr.bf16.mxu1 %v10113_v41  ;;  %v10163_v37 = vld [vmem:[%s12316_s18 + $0x480] ss:$48 sps:$4 sm:$0xff]   ;;  %v10164_v38 = vld [vmem:[%s12316_s18 + $0x488] ss:$48 sps:$4 sm:$0xff]   ;;  %v10165_v39 = vld [vmem:[%s12316_s18 + $0x4e4] ss:$48 sps:$4 sm:$0xff]  }
 0x158   : > { %v10167_v40 = vld [vmem:[%s12316_s18 + $0x4ec] ss:$48 sps:$4 sm:$0xff]   ;;  %v10169_v41 = vld [vmem:[%s12316_s18 + $0x4e0] ss:$48 sps:$4 sm:$0xff]  }
 0x15a   : > { %3139 = vmatpush1.bf16.msra.mxu0 %v10115_v42  ;;  %3225 = vmatpush1.bf16.msra.mxu1 %v10116_v43  ;;  %v10170_v42 = vld [vmem:[%s12316_s18 + $0x4e8] ss:$48 sps:$4 sm:$0xff]   ;;  %v10171_v43 = vld [vmem:[%s12316_s18 + $0x544] ss:$48 sps:$4 sm:$0xff]  }
 0x15b   : > { %3140 = vmatprep.subr.bf16.mxu0 %v10117_v44  ;;  %3226 = vmatprep.subr.bf16.mxu1 %v10119_v45  ;;  %v10173_v44 = vld [vmem:[%s12316_s18 + $0x54c] ss:$48 sps:$4 sm:$0xff]   ;;  %v10175_v45 = vld [vmem:[%s12316_s18 + $0x540] ss:$48 sps:$4 sm:$0xff]  }
 0x15e   : > { %3141 = vmatpush1.bf16.msra.mxu0 %v10121_v46  ;;  %3227 = vmatpush1.bf16.msra.mxu1 %v10122_v47  ;;  %v10176_v46 = vld [vmem:[%s12316_s18 + $0x548] ss:$48 sps:$4 sm:$0xff]   ;;  %v10177_v47 = vld [vmem:[%s12316_s18 + $0x5a4] ss:$48 sps:$4 sm:$0xff]  }
 0x1d8   : > { %v711_v48 = vpop.xlane.xlu0 %710 }
 0x1d9   : > { %v718_v49 = vmul.f32 0.001953125, %v711_v48  ;;  %v10179_v48 = vld [vmem:[%s12316_s18 + $0x5ac] ss:$48 sps:$4 sm:$0xff]  }
 0x1db   : > { %v12394_v50 = vsub.f32 %v12348_v10, %v718_v49  ;;  %v12397_v51 = vsub.f32 %v12350_v11, %v718_v49  ;;  %v12400_v52 = vsub.f32 %v12352_v12, %v718_v49  ;;  %v12403_v54 = vsub.f32 %v12354_v13, %v718_v49  ;;  %v10123_v11 = vld [vmem:[%s12316_s18 + $0x244] ss:$48 sps:$4 sm:$0xff]   ;;  %v10125_v12 = vld [vmem:[%s12316_s18 + $0x24c] ss:$48 sps:$4 sm:$0xff]   ;;  %v10127_v13 = vld [vmem:[%s12316_s18 + $0x240] ss:$48 sps:$4 sm:$0xff]  }
 0x1dc   : > { %v716_v53 = vpop.xlane.xlu0 %715  ;;  %3142 = vmatprep.subr.bf16.mxu0 %v10123_v11  ;;  %3228 = vmatprep.subr.bf16.mxu1 %v10125_v12  ;;  %v10181_v49 = vld [vmem:[%s12316_s18 + $0x5a0] ss:$48 sps:$4 sm:$0xff]  }
 0x1dd   : > { %v719_v55 = vmul.f32 0.001953125, %v716_v53  ;;  %v728_v56 = vmul.f32 %v12394_v50, %v12394_v50  ;;  %v729_v57 = vmul.f32 %v12397_v51, %v12397_v51  ;;  %v730_v58 = vmul.f32 %v12400_v52, %v12400_v52  ;;  %3143 = vmatpush1.bf16.msra.mxu0 %v10127_v13  ;;  %3229 = vmatpush1.bf16.msra.mxu1 %v10128_v14  ;;  %v10182_v53 = vld [vmem:[%s12316_s18 + $0x5a8] ss:$48 sps:$4 sm:$0xff]  }
 0x1de   : > { %v731_v63 = vmul.f32 %v12403_v54, %v12403_v54 }
 0x1df   : > { %v12412_v59 = vsub.f32 %v12358_v15, %v719_v55  ;;  %v12415_v60 = vsub.f32 %v12360_v16, %v719_v55  ;;  %v736_v61 = vadd.f32 %v729_v57, %v728_v56  ;;  %v12418_v62 = vsub.f32 %v12362_v17, %v719_v55  ;;  %v10129_v15 = vld [vmem:[%s12316_s18 + $0x2a4] ss:$48 sps:$4 sm:$0xff]   ;;  %v10131_v16 = vld [vmem:[%s12316_s18 + $0x2ac] ss:$48 sps:$4 sm:$0xff]   ;;  %v10133_v17 = vld [vmem:[%s12316_s18 + $0x2a0] ss:$48 sps:$4 sm:$0xff]  }
 0x1e0   : > { %v12422_v2 = vsub.f32 %v11491_v1, %v719_v55  ;;  %3144 = vmatprep.subr.bf16.mxu0 %v10129_v15  ;;  %3230 = vmatprep.subr.bf16.mxu1 %v10131_v16  ;;  %v10185_v55 = vld [vmem:[%s12316_s18 + $0x604] ss:$48 sps:$4 sm:$0xff]   ;;  %v10188_v56 = vld [vmem:[%s12316_s18 + $0x60c] ss:$48 sps:$4 sm:$0xff]  }
 0x1e1   : > { %v737_v0 = vadd.f32 %v736_v61, %v730_v58  ;;  %v732_v3 = vmul.f32 %v12412_v59, %v12412_v59  ;;  %v733_v4 = vmul.f32 %v12415_v60, %v12415_v60  ;;  %v734_v6 = vmul.f32 %v12418_v62, %v12418_v62  ;;  %3145 = vmatpush1.bf16.msra.mxu0 %v10133_v17  ;;  %v697_v15 = vld [vmem:[%s12330_s26 + $0x8] sm:$0xff]  ;;  %v696_v17 = vld [vmem:[%s12330_s26] sm:$0xff] }
 0x1e2   : > { %v735_v8 = vmul.f32 %v12422_v2, %v12422_v2  ;;  %3231 = vmatpush1.bf16.msra.mxu1 %v10134_v18  ;;  %3146 = vmatprep.subr.bf16.mxu0 %v10135_v19 }
 0x1e3   : > { %v738_v5 = vadd.f32 %v737_v0, %v731_v63  ;;  %v741_v7 = vadd.f32 %v733_v4, %v732_v3  ;;  %3232 = vmatprep.subr.bf16.mxu1 %v10137_v20 }
 0x1e5   : > { %739 = vadd.xlane.f32.xlu1 %v738_v5  ;;  %v742_v9 = vadd.f32 %v741_v7, %v734_v6  ;;  %3147 = vmatpush1.bf16.msra.mxu0 %v10139_v21 }
 0x1e6   : > { %3233 = vmatpush1.bf16.msra.mxu1 %v10140_v22  ;;  %3148 = vmatprep.subr.bf16.mxu0 %v10141_v23 }
 0x1e7   : > { %v743_v10 = vadd.f32 %v742_v9, %v735_v8  ;;  %3234 = vmatprep.subr.bf16.mxu1 %v10143_v24  ;;  %v699_v24 = vld [vmem:[%s12330_s26 + $0x18] sm:$0xff] }
 0x1e9   : > { %744 = vadd.xlane.f32.xlu1 %v743_v10  ;;  %3149 = vmatpush1.bf16.msra.mxu0 %v10145_v25  ;;  %v774_v10 = vlaneseq }
 0x1ea   : > { %3235 = vmatpush1.bf16.msra.mxu1 %v10146_v26  ;;  %3150 = vmatprep.subr.bf16.mxu0 %v10147_v27 }
 0x1eb   : > { %3236 = vmatprep.subr.bf16.mxu1 %v10149_v28  ;;  %v12474_v14 = vshrl.u32 %v774_v10, 7  ;;  %v10224_v10 = vld [vmem:[%s12316_s18 + $0x84c] ss:$48 sps:$4 sm:$0xff]  }
 0x1ed   : > { %3151 = vmatpush1.bf16.msra.mxu0 %v10151_v29  ;;  %v12478_v16 = vsub.s32 0, %v12474_v14  ;;  %v12484_v19 = vsub.s32 1, %v12474_v14 }
 0x1ee   : > { %3237 = vmatpush1.bf16.msra.mxu1 %v10152_v30  ;;  %3152 = vmatprep.subr.bf16.mxu0 %v10153_v31 }
 0x1ef   : > { %3238 = vmatprep.subr.bf16.mxu1 %v10155_v32  ;;  %v781_v21 = vrot.slane %v697_v15, %v12478_v16  ;;  %v777_v23 = vrot.slane %v696_v17, %v12478_v16  ;;  %v805_v26 = vrot.slane %v697_v15, %v12484_v19  ;;  %v801_v27 = vrot.slane %v696_v17, %v12484_v19  ;;  %v10230_v15 = vld [vmem:[%s12316_s18 + $0x8ac] ss:$48 sps:$4 sm:$0xff]   ;;  %v10225_v17 = vld [vmem:[%s12316_s18 + $0x8a0] ss:$48 sps:$4 sm:$0xff]  }
 0x1f1   : > { %3153 = vmatpush1.bf16.msra.mxu0 %v10157_v33 }
 0x1f2   : > { %3239 = vmatpush1.bf16.msra.mxu1 %v10158_v34  ;;  %3154 = vmatprep.subr.bf16.mxu0 %v10159_v35 }
 0x1f3   : > { %3240 = vmatprep.subr.bf16.mxu1 %v10161_v36 }
 0x1f5   : > { %3155 = vmatpush1.bf16.msra.mxu0 %v10163_v37 }
 0x1f6   : > { %3241 = vmatpush1.bf16.msra.mxu1 %v10164_v38  ;;  %3156 = vmatprep.subr.bf16.mxu0 %v10165_v39  ;;  %v10183_v38 = vld [vmem:[%s12316_s18 + $0x600] ss:$48 sps:$4 sm:$0xff]  }
 0x1f7   : > { %3242 = vmatprep.subr.bf16.mxu1 %v10167_v40 }
 0x1f9   : > { %3157 = vmatpush1.bf16.msra.mxu0 %v10169_v41 }
 0x1fa   : > { %3243 = vmatpush1.bf16.msra.mxu1 %v10170_v42  ;;  %3158 = vmatprep.subr.bf16.mxu0 %v10171_v43  ;;  %v10191_v43 = vld [vmem:[%s12316_s18 + $0x664] ss:$48 sps:$4 sm:$0xff]  }
 0x1fb   : > { %3244 = vmatprep.subr.bf16.mxu1 %v10173_v44 }
 0x1fd   : > { %3159 = vmatpush1.bf16.msra.mxu0 %v10175_v45  ;;  %v10189_v45 = vld [vmem:[%s12316_s18 + $0x660] ss:$48 sps:$4 sm:$0xff]  }
 0x1fe   : > { %3245 = vmatpush1.bf16.msra.mxu1 %v10176_v46  ;;  %3160 = vmatprep.subr.bf16.mxu0 %v10177_v47  ;;  %v10192_v46 = vld [vmem:[%s12316_s18 + $0x668] ss:$48 sps:$4 sm:$0xff]   ;;  %v10194_v47 = vld [vmem:[%s12316_s18 + $0x66c] ss:$48 sps:$4 sm:$0xff]  }
 0x1ff   : > { %3246 = vmatprep.subr.bf16.mxu1 %v10179_v48 }
 0x201   : > { %3161 = vmatpush1.bf16.msra.mxu0 %v10181_v49  ;;  %v10197_v49 = vld [vmem:[%s12316_s18 + $0x6c4] ss:$48 sps:$4 sm:$0xff]  }
 0x202   : > { %3247 = vmatpush1.bf16.msra.mxu1 %v10182_v53  ;;  %3173 = vmatprep.subr.bf16.mxu0 %v10185_v55  ;;  %v10200_v53 = vld [vmem:[%s12316_s18 + $0x6cc] ss:$48 sps:$4 sm:$0xff]   ;;  %v10195_v55 = vld [vmem:[%s12316_s18 + $0x6c0] ss:$48 sps:$4 sm:$0xff]  }
 0x203   : > { %3259 = vmatprep.subr.bf16.mxu1 %v10188_v56  ;;  %v10198_v56 = vld [vmem:[%s12316_s18 + $0x6c8] ss:$48 sps:$4 sm:$0xff]  }
 0x272   : > { %v740_v57 = vpop.xlane.xlu1 %739 }
 0x273   : > { %v746_v58 = vmul.f32 0.0019569471, %v740_v57  ;;  %v10203_v57 = vld [vmem:[%s12316_s18 + $0x724] ss:$48 sps:$4 sm:$0xff]  }
 0x275   : > { %11431 = vrsqrt.f32 %v746_v58  ;;  %vm750_vm1 = vcmp.eq.f32.partialorder %v746_v58, inf  ;;  %v753_v3 = vand.u32 2147483648, %v746_v58  ;;  %vm752_vm2 = vcmp.eq.f32.partialorder %v746_v58, 0.0 }
 0x276   : > { %v745_v61 = vpop.xlane.xlu1 %744 }
 0x277   : > { %v747_v63 = vmul.f32 0.0019569471, %v745_v61  ;;  %v10201_v61 = vld [vmem:[%s12316_s18 + $0x720] ss:$48 sps:$4 sm:$0xff]  }
 0x279   : > { %11433 = vrsqrt.f32 %v747_v63  ;;  %vm757_vm3 = vcmp.eq.f32.partialorder %v747_v63, inf  ;;  %v760_v9 = vand.u32 2147483648, %v747_v63  ;;  %vm759_vm4 = vcmp.eq.f32.partialorder %v747_v63, 0.0 }
 0x27f   : > { %v11432_v0 = vpop.eup %11431 }
 0x280   : > { %v749_v1 = vmul.f32 %v11432_v0, %v746_v58  ;;  %v10209_v0 = vld [vmem:[%s12316_s18 + $0x784] ss:$48 sps:$4 sm:$0xff]  }
 0x282   : > { %v751_v4 = vsel %vm750_vm1, %v746_v58, %v749_v1  ;;  %v10206_v58 = vld [vmem:[%s12316_s18 + $0x72c] ss:$48 sps:$4 sm:$0xff]  }
 0x283   : > { %v11434_v5 = vpop.eup %11433  ;;  %v754_v6 = vsel %vm752_vm2, %v753_v3, %v751_v4  ;;  %v10212_v1 = vld [vmem:[%s12316_s18 + $0x78c] ss:$48 sps:$4 sm:$0xff]   ;;  %v10207_v3 = vld [vmem:[%s12316_s18 + $0x780] ss:$48 sps:$4 sm:$0xff]   ;;  %v10210_v4 = vld [vmem:[%s12316_s18 + $0x788] ss:$48 sps:$4 sm:$0xff]  }
 0x284   : > { %v762_v7 = vadd.f32 1e-06, %v754_v6  ;;  %v756_v8 = vmul.f32 %v11434_v5, %v747_v63  ;;  %v10215_v5 = vld [vmem:[%s12316_s18 + $0x7e4] ss:$48 sps:$4 sm:$0xff]   ;;  %v10218_v6 = vld [vmem:[%s12316_s18 + $0x7ec] ss:$48 sps:$4 sm:$0xff]  }
 0x286   : > { %11435 = vrcp.f32 %v762_v7  ;;  %v758_v11 = vsel %vm757_vm3, %v747_v63, %v756_v8  ;;  %v10204_v63 = vld [vmem:[%s12316_s18 + $0x728] ss:$48 sps:$4 sm:$0xff]   ;;  %v10213_v7 = vld [vmem:[%s12316_s18 + $0x7e0] ss:$48 sps:$4 sm:$0xff]  }
 0x287   : > { %v761_v12 = vsel %vm759_vm4, %v760_v9, %v758_v11  ;;  %v10216_v8 = vld [vmem:[%s12316_s18 + $0x7e8] ss:$48 sps:$4 sm:$0xff]   ;;  %v10221_v9 = vld [vmem:[%s12316_s18 + $0x844] ss:$48 sps:$4 sm:$0xff]   ;;  %v10219_v11 = vld [vmem:[%s12316_s18 + $0x840] ss:$48 sps:$4 sm:$0xff]  }
 0x288   : > { %v763_v13 = vadd.f32 1e-06, %v761_v12  ;;  %v10222_v12 = vld [vmem:[%s12316_s18 + $0x848] ss:$48 sps:$4 sm:$0xff]  }
 0x28a   : > { %11437 = vrcp.f32 %v763_v13  ;;  %v10227_v13 = vld [vmem:[%s12316_s18 + $0x8a4] ss:$48 sps:$4 sm:$0xff]  }
 0x290   : > { %v12481_v18 = vpop.eup %11435 }
 0x291   : > { %v766_v20 = vmul.f32 %v12481_v18, %v12397_v51  ;;  %v765_v22 = vmul.f32 %v12481_v18, %v12394_v50  ;;  %v768_v28 = vmul.f32 %v12481_v18, %v12403_v54  ;;  %v789_v51 = vrot.slane %v699_v24, %v12478_v16 }
 0x292   : > { %v813_v54 = vrot.slane %v699_v24, %v12484_v19  ;;  %v10234_v24 = vld [vmem:[%s12316_s18 + $0x908] ss:$48 sps:$4 sm:$0xff]  }
 0x293   : > { %v791_v50 = vmul.f32 %v781_v21, %v766_v20  ;;  %v790_v31 = vmul.f32 %v777_v23, %v765_v22  ;;  %v793_v35 = vmul.f32 %v789_v51, %v768_v28  ;;  %v10228_v20 = vld [vmem:[%s12316_s18 + $0x8a8] ss:$48 sps:$4 sm:$0xff]   ;;  %v10236_v22 = vld [vmem:[%s12316_s18 + $0x90c] ss:$48 sps:$4 sm:$0xff]   ;;  %v10237_v28 = vld [vmem:[%s12316_s18 + $0x960] ss:$48 sps:$4 sm:$0xff]  }
 0x294   : > { %v12493_v25 = vpop.eup %11437 }
 0x295   : > { %v771_v29 = vmul.f32 %v12493_v25, %v12415_v60  ;;  %v770_v30 = vmul.f32 %v12493_v25, %v12412_v59  ;;  %v773_v32 = vmul.f32 %v12493_v25, %v12422_v2  ;;  %v12507_v37 = vadd.f32 %v805_v26, %v791_v50  ;;  %v10186_v59 = vld [vmem:[%s12316_s18 + $0x608] ss:$48 sps:$4 sm:$0xff]   ;;  %v10248_v50 = vld [vmem:[%s12316_s18 + $0x9cc] ss:$48 sps:$4 sm:$0xff]  }
 0x296   : > { %v12513_v39 = vadd.f32 %v801_v27, %v790_v31  ;;  %v12528_v44 = vadd.f32 %v813_v54, %v793_v35  ;;  %v10246_v31 = vld [vmem:[%s12316_s18 + $0x9c8] ss:$48 sps:$4 sm:$0xff]  }
 0x297   : > { %v795_v33 = vmul.f32 %v781_v21, %v771_v29  ;;  %v794_v34 = vmul.f32 %v777_v23, %v770_v30  ;;  %v797_v36 = vmul.f32 %v789_v51, %v773_v32  ;;  %v10233_v21 = vld [vmem:[%s12316_s18 + $0x904] ss:$48 sps:$4 sm:$0xff]   ;;  %v10231_v23 = vld [vmem:[%s12316_s18 + $0x900] ss:$48 sps:$4 sm:$0xff]   ;;  %v10240_v51 = vld [vmem:[%s12316_s18 + $0x968] ss:$48 sps:$4 sm:$0xff]  }
 0x298   : > { %v10245_v29 = vld [vmem:[%s12316_s18 + $0x9c4] ss:$48 sps:$4 sm:$0xff]   ;;  %v10243_v30 = vld [vmem:[%s12316_s18 + $0x9c0] ss:$48 sps:$4 sm:$0xff]   ;;  %v10252_v35 = vld [vmem:[%s12316_s18 + $0xa28] ss:$48 sps:$4 sm:$0xff]  }
 0x299   : > { %v12509_v60 = vadd.f32 %v805_v26, %v795_v33  ;;  %v12515_v2 = vadd.f32 %v801_v27, %v794_v34  ;;  %v12517_v40 = vadd.f32 %v813_v54, %v797_v36  ;;  %v10239_v26 = vld [vmem:[%s12316_s18 + $0x964] ss:$48 sps:$4 sm:$0xff]   ;;  %v10242_v27 = vld [vmem:[%s12316_s18 + $0x96c] ss:$48 sps:$4 sm:$0xff]   ;;  %v10249_v34 = vld [vmem:[%s12316_s18 + $0xa20] ss:$48 sps:$4 sm:$0xff]  }
 0x29a   : > { %v10251_v32 = vld [vmem:[%s12316_s18 + $0xa24] ss:$48 sps:$4 sm:$0xff]   ;;  %v10254_v33 = vld [vmem:[%s12316_s18 + $0xa2c] ss:$48 sps:$4 sm:$0xff]  }
 0x29b   : > { %v12521_v41 = vpack.c.bf16 %v12509_v60, %v12507_v37  ;;  %v12525_v42 = vpack.c.bf16 %v12515_v2, %v12513_v39  ;;  %v12539_v48 = vpack.c.bf16 %v12517_v40, %v12528_v44  ;;  %v10257_v36 = vld [vmem:[%s12316_s18 + $0xa84] ss:$48 sps:$4 sm:$0xff]   ;;  %v10260_v54 = vld [vmem:[%s12316_s18 + $0xa8c] ss:$48 sps:$4 sm:$0xff]  }
 0x29d   : > { %3162 = vmatprep.mubr.bf16.mxu0 %v12521_v41  ;;  %3248 = vmatprep.mubr.bf16.mxu1 %v12521_v41 }
 0x29e   : > { %3163 = vmatmul.mubr.bf16.vlgmr.msra.gmra.mrb[0].mxu0 %v12525_v42  ;;  %3249 = vmatmul.mubr.bf16.vlgmr.msra.gmra.mrb[0].mxu1 %v12525_v42 }
 0x29f   : > { %3174 = vmatpush1.bf16.msra.mxu0 %v10183_v38  ;;  %3260 = vmatpush1.bf16.msra.mxu1 %v10186_v59  ;;  %v10255_v38 = vld [vmem:[%s12316_s18 + $0xa80] ss:$48 sps:$4 sm:$0xff]   ;;  %v10258_v59 = vld [vmem:[%s12316_s18 + $0xa88] ss:$48 sps:$4 sm:$0xff]  }
 0x2a0   : > { %3205 = vmatprep.mubr.bf16.mxu0 %v12539_v48  ;;  %3291 = vmatprep.mubr.bf16.mxu1 %v12539_v48 }
 0x2a1   : > { %3175 = vmatprep.subr.bf16.mxu0 %v10191_v43  ;;  %3261 = vmatprep.subr.bf16.mxu1 %v10194_v47  ;;  %v10263_v43 = vld [vmem:[%s12316_s18 + $0xae4] ss:$48 sps:$4 sm:$0xff]   ;;  %v10264_v47 = vld [vmem:[%s12316_s18 + $0xae8] ss:$48 sps:$4 sm:$0xff]  }
 0x2a3   : > { %3176 = vmatpush1.bf16.msra.mxu0 %v10189_v45  ;;  %3262 = vmatpush1.bf16.msra.mxu1 %v10192_v46  ;;  %v10266_v45 = vld [vmem:[%s12316_s18 + $0xaec] ss:$48 sps:$4 sm:$0xff]   ;;  %v10261_v46 = vld [vmem:[%s12316_s18 + $0xae0] ss:$48 sps:$4 sm:$0xff]  }
 0x2a4   : > { %3177 = vmatprep.subr.bf16.mxu0 %v10197_v49  ;;  %3263 = vmatprep.subr.bf16.mxu1 %v10200_v53  ;;  %v12592_v49 = vld [vmem:[%s12330_s26 + $0x10] sm:$0xff] }
 0x2a5   : > { %v10269_v53 = vld [vmem:[%s12316_s18 + $0xb44] ss:$48 sps:$4 sm:$0xff]  }
 0x2a7   : > { %3178 = vmatpush1.bf16.msra.mxu0 %v10195_v55  ;;  %3264 = vmatpush1.bf16.msra.mxu1 %v10198_v56  ;;  %v10272_v55 = vld [vmem:[%s12316_s18 + $0xb4c] ss:$48 sps:$4 sm:$0xff]   ;;  %v772_v56 = vmul.f32 %v12493_v25, %v12418_v62 }
 0x2a8   : > { %3179 = vmatprep.subr.bf16.mxu0 %v10203_v57  ;;  %3265 = vmatprep.subr.bf16.mxu1 %v10206_v58  ;;  %v767_v57 = vmul.f32 %v12481_v18, %v12400_v52  ;;  %v785_v58 = vrot.slane %v12592_v49, %v12478_v16  ;;  %v809_v52 = vrot.slane %v12592_v49, %v12484_v19  ;;  %v10273_v18 = vld [vmem:[%s12316_s18 + $0xba0] ss:$48 sps:$4 sm:$0xff]  }
 0x2aa   : > { %v796_v62 = vmul.f32 %v785_v58, %v772_v56  ;;  %v792_v25 = vmul.f32 %v785_v58, %v767_v57  ;;  %v10335_v56 = vld [vmem:[%s12316_s18 + $0x374] ss:$48 sps:$4 sm:$0xff]   ;;  %v10338_v57 = vld [vmem:[%s12316_s18 + $0x37c] ss:$48 sps:$4 sm:$0xff]   ;;  %v10333_v58 = vld [vmem:[%s12316_s18 + $0x370] ss:$48 sps:$4 sm:$0xff]  }
 0x2ab   : > { %3180 = vmatpush1.bf16.msra.mxu0 %v10201_v61  ;;  %3266 = vmatpush1.bf16.msra.mxu1 %v10204_v63  ;;  %v10267_v61 = vld [vmem:[%s12316_s18 + $0xb40] ss:$48 sps:$4 sm:$0xff]   ;;  %v10270_v63 = vld [vmem:[%s12316_s18 + $0xb48] ss:$48 sps:$4 sm:$0xff]  }
 0x2ac   : > { %3181 = vmatprep.subr.bf16.mxu0 %v10209_v0  ;;  %3267 = vmatprep.subr.bf16.mxu1 %v10212_v1  ;;  %v10275_v0 = vld [vmem:[%s12316_s18 + $0xba4] ss:$48 sps:$4 sm:$0xff]   ;;  %v10278_v1 = vld [vmem:[%s12316_s18 + $0xbac] ss:$48 sps:$4 sm:$0xff]  }
 0x2af   : > { %3182 = vmatpush1.bf16.msra.mxu0 %v10207_v3  ;;  %3268 = vmatpush1.bf16.msra.mxu1 %v10210_v4  ;;  %v10276_v3 = vld [vmem:[%s12316_s18 + $0xba8] ss:$48 sps:$4 sm:$0xff]   ;;  %v12610_v4 = vadd.f32 %v809_v52, %v796_v62 }
 0x2b0   : > { %3183 = vmatprep.subr.bf16.mxu0 %v10215_v5  ;;  %3269 = vmatprep.subr.bf16.mxu1 %v10218_v6  ;;  %v10281_v5 = vld [vmem:[%s12316_s18 + $0x14] ss:$48 sps:$4 sm:$0xff]   ;;  %v10284_v6 = vld [vmem:[%s12316_s18 + $0x1c] ss:$48 sps:$4 sm:$0xff]   ;;  %v10342_v62 = vld [vmem:[%s12316_s18 + $0x3d8] ss:$48 sps:$4 sm:$0xff]  }
 0x2b3   : > { %3184 = vmatpush1.bf16.msra.mxu0 %v10213_v7  ;;  %3270 = vmatpush1.bf16.msra.mxu1 %v10216_v8  ;;  %v12614_v7 = vadd.f32 %v809_v52, %v792_v25  ;;  %v10279_v8 = vld [vmem:[%s12316_s18 + $0x10] ss:$48 sps:$4 sm:$0xff]   ;;  %v10347_v25 = vld [vmem:[%s12316_s18 + $0x434] ss:$48 sps:$4 sm:$0xff]   ;;  %v10350_v52 = vld [vmem:[%s12316_s18 + $0x43c] ss:$48 sps:$4 sm:$0xff]  }
 0x2b4   : > { %3185 = vmatprep.subr.bf16.mxu0 %v10221_v9  ;;  %3271 = vmatprep.subr.bf16.mxu1 %v10224_v10  ;;  %v10282_v10 = vld [vmem:[%s12316_s18 + $0x18] ss:$48 sps:$4 sm:$0xff]  }
 0x2b5   : > { %v12619_v9 = vpack.c.bf16 %v12610_v4, %v12614_v7 }
 0x2b7   : > { %3186 = vmatpush1.bf16.msra.mxu0 %v10219_v11  ;;  %3272 = vmatpush1.bf16.msra.mxu1 %v10222_v12  ;;  %v10287_v11 = vld [vmem:[%s12316_s18 + $0x74] ss:$48 sps:$4 sm:$0xff]   ;;  %v10290_v12 = vld [vmem:[%s12316_s18 + $0x7c] ss:$48 sps:$4 sm:$0xff]  }
 0x2b8   : > { %3187 = vmatprep.subr.bf16.mxu0 %v10227_v13  ;;  %3273 = vmatprep.subr.bf16.mxu1 %v10230_v15  ;;  %v10285_v13 = vld [vmem:[%s12316_s18 + $0x70] ss:$48 sps:$4 sm:$0xff]   ;;  %v10288_v15 = vld [vmem:[%s12316_s18 + $0x78] ss:$48 sps:$4 sm:$0xff]  }
 0x2bb   : > { %3188 = vmatpush1.bf16.msra.mxu0 %v10225_v17  ;;  %3274 = vmatpush1.bf16.msra.mxu1 %v10228_v20  ;;  %v10293_v17 = vld [vmem:[%s12316_s18 + $0xd4] ss:$48 sps:$4 sm:$0xff]   ;;  %v10296_v20 = vld [vmem:[%s12316_s18 + $0xdc] ss:$48 sps:$4 sm:$0xff]  }
 0x2bc   : > { %3189 = vmatprep.subr.bf16.mxu0 %v10233_v21  ;;  %3275 = vmatprep.subr.bf16.mxu1 %v10236_v22  ;;  %v10291_v21 = vld [vmem:[%s12316_s18 + $0xd0] ss:$48 sps:$4 sm:$0xff]   ;;  %v10294_v22 = vld [vmem:[%s12316_s18 + $0xd8] ss:$48 sps:$4 sm:$0xff]  }
 0x2bf   : > { %3190 = vmatpush1.bf16.msra.mxu0 %v10231_v23  ;;  %3276 = vmatpush1.bf16.msra.mxu1 %v10234_v24  ;;  %v10299_v23 = vld [vmem:[%s12316_s18 + $0x134] ss:$48 sps:$4 sm:$0xff]   ;;  %v10302_v24 = vld [vmem:[%s12316_s18 + $0x13c] ss:$48 sps:$4 sm:$0xff]  }
 0x2c0   : > { %3191 = vmatprep.subr.bf16.mxu0 %v10239_v26  ;;  %3277 = vmatprep.subr.bf16.mxu1 %v10242_v27  ;;  %v10297_v26 = vld [vmem:[%s12316_s18 + $0x130] ss:$48 sps:$4 sm:$0xff]   ;;  %v10300_v27 = vld [vmem:[%s12316_s18 + $0x138] ss:$48 sps:$4 sm:$0xff]  }
 0x2c3   : > { %3192 = vmatpush1.bf16.msra.mxu0 %v10237_v28  ;;  %3278 = vmatpush1.bf16.msra.mxu1 %v10240_v51  ;;  %v10305_v28 = vld [vmem:[%s12316_s18 + $0x194] ss:$48 sps:$4 sm:$0xff]   ;;  %v10308_v51 = vld [vmem:[%s12316_s18 + $0x19c] ss:$48 sps:$4 sm:$0xff]  }
 0x2c4   : > { %3193 = vmatprep.subr.bf16.mxu0 %v10245_v29  ;;  %3279 = vmatprep.subr.bf16.mxu1 %v10248_v50  ;;  %v10303_v29 = vld [vmem:[%s12316_s18 + $0x190] ss:$48 sps:$4 sm:$0xff]   ;;  %v10306_v50 = vld [vmem:[%s12316_s18 + $0x198] ss:$48 sps:$4 sm:$0xff]  }
 0x2c7   : > { %3194 = vmatpush1.bf16.msra.mxu0 %v10243_v30  ;;  %3280 = vmatpush1.bf16.msra.mxu1 %v10246_v31  ;;  %v10311_v30 = vld [vmem:[%s12316_s18 + $0x1f4] ss:$48 sps:$4 sm:$0xff]   ;;  %v10314_v31 = vld [vmem:[%s12316_s18 + $0x1fc] ss:$48 sps:$4 sm:$0xff]  }
 0x2c8   : > { %3195 = vmatprep.subr.bf16.mxu0 %v10251_v32  ;;  %3281 = vmatprep.subr.bf16.mxu1 %v10254_v33  ;;  %v10309_v32 = vld [vmem:[%s12316_s18 + $0x1f0] ss:$48 sps:$4 sm:$0xff]   ;;  %v10312_v33 = vld [vmem:[%s12316_s18 + $0x1f8] ss:$48 sps:$4 sm:$0xff]  }
 0x2cb   : > { %3196 = vmatpush1.bf16.msra.mxu0 %v10249_v34  ;;  %3282 = vmatpush1.bf16.msra.mxu1 %v10252_v35  ;;  %v10317_v34 = vld [vmem:[%s12316_s18 + $0x254] ss:$48 sps:$4 sm:$0xff]   ;;  %v10320_v35 = vld [vmem:[%s12316_s18 + $0x25c] ss:$48 sps:$4 sm:$0xff]  }
 0x2cc   : > { %3197 = vmatprep.subr.bf16.mxu0 %v10257_v36  ;;  %3283 = vmatprep.subr.bf16.mxu1 %v10260_v54  ;;  %v10315_v36 = vld [vmem:[%s12316_s18 + $0x250] ss:$48 sps:$4 sm:$0xff]   ;;  %v10318_v54 = vld [vmem:[%s12316_s18 + $0x258] ss:$48 sps:$4 sm:$0xff]  }
 0x2cf   : > { %3198 = vmatpush1.bf16.msra.mxu0 %v10255_v38  ;;  %3284 = vmatpush1.bf16.msra.mxu1 %v10258_v59  ;;  %v10323_v38 = vld [vmem:[%s12316_s18 + $0x2b4] ss:$48 sps:$4 sm:$0xff]   ;;  %v10326_v59 = vld [vmem:[%s12316_s18 + $0x2bc] ss:$48 sps:$4 sm:$0xff]  }
 0x2d0   : > { %3199 = vmatprep.subr.bf16.mxu0 %v10263_v43  ;;  %3285 = vmatprep.subr.bf16.mxu1 %v10266_v45  ;;  %v10321_v43 = vld [vmem:[%s12316_s18 + $0x2b0] ss:$48 sps:$4 sm:$0xff]   ;;  %v10324_v45 = vld [vmem:[%s12316_s18 + $0x2b8] ss:$48 sps:$4 sm:$0xff]  }
 0x2d3   : > { %3200 = vmatpush1.bf16.msra.mxu0 %v10261_v46  ;;  %3286 = vmatpush1.bf16.msra.mxu1 %v10264_v47  ;;  %v10329_v46 = vld [vmem:[%s12316_s18 + $0x314] ss:$48 sps:$4 sm:$0xff]   ;;  %v10332_v47 = vld [vmem:[%s12316_s18 + $0x31c] ss:$48 sps:$4 sm:$0xff]  }
 0x2d4   : > { %3201 = vmatprep.subr.bf16.mxu0 %v10269_v53  ;;  %3287 = vmatprep.subr.bf16.mxu1 %v10272_v55  ;;  %v10327_v53 = vld [vmem:[%s12316_s18 + $0x310] ss:$48 sps:$4 sm:$0xff]   ;;  %v10330_v55 = vld [vmem:[%s12316_s18 + $0x318] ss:$48 sps:$4 sm:$0xff]  }
 0x2d7   : > { %3202 = vmatpush1.bf16.msra.mxu0 %v10267_v61  ;;  %3288 = vmatpush1.bf16.msra.mxu1 %v10270_v63  ;;  %v10336_v61 = vld [vmem:[%s12316_s18 + $0x378] ss:$48 sps:$4 sm:$0xff]   ;;  %v10341_v63 = vld [vmem:[%s12316_s18 + $0x3d4] ss:$48 sps:$4 sm:$0xff]  }
 0x2d8   : > { %3203 = vmatprep.subr.bf16.mxu0 %v10275_v0  ;;  %3289 = vmatprep.subr.bf16.mxu1 %v10278_v1  ;;  %v10344_v0 = vld [vmem:[%s12316_s18 + $0x3dc] ss:$48 sps:$4 sm:$0xff]   ;;  %v10339_v1 = vld [vmem:[%s12316_s18 + $0x3d0] ss:$48 sps:$4 sm:$0xff]  }
 0x2db   : > { %3204 = vmatpush1.bf16.msra.mxu0 %v10273_v18  ;;  %3290 = vmatpush1.bf16.msra.mxu1 %v10276_v3  ;;  %v10345_v18 = vld [vmem:[%s12316_s18 + $0x430] ss:$48 sps:$4 sm:$0xff]   ;;  %v10348_v3 = vld [vmem:[%s12316_s18 + $0x438] ss:$48 sps:$4 sm:$0xff]  }
 0x2dc   : > { %3302 = vmatprep.subr.bf16.mxu0 %v10281_v5  ;;  %3388 = vmatprep.subr.bf16.mxu1 %v10284_v6  ;;  %v10353_v5 = vld [vmem:[%s12316_s18 + $0x494] ss:$48 sps:$4 sm:$0xff]   ;;  %v10356_v6 = vld [vmem:[%s12316_s18 + $0x49c] ss:$48 sps:$4 sm:$0xff]  }
 0x2de   : > { %3206 = vmatmul.mubr.bf16.vlgmr.msra.gmra.mrb[0].mxu0 %v12619_v9  ;;  %3292 = vmatmul.mubr.bf16.vlgmr.msra.gmra.mrb[0].mxu1 %v12619_v9 }
 0x2df   : > { %3303 = vmatpush1.bf16.msra.mxu0 %v10279_v8  ;;  %3334 = vmatprep.mubr.bf16.mxu0 %v12521_v41  ;;  %v10351_v8 = vld [vmem:[%s12316_s18 + $0x490] ss:$48 sps:$4 sm:$0xff]  }
 0x2e0   : > { %3389 = vmatpush1.bf16.msra.mxu1 %v10282_v10  ;;  %3420 = vmatprep.mubr.bf16.mxu1 %v12521_v41  ;;  %v10354_v10 = vld [vmem:[%s12316_s18 + $0x498] ss:$48 sps:$4 sm:$0xff]  }
 0x2e1   : > { %3304 = vmatprep.subr.bf16.mxu0 %v10287_v11  ;;  %3390 = vmatprep.subr.bf16.mxu1 %v10290_v12  ;;  %v10359_v11 = vld [vmem:[%s12316_s18 + $0x4f4] ss:$48 sps:$4 sm:$0xff]   ;;  %v10362_v12 = vld [vmem:[%s12316_s18 + $0x4fc] ss:$48 sps:$4 sm:$0xff]  }
 0x2e3   : > { %3305 = vmatpush1.bf16.msra.mxu0 %v10285_v13  ;;  %v10357_v13 = vld [vmem:[%s12316_s18 + $0x4f0] ss:$48 sps:$4 sm:$0xff]  }
 0x2e4   : > { %3391 = vmatpush1.bf16.msra.mxu1 %v10288_v15  ;;  %3306 = vmatprep.subr.bf16.mxu0 %v10293_v17  ;;  %v10360_v15 = vld [vmem:[%s12316_s18 + $0x4f8] ss:$48 sps:$4 sm:$0xff]   ;;  %v10365_v17 = vld [vmem:[%s12316_s18 + $0x554] ss:$48 sps:$4 sm:$0xff]  }
 0x2e5   : > { %3392 = vmatprep.subr.bf16.mxu1 %v10296_v20  ;;  %v10368_v20 = vld [vmem:[%s12316_s18 + $0x55c] ss:$48 sps:$4 sm:$0xff]  }
 0x2e7   : > { %3307 = vmatpush1.bf16.msra.mxu0 %v10291_v21  ;;  %v10363_v21 = vld [vmem:[%s12316_s18 + $0x550] ss:$48 sps:$4 sm:$0xff]  }
 0x2e8   : > { %3393 = vmatpush1.bf16.msra.mxu1 %v10294_v22  ;;  %3308 = vmatprep.subr.bf16.mxu0 %v10299_v23  ;;  %v10366_v22 = vld [vmem:[%s12316_s18 + $0x558] ss:$48 sps:$4 sm:$0xff]   ;;  %v10371_v23 = vld [vmem:[%s12316_s18 + $0x5b4] ss:$48 sps:$4 sm:$0xff]  }
 0x2e9   : > { %3394 = vmatprep.subr.bf16.mxu1 %v10302_v24  ;;  %v10374_v24 = vld [vmem:[%s12316_s18 + $0x5bc] ss:$48 sps:$4 sm:$0xff]  }
 0x2eb   : > { %3309 = vmatpush1.bf16.msra.mxu0 %v10297_v26  ;;  %v10369_v26 = vld [vmem:[%s12316_s18 + $0x5b0] ss:$48 sps:$4 sm:$0xff]  }
 0x2ec   : > { %3395 = vmatpush1.bf16.msra.mxu1 %v10300_v27  ;;  %3310 = vmatprep.subr.bf16.mxu0 %v10305_v28  ;;  %v10372_v27 = vld [vmem:[%s12316_s18 + $0x5b8] ss:$48 sps:$4 sm:$0xff]   ;;  %v10377_v28 = vld [vmem:[%s12316_s18 + $0x614] ss:$48 sps:$4 sm:$0xff]  }
 0x2ed   : > { %3396 = vmatprep.subr.bf16.mxu1 %v10308_v51  ;;  %v10380_v51 = vld [vmem:[%s12316_s18 + $0x61c] ss:$48 sps:$4 sm:$0xff]  }
 0x2ef   : > { %3311 = vmatpush1.bf16.msra.mxu0 %v10303_v29  ;;  %v10375_v29 = vld [vmem:[%s12316_s18 + $0x610] ss:$48 sps:$4 sm:$0xff]  }
 0x2f0   : > { %3397 = vmatpush1.bf16.msra.mxu1 %v10306_v50  ;;  %3312 = vmatprep.subr.bf16.mxu0 %v10311_v30  ;;  %v10378_v50 = vld [vmem:[%s12316_s18 + $0x618] ss:$48 sps:$4 sm:$0xff]   ;;  %v10383_v30 = vld [vmem:[%s12316_s18 + $0x674] ss:$48 sps:$4 sm:$0xff]  }
 0x2f1   : > { %3398 = vmatprep.subr.bf16.mxu1 %v10314_v31  ;;  %v10386_v31 = vld [vmem:[%s12316_s18 + $0x67c] ss:$48 sps:$4 sm:$0xff]  }
 0x2f3   : > { %3313 = vmatpush1.bf16.msra.mxu0 %v10309_v32  ;;  %v10381_v32 = vld [vmem:[%s12316_s18 + $0x670] ss:$48 sps:$4 sm:$0xff]  }
 0x2f4   : > { %3399 = vmatpush1.bf16.msra.mxu1 %v10312_v33  ;;  %3314 = vmatprep.subr.bf16.mxu0 %v10317_v34  ;;  %v10384_v33 = vld [vmem:[%s12316_s18 + $0x678] ss:$48 sps:$4 sm:$0xff]   ;;  %v10389_v34 = vld [vmem:[%s12316_s18 + $0x6d4] ss:$48 sps:$4 sm:$0xff]  }
 0x2f5   : > { %3400 = vmatprep.subr.bf16.mxu1 %v10320_v35  ;;  %v10392_v35 = vld [vmem:[%s12316_s18 + $0x6dc] ss:$48 sps:$4 sm:$0xff]  }
 0x2f7   : > { %3315 = vmatpush1.bf16.msra.mxu0 %v10315_v36  ;;  %v10387_v36 = vld [vmem:[%s12316_s18 + $0x6d0] ss:$48 sps:$4 sm:$0xff]  }
 0x2f8   : > { %3401 = vmatpush1.bf16.msra.mxu1 %v10318_v54  ;;  %3316 = vmatprep.subr.bf16.mxu0 %v10323_v38  ;;  %v10390_v54 = vld [vmem:[%s12316_s18 + $0x6d8] ss:$48 sps:$4 sm:$0xff]   ;;  %v10395_v38 = vld [vmem:[%s12316_s18 + $0x734] ss:$48 sps:$4 sm:$0xff]  }
 0x2f9   : > { %3402 = vmatprep.subr.bf16.mxu1 %v10326_v59  ;;  %v10398_v59 = vld [vmem:[%s12316_s18 + $0x73c] ss:$48 sps:$4 sm:$0xff]  }
 0x2fb   : > { %3317 = vmatpush1.bf16.msra.mxu0 %v10321_v43  ;;  %v10393_v43 = vld [vmem:[%s12316_s18 + $0x730] ss:$48 sps:$4 sm:$0xff]  }
 0x2fc   : > { %3403 = vmatpush1.bf16.msra.mxu1 %v10324_v45  ;;  %3318 = vmatprep.subr.bf16.mxu0 %v10329_v46  ;;  %v10396_v45 = vld [vmem:[%s12316_s18 + $0x738] ss:$48 sps:$4 sm:$0xff]   ;;  %v10401_v46 = vld [vmem:[%s12316_s18 + $0x794] ss:$48 sps:$4 sm:$0xff]  }
 0x2fd   : > { %3404 = vmatprep.subr.bf16.mxu1 %v10332_v47  ;;  %v10404_v47 = vld [vmem:[%s12316_s18 + $0x79c] ss:$48 sps:$4 sm:$0xff]  }
 0x2ff   : > { %3319 = vmatpush1.bf16.msra.mxu0 %v10327_v53  ;;  %v10399_v53 = vld [vmem:[%s12316_s18 + $0x790] ss:$48 sps:$4 sm:$0xff]  }
 0x300   : > { %3405 = vmatpush1.bf16.msra.mxu1 %v10330_v55  ;;  %3320 = vmatprep.subr.bf16.mxu0 %v10335_v56  ;;  %v10402_v55 = vld [vmem:[%s12316_s18 + $0x798] ss:$48 sps:$4 sm:$0xff]   ;;  %v10407_v56 = vld [vmem:[%s12316_s18 + $0x7f4] ss:$48 sps:$4 sm:$0xff]  }
 0x301   : > { %3406 = vmatprep.subr.bf16.mxu1 %v10338_v57  ;;  %v10410_v57 = vld [vmem:[%s12316_s18 + $0x7fc] ss:$48 sps:$4 sm:$0xff]  }
 0x303   : > { %3321 = vmatpush1.bf16.msra.mxu0 %v10333_v58  ;;  %v10405_v58 = vld [vmem:[%s12316_s18 + $0x7f0] ss:$48 sps:$4 sm:$0xff]  }
 0x304   : > { %3407 = vmatpush1.bf16.msra.mxu1 %v10336_v61  ;;  %3322 = vmatprep.subr.bf16.mxu0 %v10341_v63  ;;  %v10408_v61 = vld [vmem:[%s12316_s18 + $0x7f8] ss:$48 sps:$4 sm:$0xff]   ;;  %v10413_v63 = vld [vmem:[%s12316_s18 + $0x854] ss:$48 sps:$4 sm:$0xff]  }
 0x305   : > { %3408 = vmatprep.subr.bf16.mxu1 %v10344_v0  ;;  %v10416_v0 = vld [vmem:[%s12316_s18 + $0x85c] ss:$48 sps:$4 sm:$0xff]  }
 0x307   : > { %3323 = vmatpush1.bf16.msra.mxu0 %v10339_v1  ;;  %v10411_v1 = vld [vmem:[%s12316_s18 + $0x850] ss:$48 sps:$4 sm:$0xff]  }
 0x308   : > { %3409 = vmatpush1.bf16.msra.mxu1 %v10342_v62  ;;  %3324 = vmatprep.subr.bf16.mxu0 %v10347_v25  ;;  %v10414_v62 = vld [vmem:[%s12316_s18 + $0x858] ss:$48 sps:$4 sm:$0xff]   ;;  %v10419_v25 = vld [vmem:[%s12316_s18 + $0x8b4] ss:$48 sps:$4 sm:$0xff]  }
 0x309   : > { %3410 = vmatprep.subr.bf16.mxu1 %v10350_v52  ;;  %v10422_v52 = vld [vmem:[%s12316_s18 + $0x8bc] ss:$48 sps:$4 sm:$0xff]  }
 0x30b   : > { %3325 = vmatpush1.bf16.msra.mxu0 %v10345_v18  ;;  %v10417_v18 = vld [vmem:[%s12316_s18 + $0x8b0] ss:$48 sps:$4 sm:$0xff]  }
 0x30c   : > { %3411 = vmatpush1.bf16.msra.mxu1 %v10348_v3  ;;  %3326 = vmatprep.subr.bf16.mxu0 %v10353_v5  ;;  %v10420_v3 = vld [vmem:[%s12316_s18 + $0x8b8] ss:$48 sps:$4 sm:$0xff]   ;;  %v10425_v5 = vld [vmem:[%s12316_s18 + $0x914] ss:$48 sps:$4 sm:$0xff]  }
 0x30d   : > { %3412 = vmatprep.subr.bf16.mxu1 %v10356_v6  ;;  %v10428_v6 = vld [vmem:[%s12316_s18 + $0x91c] ss:$48 sps:$4 sm:$0xff]  }
 0x30f   : > { %3327 = vmatpush1.bf16.msra.mxu0 %v10351_v8  ;;  %v10423_v8 = vld [vmem:[%s12316_s18 + $0x910] ss:$48 sps:$4 sm:$0xff]  }
 0x310   : > { %3413 = vmatpush1.bf16.msra.mxu1 %v10354_v10  ;;  %3328 = vmatprep.subr.bf16.mxu0 %v10359_v11  ;;  %v10426_v10 = vld [vmem:[%s12316_s18 + $0x918] ss:$48 sps:$4 sm:$0xff]   ;;  %v10431_v11 = vld [vmem:[%s12316_s18 + $0x974] ss:$48 sps:$4 sm:$0xff]  }
 0x311   : > { %3414 = vmatprep.subr.bf16.mxu1 %v10362_v12  ;;  %v10434_v12 = vld [vmem:[%s12316_s18 + $0x97c] ss:$48 sps:$4 sm:$0xff]  }
 0x313   : > { %3329 = vmatpush1.bf16.msra.mxu0 %v10357_v13  ;;  %v10429_v13 = vld [vmem:[%s12316_s18 + $0x970] ss:$48 sps:$4 sm:$0xff]  }
 0x314   : > { %3415 = vmatpush1.bf16.msra.mxu1 %v10360_v15  ;;  %3330 = vmatprep.subr.bf16.mxu0 %v10365_v17  ;;  %v10432_v15 = vld [vmem:[%s12316_s18 + $0x978] ss:$48 sps:$4 sm:$0xff]   ;;  %v10437_v17 = vld [vmem:[%s12316_s18 + $0x9d4] ss:$48 sps:$4 sm:$0xff]  }
 0x315   : > { %3416 = vmatprep.subr.bf16.mxu1 %v10368_v20  ;;  %v10440_v20 = vld [vmem:[%s12316_s18 + $0x9dc] ss:$48 sps:$4 sm:$0xff]  }
 0x317   : > { %3331 = vmatpush1.bf16.msra.mxu0 %v10363_v21  ;;  %v10435_v21 = vld [vmem:[%s12316_s18 + $0x9d0] ss:$48 sps:$4 sm:$0xff]  }
 0x318   : > { %3417 = vmatpush1.bf16.msra.mxu1 %v10366_v22  ;;  %3332 = vmatprep.subr.bf16.mxu0 %v10371_v23  ;;  %v10438_v22 = vld [vmem:[%s12316_s18 + $0x9d8] ss:$48 sps:$4 sm:$0xff]   ;;  %v10443_v23 = vld [vmem:[%s12316_s18 + $0xa34] ss:$48 sps:$4 sm:$0xff]  }
 0x319   : > { %3418 = vmatprep.subr.bf16.mxu1 %v10374_v24  ;;  %v10446_v24 = vld [vmem:[%s12316_s18 + $0xa3c] ss:$48 sps:$4 sm:$0xff]  }
 0x31b   : > { %3333 = vmatpush1.bf16.msra.mxu0 %v10369_v26  ;;  %v10441_v26 = vld [vmem:[%s12316_s18 + $0xa30] ss:$48 sps:$4 sm:$0xff]  }
 0x31c   : > { %3419 = vmatpush1.bf16.msra.mxu1 %v10372_v27  ;;  %3345 = vmatprep.subr.bf16.mxu0 %v10377_v28  ;;  %v10444_v27 = vld [vmem:[%s12316_s18 + $0xa38] ss:$48 sps:$4 sm:$0xff]   ;;  %v10449_v28 = vld [vmem:[%s12316_s18 + $0xa94] ss:$48 sps:$4 sm:$0xff]  }
 0x31d   : > { %3431 = vmatprep.subr.bf16.mxu1 %v10380_v51  ;;  %v10452_v51 = vld [vmem:[%s12316_s18 + $0xa9c] ss:$48 sps:$4 sm:$0xff]  }
 0x31e   : > { %3335 = vmatmul.mubr.bf16.vlgmr.msra.gmra.mrb[4].mxu0 %v12525_v42 }
 0x31f   : > { %3421 = vmatmul.mubr.bf16.vlgmr.msra.gmra.mrb[4].mxu1 %v12525_v42  ;;  %3346 = vmatpush1.bf16.msra.mxu0 %v10375_v29  ;;  %v10447_v29 = vld [vmem:[%s12316_s18 + $0xa90] ss:$48 sps:$4 sm:$0xff]  }
 0x320   : > { %3377 = vmatprep.mubr.bf16.mxu0 %v12539_v48  ;;  %3432 = vmatpush1.bf16.msra.mxu1 %v10378_v50  ;;  %v10450_v50 = vld [vmem:[%s12316_s18 + $0xa98] ss:$48 sps:$4 sm:$0xff]  }
 0x321   : > { %3463 = vmatprep.mubr.bf16.mxu1 %v12539_v48  ;;  %3347 = vmatprep.subr.bf16.mxu0 %v10383_v30  ;;  %v10455_v30 = vld [vmem:[%s12316_s18 + $0xaf4] ss:$48 sps:$4 sm:$0xff]  }
 0x322   : > { %3433 = vmatprep.subr.bf16.mxu1 %v10386_v31  ;;  %v10458_v31 = vld [vmem:[%s12316_s18 + $0xafc] ss:$48 sps:$4 sm:$0xff]  }
 0x323   : > { %3348 = vmatpush1.bf16.msra.mxu0 %v10381_v32  ;;  %v10453_v32 = vld [vmem:[%s12316_s18 + $0xaf0] ss:$48 sps:$4 sm:$0xff]  }
 0x324   : > { %3434 = vmatpush1.bf16.msra.mxu1 %v10384_v33  ;;  %3349 = vmatprep.subr.bf16.mxu0 %v10389_v34  ;;  %v10456_v33 = vld [vmem:[%s12316_s18 + $0xaf8] ss:$48 sps:$4 sm:$0xff]   ;;  %v10461_v34 = vld [vmem:[%s12316_s18 + $0xb54] ss:$48 sps:$4 sm:$0xff]  }
 0x325   : > { %3435 = vmatprep.subr.bf16.mxu1 %v10392_v35  ;;  %v10464_v35 = vld [vmem:[%s12316_s18 + $0xb5c] ss:$48 sps:$4 sm:$0xff]  }
 0x327   : > { %3350 = vmatpush1.bf16.msra.mxu0 %v10387_v36  ;;  %v10459_v36 = vld [vmem:[%s12316_s18 + $0xb50] ss:$48 sps:$4 sm:$0xff]  }
 0x328   : > { %3436 = vmatpush1.bf16.msra.mxu1 %v10390_v54  ;;  %3351 = vmatprep.subr.bf16.mxu0 %v10395_v38  ;;  %v10462_v54 = vld [vmem:[%s12316_s18 + $0xb58] ss:$48 sps:$4 sm:$0xff]   ;;  %v10467_v38 = vld [vmem:[%s12316_s18 + $0xbb4] ss:$48 sps:$4 sm:$0xff]  }
 0x329   : > { %3437 = vmatprep.subr.bf16.mxu1 %v10398_v59  ;;  %v10470_v59 = vld [vmem:[%s12316_s18 + $0xbbc] ss:$48 sps:$4 sm:$0xff]  }
 0x32b   : > { %3352 = vmatpush1.bf16.msra.mxu0 %v10393_v43  ;;  %v10465_v43 = vld [vmem:[%s12316_s18 + $0xbb0] ss:$48 sps:$4 sm:$0xff]  }
 0x32c   : > { %3438 = vmatpush1.bf16.msra.mxu1 %v10396_v45  ;;  %3353 = vmatprep.subr.bf16.mxu0 %v10401_v46  ;;  %v10468_v45 = vld [vmem:[%s12316_s18 + $0xbb8] ss:$48 sps:$4 sm:$0xff]   ;;  %v10473_v46 = vld [vmem:[%s12316_s18 + $0x24] ss:$48 sps:$4 sm:$0xff]  }
 0x32d   : > { %3439 = vmatprep.subr.bf16.mxu1 %v10404_v47  ;;  %v10476_v47 = vld [vmem:[%s12316_s18 + $0x2c] ss:$48 sps:$4 sm:$0xff]  }
 0x32f   : > { %3354 = vmatpush1.bf16.msra.mxu0 %v10399_v53  ;;  %v10471_v53 = vld [vmem:[%s12316_s18 + $0x20] ss:$48 sps:$4 sm:$0xff]  }
 0x330   : > { %3440 = vmatpush1.bf16.msra.mxu1 %v10402_v55  ;;  %3355 = vmatprep.subr.bf16.mxu0 %v10407_v56  ;;  %v10474_v55 = vld [vmem:[%s12316_s18 + $0x28] ss:$48 sps:$4 sm:$0xff]   ;;  %v10479_v56 = vld [vmem:[%s12316_s18 + $0x84] ss:$48 sps:$4 sm:$0xff]  }
 0x331   : > { %3441 = vmatprep.subr.bf16.mxu1 %v10410_v57  ;;  %v10482_v57 = vld [vmem:[%s12316_s18 + $0x8c] ss:$48 sps:$4 sm:$0xff]  }
 0x333   : > { %3356 = vmatpush1.bf16.msra.mxu0 %v10405_v58  ;;  %v10477_v58 = vld [vmem:[%s12316_s18 + $0x80] ss:$48 sps:$4 sm:$0xff]  }
 0x334   : > { %3442 = vmatpush1.bf16.msra.mxu1 %v10408_v61  ;;  %3357 = vmatprep.subr.bf16.mxu0 %v10413_v63  ;;  %v10480_v61 = vld [vmem:[%s12316_s18 + $0x88] ss:$48 sps:$4 sm:$0xff]   ;;  %v10485_v63 = vld [vmem:[%s12316_s18 + $0xe4] ss:$48 sps:$4 sm:$0xff]  }
 0x335   : > { %3443 = vmatprep.subr.bf16.mxu1 %v10416_v0  ;;  %v10488_v0 = vld [vmem:[%s12316_s18 + $0xec] ss:$48 sps:$4 sm:$0xff]  }
 0x337   : > { %3358 = vmatpush1.bf16.msra.mxu0 %v10411_v1  ;;  %v10483_v1 = vld [vmem:[%s12316_s18 + $0xe0] ss:$48 sps:$4 sm:$0xff]  }
 0x338   : > { %3444 = vmatpush1.bf16.msra.mxu1 %v10414_v62  ;;  %3359 = vmatprep.subr.bf16.mxu0 %v10419_v25  ;;  %v10486_v62 = vld [vmem:[%s12316_s18 + $0xe8] ss:$48 sps:$4 sm:$0xff]   ;;  %v10491_v25 = vld [vmem:[%s12316_s18 + $0x144] ss:$48 sps:$4 sm:$0xff]  }
 0x339   : > { %3445 = vmatprep.subr.bf16.mxu1 %v10422_v52  ;;  %v10494_v52 = vld [vmem:[%s12316_s18 + $0x14c] ss:$48 sps:$4 sm:$0xff]  }
 0x33b   : > { %3360 = vmatpush1.bf16.msra.mxu0 %v10417_v18  ;;  %v10492_v18 = vld [vmem:[%s12316_s18 + $0x148] ss:$48 sps:$4 sm:$0xff]  }
 0x33c   : > { %3446 = vmatpush1.bf16.msra.mxu1 %v10420_v3  ;;  %3361 = vmatprep.subr.bf16.mxu0 %v10425_v5  ;;  %v10497_v3 = vld [vmem:[%s12316_s18 + $0x1a4] ss:$48 sps:$4 sm:$0xff]   ;;  %v10500_v5 = vld [vmem:[%s12316_s18 + $0x1ac] ss:$48 sps:$4 sm:$0xff]  }
 0x33d   : > { %3447 = vmatprep.subr.bf16.mxu1 %v10428_v6  ;;  %v10495_v6 = vld [vmem:[%s12316_s18 + $0x1a0] ss:$48 sps:$4 sm:$0xff]  }
 0x33f   : > { %3362 = vmatpush1.bf16.msra.mxu0 %v10423_v8  ;;  %v10498_v8 = vld [vmem:[%s12316_s18 + $0x1a8] ss:$48 sps:$4 sm:$0xff]  }
 0x340   : > { %3448 = vmatpush1.bf16.msra.mxu1 %v10426_v10  ;;  %3363 = vmatprep.subr.bf16.mxu0 %v10431_v11  ;;  %v10503_v10 = vld [vmem:[%s12316_s18 + $0x204] ss:$48 sps:$4 sm:$0xff]   ;;  %v10506_v11 = vld [vmem:[%s12316_s18 + $0x20c] ss:$48 sps:$4 sm:$0xff]  }
 0x341   : > { %3449 = vmatprep.subr.bf16.mxu1 %v10434_v12  ;;  %v10501_v12 = vld [vmem:[%s12316_s18 + $0x200] ss:$48 sps:$4 sm:$0xff]  }
 0x343   : > { %3364 = vmatpush1.bf16.msra.mxu0 %v10429_v13  ;;  %v10504_v13 = vld [vmem:[%s12316_s18 + $0x208] ss:$48 sps:$4 sm:$0xff]  }
 0x344   : > { %3450 = vmatpush1.bf16.msra.mxu1 %v10432_v15  ;;  %3365 = vmatprep.subr.bf16.mxu0 %v10437_v17  ;;  %v10509_v15 = vld [vmem:[%s12316_s18 + $0x264] ss:$48 sps:$4 sm:$0xff]   ;;  %v10512_v17 = vld [vmem:[%s12316_s18 + $0x26c] ss:$48 sps:$4 sm:$0xff]  }
 0x345   : > { %3451 = vmatprep.subr.bf16.mxu1 %v10440_v20  ;;  %v10507_v20 = vld [vmem:[%s12316_s18 + $0x260] ss:$48 sps:$4 sm:$0xff]  }
 0x347   : > { %3366 = vmatpush1.bf16.msra.mxu0 %v10435_v21  ;;  %v10510_v21 = vld [vmem:[%s12316_s18 + $0x268] ss:$48 sps:$4 sm:$0xff]  }
 0x348   : > { %3452 = vmatpush1.bf16.msra.mxu1 %v10438_v22  ;;  %3367 = vmatprep.subr.bf16.mxu0 %v10443_v23  ;;  %v10515_v22 = vld [vmem:[%s12316_s18 + $0x2c4] ss:$48 sps:$4 sm:$0xff]   ;;  %v10518_v23 = vld [vmem:[%s12316_s18 + $0x2cc] ss:$48 sps:$4 sm:$0xff]  }
 0x349   : > { %3453 = vmatprep.subr.bf16.mxu1 %v10446_v24  ;;  %v10513_v24 = vld [vmem:[%s12316_s18 + $0x2c0] ss:$48 sps:$4 sm:$0xff]  }
 0x34b   : > { %3368 = vmatpush1.bf16.msra.mxu0 %v10441_v26  ;;  %v10516_v26 = vld [vmem:[%s12316_s18 + $0x2c8] ss:$48 sps:$4 sm:$0xff]  }
 0x34c   : > { %3454 = vmatpush1.bf16.msra.mxu1 %v10444_v27  ;;  %3369 = vmatprep.subr.bf16.mxu0 %v10449_v28  ;;  %v10521_v27 = vld [vmem:[%s12316_s18 + $0x324] ss:$48 sps:$4 sm:$0xff]   ;;  %v10524_v28 = vld [vmem:[%s12316_s18 + $0x32c] ss:$48 sps:$4 sm:$0xff]  }
 0x34d   : > { %3455 = vmatprep.subr.bf16.mxu1 %v10452_v51  ;;  %v10519_v51 = vld [vmem:[%s12316_s18 + $0x320] ss:$48 sps:$4 sm:$0xff]  }
 0x34f   : > { %3370 = vmatpush1.bf16.msra.mxu0 %v10447_v29  ;;  %v10522_v29 = vld [vmem:[%s12316_s18 + $0x328] ss:$48 sps:$4 sm:$0xff]  }
 0x350   : > { %3456 = vmatpush1.bf16.msra.mxu1 %v10450_v50  ;;  %3371 = vmatprep.subr.bf16.mxu0 %v10455_v30  ;;  %v10527_v50 = vld [vmem:[%s12316_s18 + $0x384] ss:$48 sps:$4 sm:$0xff]   ;;  %v10530_v30 = vld [vmem:[%s12316_s18 + $0x38c] ss:$48 sps:$4 sm:$0xff]  }
 0x351   : > { %3457 = vmatprep.subr.bf16.mxu1 %v10458_v31  ;;  %v10525_v31 = vld [vmem:[%s12316_s18 + $0x380] ss:$48 sps:$4 sm:$0xff]  }
 0x353   : > { %3372 = vmatpush1.bf16.msra.mxu0 %v10453_v32  ;;  %v10528_v32 = vld [vmem:[%s12316_s18 + $0x388] ss:$48 sps:$4 sm:$0xff]  }
 0x354   : > { %3458 = vmatpush1.bf16.msra.mxu1 %v10456_v33  ;;  %3373 = vmatprep.subr.bf16.mxu0 %v10461_v34  ;;  %v10533_v33 = vld [vmem:[%s12316_s18 + $0x3e4] ss:$48 sps:$4 sm:$0xff]   ;;  %v10536_v34 = vld [vmem:[%s12316_s18 + $0x3ec] ss:$48 sps:$4 sm:$0xff]  }
 0x355   : > { %3459 = vmatprep.subr.bf16.mxu1 %v10464_v35  ;;  %v10531_v35 = vld [vmem:[%s12316_s18 + $0x3e0] ss:$48 sps:$4 sm:$0xff]  }
 0x357   : > { %3374 = vmatpush1.bf16.msra.mxu0 %v10459_v36  ;;  %v10534_v36 = vld [vmem:[%s12316_s18 + $0x3e8] ss:$48 sps:$4 sm:$0xff]  }
 0x358   : > { %3460 = vmatpush1.bf16.msra.mxu1 %v10462_v54  ;;  %3375 = vmatprep.subr.bf16.mxu0 %v10467_v38  ;;  %v10539_v54 = vld [vmem:[%s12316_s18 + $0x444] ss:$48 sps:$4 sm:$0xff]   ;;  %v10542_v38 = vld [vmem:[%s12316_s18 + $0x44c] ss:$48 sps:$4 sm:$0xff]  }
 0x359   : > { %3461 = vmatprep.subr.bf16.mxu1 %v10470_v59  ;;  %v10537_v59 = vld [vmem:[%s12316_s18 + $0x440] ss:$48 sps:$4 sm:$0xff]  }
 0x35b   : > { %3376 = vmatpush1.bf16.msra.mxu0 %v10465_v43  ;;  %v10540_v43 = vld [vmem:[%s12316_s18 + $0x448] ss:$48 sps:$4 sm:$0xff]  }
 0x35c   : > { %3462 = vmatpush1.bf16.msra.mxu1 %v10468_v45  ;;  %3474 = vmatprep.subr.bf16.mxu0 %v10473_v46  ;;  %v10545_v45 = vld [vmem:[%s12316_s18 + $0x4a4] ss:$48 sps:$4 sm:$0xff]   ;;  %v10548_v46 = vld [vmem:[%s12316_s18 + $0x4ac] ss:$48 sps:$4 sm:$0xff]  }
 0x35d   : > { %3560 = vmatprep.subr.bf16.mxu1 %v10476_v47  ;;  %v10543_v47 = vld [vmem:[%s12316_s18 + $0x4a0] ss:$48 sps:$4 sm:$0xff]  }
 0x35e   : > { %3378 = vmatmul.mubr.bf16.vlgmr.msra.gmra.mrb[4].mxu0 %v12619_v9 }
 0x35f   : > { %3464 = vmatmul.mubr.bf16.vlgmr.msra.gmra.mrb[4].mxu1 %v12619_v9  ;;  %3475 = vmatpush1.bf16.msra.mxu0 %v10471_v53  ;;  %v10546_v53 = vld [vmem:[%s12316_s18 + $0x4a8] ss:$48 sps:$4 sm:$0xff]  }
 0x360   : > { %3506 = vmatprep.mubr.bf16.mxu0 %v12521_v41  ;;  %3561 = vmatpush1.bf16.msra.mxu1 %v10474_v55  ;;  %v10551_v55 = vld [vmem:[%s12316_s18 + $0x504] ss:$48 sps:$4 sm:$0xff]  }
 0x361   : > { %3592 = vmatprep.mubr.bf16.mxu1 %v12521_v41  ;;  %3476 = vmatprep.subr.bf16.mxu0 %v10479_v56  ;;  %v10489_v41 = vld [vmem:[%s12316_s18 + $0x140] ss:$48 sps:$4 sm:$0xff]   ;;  %v10554_v56 = vld [vmem:[%s12316_s18 + $0x50c] ss:$48 sps:$4 sm:$0xff]  }
 0x362   : > { %3562 = vmatprep.subr.bf16.mxu1 %v10482_v57  ;;  %v10549_v57 = vld [vmem:[%s12316_s18 + $0x500] ss:$48 sps:$4 sm:$0xff]  }
 0x363   : > { %3477 = vmatpush1.bf16.msra.mxu0 %v10477_v58  ;;  %v10552_v58 = vld [vmem:[%s12316_s18 + $0x508] ss:$48 sps:$4 sm:$0xff]  }
 0x364   : > { %3563 = vmatpush1.bf16.msra.mxu1 %v10480_v61  ;;  %3478 = vmatprep.subr.bf16.mxu0 %v10485_v63  ;;  %v10557_v61 = vld [vmem:[%s12316_s18 + $0x564] ss:$48 sps:$4 sm:$0xff]   ;;  %v10560_v63 = vld [vmem:[%s12316_s18 + $0x56c] ss:$48 sps:$4 sm:$0xff]  }
 0x365   : > { %3564 = vmatprep.subr.bf16.mxu1 %v10488_v0  ;;  %v10555_v0 = vld [vmem:[%s12316_s18 + $0x560] ss:$48 sps:$4 sm:$0xff]  }
 0x367   : > { %3479 = vmatpush1.bf16.msra.mxu0 %v10483_v1  ;;  %v10558_v1 = vld [vmem:[%s12316_s18 + $0x568] ss:$48 sps:$4 sm:$0xff]  }
 0x368   : > { %3565 = vmatpush1.bf16.msra.mxu1 %v10486_v62  ;;  %3480 = vmatprep.subr.bf16.mxu0 %v10491_v25  ;;  %v10563_v62 = vld [vmem:[%s12316_s18 + $0x5c4] ss:$48 sps:$4 sm:$0xff]   ;;  %v10566_v25 = vld [vmem:[%s12316_s18 + $0x5cc] ss:$48 sps:$4 sm:$0xff]  }
 0x369   : > { %3566 = vmatprep.subr.bf16.mxu1 %v10494_v52  ;;  %v10561_v52 = vld [vmem:[%s12316_s18 + $0x5c0] ss:$48 sps:$4 sm:$0xff]  }
 0x36b   : > { %3481 = vmatpush1.bf16.msra.mxu0 %v10489_v41  ;;  %v10564_v41 = vld [vmem:[%s12316_s18 + $0x5c8] ss:$48 sps:$4 sm:$0xff]  }
 0x36c   : > { %3567 = vmatpush1.bf16.msra.mxu1 %v10492_v18  ;;  %3482 = vmatprep.subr.bf16.mxu0 %v10497_v3  ;;  %v10569_v18 = vld [vmem:[%s12316_s18 + $0x624] ss:$48 sps:$4 sm:$0xff]   ;;  %v10572_v3 = vld [vmem:[%s12316_s18 + $0x62c] ss:$48 sps:$4 sm:$0xff]  }
 0x36d   : > { %3568 = vmatprep.subr.bf16.mxu1 %v10500_v5  ;;  %v10567_v5 = vld [vmem:[%s12316_s18 + $0x620] ss:$48 sps:$4 sm:$0xff]  }
 0x36f   : > { %3483 = vmatpush1.bf16.msra.mxu0 %v10495_v6  ;;  %v10570_v6 = vld [vmem:[%s12316_s18 + $0x628] ss:$48 sps:$4 sm:$0xff]  }
 0x370   : > { %3569 = vmatpush1.bf16.msra.mxu1 %v10498_v8  ;;  %3484 = vmatprep.subr.bf16.mxu0 %v10503_v10  ;;  %v10575_v8 = vld [vmem:[%s12316_s18 + $0x684] ss:$48 sps:$4 sm:$0xff]   ;;  %v10578_v10 = vld [vmem:[%s12316_s18 + $0x68c] ss:$48 sps:$4 sm:$0xff]  }
 0x371   : > { %3570 = vmatprep.subr.bf16.mxu1 %v10506_v11  ;;  %v10573_v11 = vld [vmem:[%s12316_s18 + $0x680] ss:$48 sps:$4 sm:$0xff]  }
 0x373   : > { %3485 = vmatpush1.bf16.msra.mxu0 %v10501_v12  ;;  %v10576_v12 = vld [vmem:[%s12316_s18 + $0x688] ss:$48 sps:$4 sm:$0xff]  }
 0x374   : > { %3571 = vmatpush1.bf16.msra.mxu1 %v10504_v13  ;;  %3486 = vmatprep.subr.bf16.mxu0 %v10509_v15  ;;  %v10581_v13 = vld [vmem:[%s12316_s18 + $0x6e4] ss:$48 sps:$4 sm:$0xff]   ;;  %v10584_v15 = vld [vmem:[%s12316_s18 + $0x6ec] ss:$48 sps:$4 sm:$0xff]  }
 0x375   : > { %3572 = vmatprep.subr.bf16.mxu1 %v10512_v17  ;;  %v10582_v17 = vld [vmem:[%s12316_s18 + $0x6e8] ss:$48 sps:$4 sm:$0xff]  }
 0x377   : > { %3487 = vmatpush1.bf16.msra.mxu0 %v10507_v20  ;;  %v10587_v20 = vld [vmem:[%s12316_s18 + $0x744] ss:$48 sps:$4 sm:$0xff]  }
 0x378   : > { %3573 = vmatpush1.bf16.msra.mxu1 %v10510_v21  ;;  %3488 = vmatprep.subr.bf16.mxu0 %v10515_v22  ;;  %v10590_v21 = vld [vmem:[%s12316_s18 + $0x74c] ss:$48 sps:$4 sm:$0xff]   ;;  %v10588_v22 = vld [vmem:[%s12316_s18 + $0x748] ss:$48 sps:$4 sm:$0xff]  }
 0x379   : > { %3574 = vmatprep.subr.bf16.mxu1 %v10518_v23  ;;  %v10593_v23 = vld [vmem:[%s12316_s18 + $0x7a4] ss:$48 sps:$4 sm:$0xff]  }
 0x37b   : > { %3489 = vmatpush1.bf16.msra.mxu0 %v10513_v24  ;;  %v10596_v24 = vld [vmem:[%s12316_s18 + $0x7ac] ss:$48 sps:$4 sm:$0xff]  }
 0x37c   : > { %3575 = vmatpush1.bf16.msra.mxu1 %v10516_v26  ;;  %3490 = vmatprep.subr.bf16.mxu0 %v10521_v27  ;;  %v10591_v26 = vld [vmem:[%s12316_s18 + $0x7a0] ss:$48 sps:$4 sm:$0xff]   ;;  %v3648_v27 = vsub.s32 4, %v12474_v14 }
 0x37d   : > { %3576 = vmatprep.subr.bf16.mxu1 %v10524_v28  ;;  %v10594_v28 = vld [vmem:[%s12316_s18 + $0x7a8] ss:$48 sps:$4 sm:$0xff]  }
 0x37f   : > { %3491 = vmatpush1.bf16.msra.mxu0 %v10519_v51  ;;  %v10599_v51 = vld [vmem:[%s12316_s18 + $0x804] ss:$48 sps:$4 sm:$0xff]  }
 0x380   : > { %3577 = vmatpush1.bf16.msra.mxu1 %v10522_v29  ;;  %3492 = vmatprep.subr.bf16.mxu0 %v10527_v50  ;;  %v10602_v29 = vld [vmem:[%s12316_s18 + $0x80c] ss:$48 sps:$4 sm:$0xff]   ;;  %v12850_v50 = vld [vmem:[%s12330_s26] sm:$0xff] }
 0x381   : > { %3578 = vmatprep.subr.bf16.mxu1 %v10530_v30  ;;  %v3649_v30 = vrot.slane %v12850_v50, %v3648_v27 }
 0x383   : > { %3493 = vmatpush1.bf16.msra.mxu0 %v10525_v31  ;;  %v10597_v31 = vld [vmem:[%s12316_s18 + $0x800] ss:$48 sps:$4 sm:$0xff]  }
 0x384   : > { %3579 = vmatpush1.bf16.msra.mxu1 %v10528_v32  ;;  %3494 = vmatprep.subr.bf16.mxu0 %v10533_v33  ;;  %v3657_v32 = vrot.slane %v12592_v49, %v3648_v27  ;;  %v10600_v33 = vld [vmem:[%s12316_s18 + $0x808] ss:$48 sps:$4 sm:$0xff]  }
 0x385   : > { %3580 = vmatprep.subr.bf16.mxu1 %v10536_v34  ;;  %v10605_v34 = vld [vmem:[%s12316_s18 + $0x864] ss:$48 sps:$4 sm:$0xff]  }
 0x387   : > { %3495 = vmatpush1.bf16.msra.mxu0 %v10531_v35 }
 0x388   : > { %3581 = vmatpush1.bf16.msra.mxu1 %v10534_v36  ;;  %3496 = vmatprep.subr.bf16.mxu0 %v10539_v54  ;;  %v12858_v54 = vld [vmem:[%s12330_s26 + $0x8] sm:$0xff] }
 0x389   : > { %3582 = vmatprep.subr.bf16.mxu1 %v10542_v38  ;;  %v3653_v38 = vrot.slane %v12858_v54, %v3648_v27 }
 0x38b   : > { %3497 = vmatpush1.bf16.msra.mxu0 %v10537_v59  ;;  %v12862_v59 = vld [vmem:[%s12330_s26 + $0x18] sm:$0xff] }
 0x38c   : > { %3583 = vmatpush1.bf16.msra.mxu1 %v10540_v43  ;;  %3498 = vmatprep.subr.bf16.mxu0 %v10545_v45  ;;  %v3661_v43 = vrot.slane %v12862_v59, %v3648_v27  ;;  %v10608_v45 = vld [vmem:[%s12316_s18 + $0x86c] ss:$48 sps:$4 sm:$0xff]   ;;  %v10630_v27 = vld [vmem:[%s12316_s18 + $0x9e8] ss:$48 sps:$4 sm:$0xff]  }
 0x38d   : > { %3584 = vmatprep.subr.bf16.mxu1 %v10548_v46 }
 0x38f   : > { %3499 = vmatpush1.bf16.msra.mxu0 %v10543_v47 }
 0x390   : > { %3585 = vmatpush1.bf16.msra.mxu1 %v10546_v53  ;;  %3500 = vmatprep.subr.bf16.mxu0 %v10551_v55 }
 0x391   : > { %3586 = vmatprep.subr.bf16.mxu1 %v10554_v56  ;;  %v10603_v56 = vld [vmem:[%s12316_s18 + $0x860] ss:$48 sps:$4 sm:$0xff]  }
 0x393   : > { %3501 = vmatpush1.bf16.msra.mxu0 %v10549_v57 }
 0x394   : > { %3587 = vmatpush1.bf16.msra.mxu1 %v10552_v58  ;;  %3502 = vmatprep.subr.bf16.mxu0 %v10557_v61 }
 0x395   : > { %3588 = vmatprep.subr.bf16.mxu1 %v10560_v63 }
 0x397   : > { %3503 = vmatpush1.bf16.msra.mxu0 %v10555_v0 }
 0x398   : > { %3589 = vmatpush1.bf16.msra.mxu1 %v10558_v1  ;;  %3504 = vmatprep.subr.bf16.mxu0 %v10563_v62  ;;  %v10606_v1 = vld [vmem:[%s12316_s18 + $0x868] ss:$48 sps:$4 sm:$0xff]   ;;  %v10611_v62 = vld [vmem:[%s12316_s18 + $0x8c4] ss:$48 sps:$4 sm:$0xff]  }
 0x399   : > { %3590 = vmatprep.subr.bf16.mxu1 %v10566_v25 }
 0x39b   : > { %3505 = vmatpush1.bf16.msra.mxu0 %v10561_v52 }
 0x39c   : > { %3591 = vmatpush1.bf16.msra.mxu1 %v10564_v41  ;;  %3517 = vmatprep.subr.bf16.mxu0 %v10569_v18 }
 0x39d   : > { %3603 = vmatprep.subr.bf16.mxu1 %v10572_v3  ;;  %v10614_v3 = vld [vmem:[%s12316_s18 + $0x8cc] ss:$48 sps:$4 sm:$0xff]  }
 0x39e   : > { %3507 = vmatmul.mubr.bf16.vlgmr.msra.gmra.mrb[8].mxu0 %v12525_v42 }
 0x39f   : > { %3593 = vmatmul.mubr.bf16.vlgmr.msra.gmra.mrb[8].mxu1 %v12525_v42  ;;  %3518 = vmatpush1.bf16.msra.mxu0 %v10567_v5  ;;  %v10579_v42 = vld [vmem:[%s12316_s18 + $0x6e0] ss:$48 sps:$4 sm:$0xff]  }
 0x3a0   : > { %3549 = vmatprep.mubr.bf16.mxu0 %v12539_v48  ;;  %3604 = vmatpush1.bf16.msra.mxu1 %v10570_v6 }
 0x3a1   : > { %3635 = vmatprep.mubr.bf16.mxu1 %v12539_v48  ;;  %3519 = vmatprep.subr.bf16.mxu0 %v10575_v8  ;;  %v10585_v48 = vld [vmem:[%s12316_s18 + $0x740] ss:$48 sps:$4 sm:$0xff]  }
 0x3a2   : > { %3605 = vmatprep.subr.bf16.mxu1 %v10578_v10 }
 0x3a3   : > { %3520 = vmatpush1.bf16.msra.mxu0 %v10573_v11  ;;  %v10609_v11 = vld [vmem:[%s12316_s18 + $0x8c0] ss:$48 sps:$4 sm:$0xff]  }
 0x3a4   : > { %3606 = vmatpush1.bf16.msra.mxu1 %v10576_v12  ;;  %3521 = vmatprep.subr.bf16.mxu0 %v10581_v13  ;;  %v10612_v12 = vld [vmem:[%s12316_s18 + $0x8c8] ss:$48 sps:$4 sm:$0xff]   ;;  %v10617_v13 = vld [vmem:[%s12316_s18 + $0x924] ss:$48 sps:$4 sm:$0xff]  }
 0x3a5   : > { %3607 = vmatprep.subr.bf16.mxu1 %v10584_v15  ;;  %v10620_v15 = vld [vmem:[%s12316_s18 + $0x92c] ss:$48 sps:$4 sm:$0xff]  }
 0x3a7   : > { %3522 = vmatpush1.bf16.msra.mxu0 %v10579_v42  ;;  %v10615_v42 = vld [vmem:[%s12316_s18 + $0x920] ss:$48 sps:$4 sm:$0xff]  }
 0x3a8   : > { %3608 = vmatpush1.bf16.msra.mxu1 %v10582_v17  ;;  %3523 = vmatprep.subr.bf16.mxu0 %v10587_v20  ;;  %v10618_v17 = vld [vmem:[%s12316_s18 + $0x928] ss:$48 sps:$4 sm:$0xff]   ;;  %v10623_v20 = vld [vmem:[%s12316_s18 + $0x984] ss:$48 sps:$4 sm:$0xff]  }
 0x3a9   : > { %3609 = vmatprep.subr.bf16.mxu1 %v10590_v21  ;;  %v10626_v21 = vld [vmem:[%s12316_s18 + $0x98c] ss:$48 sps:$4 sm:$0xff]  }
 0x3ab   : > { %3524 = vmatpush1.bf16.msra.mxu0 %v10585_v48  ;;  %v10621_v48 = vld [vmem:[%s12316_s18 + $0x980] ss:$48 sps:$4 sm:$0xff]  }
 0x3ac   : > { %3610 = vmatpush1.bf16.msra.mxu1 %v10588_v22  ;;  %3525 = vmatprep.subr.bf16.mxu0 %v10593_v23  ;;  %v10624_v22 = vld [vmem:[%s12316_s18 + $0x988] ss:$48 sps:$4 sm:$0xff]   ;;  %v10629_v23 = vld [vmem:[%s12316_s18 + $0x9e4] ss:$48 sps:$4 sm:$0xff]  }
 0x3ad   : > { %3611 = vmatprep.subr.bf16.mxu1 %v10596_v24  ;;  %v10632_v24 = vld [vmem:[%s12316_s18 + $0x9ec] ss:$48 sps:$4 sm:$0xff]  }
 0x3af   : > { %3526 = vmatpush1.bf16.msra.mxu0 %v10591_v26  ;;  %v10627_v26 = vld [vmem:[%s12316_s18 + $0x9e0] ss:$48 sps:$4 sm:$0xff]  }
 0x3b0   : > { %3612 = vmatpush1.bf16.msra.mxu1 %v10594_v28  ;;  %3527 = vmatprep.subr.bf16.mxu0 %v10599_v51  ;;  %v10635_v28 = vld [vmem:[%s12316_s18 + $0xa44] ss:$48 sps:$4 sm:$0xff]   ;;  %v10638_v51 = vld [vmem:[%s12316_s18 + $0xa4c] ss:$48 sps:$4 sm:$0xff]  }
 0x3b1   : > { %v3207_v35 = vpop.f32.mrb[0].mxu0  ;;  %v3293_v36 = vpop.f32.mrb[0].mxu1  ;;  %3613 = vmatprep.subr.bf16.mxu1 %v10602_v29  ;;  %v10633_v29 = vld [vmem:[%s12316_s18 + $0xa40] ss:$48 sps:$4 sm:$0xff]  }
 0x3b2   : > { %v3209_v46 = vpop.f32.mrb[1].mxu0  ;;  %v3295_v49 = vpop.f32.mrb[1].mxu1  ;;  %v12866_v47 = vadd.f32 %v3649_v30, %v3207_v35  ;;  %v12869_v57 = vadd.f32 %v3657_v32, %v3293_v36  ;;  %v10647_v35 = vld [vmem:[%s12316_s18 + $0xb04] ss:$48 sps:$4 sm:$0xff]   ;;  %v10650_v36 = vld [vmem:[%s12316_s18 + $0xb0c] ss:$48 sps:$4 sm:$0xff]  }
 0x3b3   : > { %v3211_v53 = vpop.f32.mrb[2].mxu0  ;;  %v3297_v55 = vpop.f32.mrb[2].mxu1  ;;  %3528 = vmatpush1.bf16.msra.mxu0 %v10597_v31  ;;  %v12877_v25 = vadd.f32 %v3653_v38, %v3209_v46  ;;  %v12879_v52 = vadd.f32 %v3661_v43, %v3295_v49  ;;  %v10641_v31 = vld [vmem:[%s12316_s18 + $0xaa4] ss:$48 sps:$4 sm:$0xff]   ;;  %v10656_v46 = vld [vmem:[%s12316_s18 + $0xb6c] ss:$48 sps:$4 sm:$0xff]  }
 0x3b4   : > { %v12871_v58 = vadd.f32 %v3649_v30, %v3211_v53  ;;  %v12873_v61 = vadd.f32 %v3657_v32, %v3297_v55  ;;  %3614 = vmatpush1.bf16.msra.mxu1 %v10600_v33  ;;  %v3213_v63 = vpop.f32.mrb[3].mxu0  ;;  %v3299_v0 = vpop.f32.mrb[3].mxu1  ;;  %3529 = vmatprep.subr.bf16.mxu0 %v10605_v34  ;;  %v10636_v30 = vld [vmem:[%s12316_s18 + $0xa48] ss:$48 sps:$4 sm:$0xff]   ;;  %v10644_v32 = vld [vmem:[%s12316_s18 + $0xaac] ss:$48 sps:$4 sm:$0xff]  }
 0x3b5   : > { %v12881_v41 = vadd.f32 %v3653_v38, %v3213_v63  ;;  %v12883_v18 = vadd.f32 %v3661_v43, %v3299_v0  ;;  %3615 = vmatprep.subr.bf16.mxu1 %v10608_v45  ;;  %v10639_v33 = vld [vmem:[%s12316_s18 + $0xaa0] ss:$48 sps:$4 sm:$0xff]   ;;  %v10642_v34 = vld [vmem:[%s12316_s18 + $0xaa8] ss:$48 sps:$4 sm:$0xff]   ;;  %v10653_v45 = vld [vmem:[%s12316_s18 + $0xb64] ss:$48 sps:$4 sm:$0xff]  }
 0x3b6   : > { %v3718_v5 = vpack.c.bf16 %v12871_v58, %v12866_v47  ;;  %v3953_v6 = vpack.c.bf16 %v12873_v61, %v12869_v57  ;;  %v10645_v38 = vld [vmem:[%s12316_s18 + $0xb00] ss:$48 sps:$4 sm:$0xff]   ;;  %v10648_v43 = vld [vmem:[%s12316_s18 + $0xb08] ss:$48 sps:$4 sm:$0xff]   ;;  %v10659_v55 = vld [vmem:[%s12316_s18 + $0xbc4] ss:$48 sps:$4 sm:$0xff]  }
 0x3b7   : > { %v3836_v8 = vpack.c.bf16 %v12881_v41, %v12877_v25  ;;  %v4070_v10 = vpack.c.bf16 %v12883_v18, %v12879_v52  ;;  %3530 = vmatpush1.bf16.msra.mxu0 %v10603_v56  ;;  %v10651_v49 = vld [vmem:[%s12316_s18 + $0xb60] ss:$48 sps:$4 sm:$0xff]   ;;  %v10654_v53 = vld [vmem:[%s12316_s18 + $0xb68] ss:$48 sps:$4 sm:$0xff]   ;;  %v10662_v56 = vld [vmem:[%s12316_s18 + $0xbcc] ss:$48 sps:$4 sm:$0xff]  }
 0x3b8   : > { %3616 = vmatpush1.bf16.msra.mxu1 %v10606_v1  ;;  %3531 = vmatprep.subr.bf16.mxu0 %v10611_v62  ;;  %v10657_v63 = vld [vmem:[%s12316_s18 + $0xbc0] ss:$48 sps:$4 sm:$0xff]   ;;  %v10660_v0 = vld [vmem:[%s12316_s18 + $0xbc8] ss:$48 sps:$4 sm:$0xff]   ;;  %v11859_v1 = vmov 0.0   ;;  %v3672_v62 = vsub.s32 5, %v12474_v14 }
 0x3b9   : > { %3617 = vmatprep.subr.bf16.mxu1 %v10614_v3  ;;  %v3696_v47 = vsub.s32 6, %v12474_v14  ;;  %s13896_s18 = sld [smem:[#allocation29_spill]] }
 0x3ba   : > { %v3673_v3 = vrot.slane %v12850_v50, %v3672_v62 }
 0x3bb   : > { %3532 = vmatpush1.bf16.msra.mxu0 %v10609_v11  ;;  %v3701_v25 = vrot.slane %v12858_v54, %v3696_v47  ;;  %v3697_v41 = vrot.slane %v12850_v50, %v3696_v47 }
 0x3bc   : > { %3618 = vmatpush1.bf16.msra.mxu1 %v10612_v12  ;;  %3533 = vmatprep.subr.bf16.mxu0 %v10617_v13  ;;  %v12939_v12 = vld [vmem:[%s12330_s26 + $0x10] sm:$0xff] }
 0x3bd   : > { %3619 = vmatprep.subr.bf16.mxu1 %v10620_v15  ;;  %v3681_v13 = vrot.slane %v12939_v12, %v3672_v62  ;;  %v3677_v15 = vrot.slane %v12858_v54, %v3672_v62  ;;  %v3705_v58 = vrot.slane %v12939_v12, %v3696_v47 }
 0x3bf   : > { %3534 = vmatpush1.bf16.msra.mxu0 %v10615_v42 }
 0x3c0   : > { %3620 = vmatpush1.bf16.msra.mxu1 %v10618_v17  ;;  %3535 = vmatprep.subr.bf16.mxu0 %v10623_v20  ;;  %v3685_v17 = vrot.slane %v12862_v59, %v3672_v62  ;;  %v705_v62 = vld [vmem:[#allocation6] sm:$0xff] }
 0x3c1   : > { %3621 = vmatprep.subr.bf16.mxu1 %v10626_v21 }
 0x3c3   : > { %3536 = vmatpush1.bf16.msra.mxu0 %v10621_v48 }
 0x3c4   : > { %3622 = vmatpush1.bf16.msra.mxu1 %v10624_v22  ;;  %3537 = vmatprep.subr.bf16.mxu0 %v10629_v23 }
 0x3c5   : > { %3623 = vmatprep.subr.bf16.mxu1 %v10632_v24 }
 0x3c7   : > { %3538 = vmatpush1.bf16.msra.mxu0 %v10627_v26 }
 0x3c8   : > { %3624 = vmatpush1.bf16.msra.mxu1 %v10630_v27  ;;  %3539 = vmatprep.subr.bf16.mxu0 %v10635_v28 }
 0x3c9   : > { %3625 = vmatprep.subr.bf16.mxu1 %v10638_v51 }
 0x3cb   : > { %3540 = vmatpush1.bf16.msra.mxu0 %v10633_v29 }
 0x3cc   : > { %3626 = vmatpush1.bf16.msra.mxu1 %v10636_v30  ;;  %3541 = vmatprep.subr.bf16.mxu0 %v10641_v31 }
 0x3cd   : > { %3627 = vmatprep.subr.bf16.mxu1 %v10644_v32 }
 0x3cf   : > { %3542 = vmatpush1.bf16.msra.mxu0 %v10639_v33 }
 0x3d0   : > { %3628 = vmatpush1.bf16.msra.mxu1 %v10642_v34  ;;  %3543 = vmatprep.subr.bf16.mxu0 %v10647_v35 }
 0x3d1   : > { %3629 = vmatprep.subr.bf16.mxu1 %v10650_v36 }
 0x3d3   : > { %3544 = vmatpush1.bf16.msra.mxu0 %v10645_v38 }
 0x3d4   : > { %3630 = vmatpush1.bf16.msra.mxu1 %v10648_v43  ;;  %3545 = vmatprep.subr.bf16.mxu0 %v10653_v45 }
 0x3d5   : > { %3631 = vmatprep.subr.bf16.mxu1 %v10656_v46 }
 0x3d7   : > { %3546 = vmatpush1.bf16.msra.mxu0 %v10651_v49 }
 0x3d8   : > { %3632 = vmatpush1.bf16.msra.mxu1 %v10654_v53  ;;  %3547 = vmatprep.subr.bf16.mxu0 %v10659_v55 }
 0x3d9   : > { %3633 = vmatprep.subr.bf16.mxu1 %v10662_v56 }
 0x3db   : > { %3548 = vmatpush1.bf16.msra.mxu0 %v10657_v63 }
 0x3dc   : > { %3634 = vmatpush1.bf16.msra.mxu1 %v10660_v0  ;;  %9823 = vmatprep.subr.bf16.mxu0 %v11859_v1 }
 0x3dd   : > { %9829 = vmatprep.subr.bf16.mxu1 %v11859_v1 }
 0x3de   : > { %3550 = vmatmul.mubr.bf16.vlgmr.msra.gmra.mrb[8].mxu0 %v12619_v9 }
 0x3df   : > { %3636 = vmatmul.mubr.bf16.vlgmr.msra.gmra.mrb[8].mxu1 %v12619_v9  ;;  %9825 = vmatprep.mubr.msk.bf16.mxu0 %vm11860_vm5, %v11859_v1 }
 0x3e0   : > { %9831 = vmatprep.mubr.msk.bf16.mxu1 %vm11860_vm5, %v11859_v1 }
 0x431   : > { %v3379_v11 = vpop.f32.mrb[4].mxu0 }
 0x432   : > { %v3465_v42 = vpop.f32.mrb[4].mxu1  ;;  %v3381_v9 = vpop.f32.mrb[5].mxu0  ;;  %v3686_v48 = vadd.f32 %v3673_v3, %v3379_v11 }
 0x433   : > { %v3467_v20 = vpop.f32.mrb[5].mxu1  ;;  %v3383_v21 = vpop.f32.mrb[6].mxu0  ;;  %v3688_v26 = vadd.f32 %v3681_v13, %v3465_v42  ;;  %v3687_v27 = vadd.f32 %v3677_v15, %v3381_v9 }
 0x434   : > { %v3690_v22 = vadd.f32 %v3673_v3, %v3383_v21  ;;  %v3469_v23 = vpop.f32.mrb[6].mxu1  ;;  %v3385_v24 = vpop.f32.mrb[7].mxu0  ;;  %v3689_v30 = vadd.f32 %v3685_v17, %v3467_v20 }
 0x435   : > { %v3692_v28 = vadd.f32 %v3681_v13, %v3469_v23  ;;  %v3691_v51 = vadd.f32 %v3677_v15, %v3385_v24  ;;  %v3471_v29 = vpop.f32.mrb[7].mxu1  ;;  %v706_v15 = vld [vmem:[#allocation6 + $0x8] sm:$0xff] }
 0x436   : > { %v3719_v31 = vpack.c.bf16 %v3690_v22, %v3686_v48  ;;  %v3693_v32 = vadd.f32 %v3685_v17, %v3471_v29 }
 0x437   : > { %v3954_v33 = vpack.c.bf16 %v3692_v28, %v3688_v26  ;;  %v3837_v34 = vpack.c.bf16 %v3691_v51, %v3687_v27 }
 0x438   : > { %v4071_v35 = vpack.c.bf16 %v3693_v32, %v3689_v30  ;;  %9824 = vmatpush3.bf16.xpose.msra.mxu0 %v3719_v31 }
 0x439   : > { %9835 = vmatprep.subr.bf16.mxu0 %v11859_v1 }
 0x43f   : > { %9826 = vmatmul.mubr.bf16.vlgmr.msra.gmra.mrb[12].mxu0 %v3718_v5  ;;  %v3709_v5 = vrot.slane %v12862_v59, %v3696_v47 }
 0x440   : > { %9836 = vmatpush3.bf16.xpose.msra.mxu0 %v3837_v34  ;;  %9837 = vmatprep.mubr.msk.bf16.mxu0 %vm11860_vm5, %v11859_v1 }
 0x441   : > { %9847 = vmatprep.subr.bf16.mxu0 %v11859_v1 }
 0x447   : > { %9838 = vmatmul.mubr.bf16.vlgmr.msra.gmra.mrb[16].mxu0 %v3836_v8 }
 0x448   : > { %9848 = vmatpush3.bf16.xpose.msra.mxu0 %v3954_v33  ;;  %9849 = vmatprep.mubr.msk.bf16.mxu0 %vm11860_vm5, %v11859_v1 }
 0x449   : > { %9859 = vmatprep.subr.bf16.mxu0 %v11859_v1 }
 0x44f   : > { %9850 = vmatmul.mubr.bf16.vlgmr.msra.gmra.mrb[20].mxu0 %v3953_v6 }
 0x450   : > { %9860 = vmatpush3.bf16.xpose.msra.mxu0 %v4071_v35  ;;  %9861 = vmatprep.mubr.msk.bf16.mxu0 %vm11860_vm5, %v11859_v1 }
 0x457   : > { %9862 = vmatmul.mubr.bf16.vlgmr.msra.gmra.mrb[24].mxu0 %v4070_v10 }
 0x4b1   : > { %v3551_v57 = vpop.f32.mrb[8].mxu0 }
 0x4b2   : > { %v3637_v61 = vpop.f32.mrb[8].mxu1  ;;  %v3553_v6 = vpop.f32.mrb[9].mxu0  ;;  %v3710_v18 = vadd.f32 %v3697_v41, %v3551_v57 }
 0x4b3   : > { %v12970_v8 = vadd.f32 %v3705_v58, %v3637_v61  ;;  %v12972_v36 = vadd.f32 %v3701_v25, %v3553_v6  ;;  %v3639_v38 = vpop.f32.mrb[9].mxu1  ;;  %v3555_v52 = vpop.f32.mrb[10].mxu0 }
 0x4b4   : > { %v12974_v10 = vadd.f32 %v3709_v5, %v3639_v38  ;;  %v3714_v43 = vadd.f32 %v3697_v41, %v3555_v52  ;;  %v3641_v45 = vpop.f32.mrb[10].mxu1  ;;  %v3557_v46 = vpop.f32.mrb[11].mxu0 }
 0x4b5   : > { %v12976_v54 = vadd.f32 %v3705_v58, %v3641_v45  ;;  %v12978_v50 = vadd.f32 %v3701_v25, %v3557_v46  ;;  %v3643_v59 = vpop.f32.mrb[11].mxu1 }
 0x4b6   : > { %v3720_v49 = vpack.c.bf16 %v3714_v43, %v3710_v18  ;;  %v12980_v53 = vadd.f32 %v3709_v5, %v3643_v59 }
 0x4b7   : > { %v3955_v55 = vpack.c.bf16 %v12976_v54, %v12970_v8  ;;  %v3838_v56 = vpack.c.bf16 %v12978_v50, %v12972_v36 }
 0x4b8   : > { %v4072_v63 = vpack.c.bf16 %v12980_v53, %v12974_v10  ;;  %9830 = vmatpush3.bf16.msra.mxu1 %v3720_v49  ;;  %v10672_v10 = vld [vmem:[%s12322_s22 + $0x28] ss:$16 sps:$4 sm:$0xff]  }
 0x4b9   : > { %9841 = vmatprep.subr.bf16.mxu1 %v11859_v1  ;;  %v10678_v53 = vld [vmem:[%s12322_s22 + $0x48] ss:$16 sps:$4 sm:$0xff]  }
 0x512   : > { %v3755_v0 = vpop.f32.mrb[12].mxu0 }
 0x513   : > { %v3762_v3 = vmul.f32 0.088388346, %v3755_v0  ;;  %v9827_v11 = vpop.f32.mrb[13].mxu0 }
 0x514   : > { %v3758_v13 = vpop.f32.mrb[14].mxu0 }
 0x515   : > { %v3763_v42 = vmul.f32 0.088388346, %v3758_v13  ;;  %v9828_v9 = vpop.f32.mrb[15].mxu0  ;;  %v3764_v17 = vadd.f32 %v3762_v3, %v705_v62 }
 0x517   : > { %v3767_v20 = vsel %vm3766_vm6, %v3764_v17, -inf  ;;  %v3765_v21 = vadd.f32 %v3763_v42, %v706_v15 }
 0x518   : > { %3768 = vmax.xlane.f32.xlu0 %v3767_v20 }
 0x519   : > { %v3770_v48 = vsel %vm3766_vm6, %v3765_v21, -inf }
 0x51a   : > { %3771 = vmax.xlane.f32.xlu1 %v3770_v48  ;;  %v3873_v22 = vpop.f32.mrb[16].mxu0 }
 0x51b   : > { %v3880_v23 = vmul.f32 0.088388346, %v3873_v22  ;;  %v9839_v24 = vpop.f32.mrb[17].mxu0 }
 0x51c   : > { %v3876_v26 = vpop.f32.mrb[18].mxu0 }
 0x51d   : > { %v3881_v27 = vmul.f32 0.088388346, %v3876_v26  ;;  %v9840_v28 = vpop.f32.mrb[19].mxu0  ;;  %v3882_v51 = vadd.f32 %v3880_v23, %v705_v62 }
 0x51f   : > { %v3884_v29 = vsel %vm3766_vm6, %v3882_v51, -inf  ;;  %v3883_v30 = vadd.f32 %v3881_v27, %v706_v15 }
 0x520   : > { %3885 = vmax.xlane.f32.xlu0 %v3884_v29 }
 0x521   : > { %v3887_v31 = vsel %vm3766_vm6, %v3883_v30, -inf }
 0x522   : > { %3888 = vmax.xlane.f32.xlu1 %v3887_v31  ;;  %v3990_v32 = vpop.f32.mrb[20].mxu0 }
 0x523   : > { %v3997_v33 = vmul.f32 0.088388346, %v3990_v32  ;;  %v9851_v34 = vpop.f32.mrb[21].mxu0 }
 0x524   : > { %v3993_v35 = vpop.f32.mrb[22].mxu0 }
 0x525   : > { %v3998_v47 = vmul.f32 0.088388346, %v3993_v35  ;;  %v9852_v58 = vpop.f32.mrb[23].mxu0  ;;  %v3999_v25 = vadd.f32 %v3997_v33, %v705_v62 }
 0x527   : > { %v4001_v41 = vsel %vm3766_vm6, %v3999_v25, -inf  ;;  %v4000_v5 = vadd.f32 %v3998_v47, %v706_v15 }
 0x528   : > { %4002 = vmax.xlane.f32.xlu0 %v4001_v41 }
 0x529   : > { %v4004_v57 = vsel %vm3766_vm6, %v4000_v5, -inf }
 0x52a   : > { %4005 = vmax.xlane.f32.xlu1 %v4004_v57  ;;  %v4107_v61 = vpop.f32.mrb[24].mxu0 }
 0x52b   : > { %v4114_v6 = vmul.f32 0.088388346, %v4107_v61  ;;  %v9863_v38 = vpop.f32.mrb[25].mxu0 }
 0x52c   : > { %v4110_v52 = vpop.f32.mrb[26].mxu0 }
 0x52d   : > { %v4115_v18 = vmul.f32 0.088388346, %v4110_v52  ;;  %v9864_v43 = vpop.f32.mrb[27].mxu0  ;;  %v4116_v45 = vadd.f32 %v4114_v6, %v705_v62 }
 0x52f   : > { %v4118_v46 = vsel %vm3766_vm6, %v4116_v45, -inf  ;;  %v4117_v59 = vadd.f32 %v4115_v18, %v706_v15 }
 0x530   : > { %4119 = vmax.xlane.f32.xlu0 %v4118_v46 }
 0x531   : > { %v4121_v49 = vsel %vm3766_vm6, %v4117_v59, -inf }
 0x532   : > { %4122 = vmax.xlane.f32.xlu1 %v4121_v49  ;;  %v10665_v49 = vld [vmem:[%s12322_s22 + $0x4] ss:$16 sps:$4 sm:$0xff]  }
 0x533   : > { %4983 = vmatprep.subr.bf16.mxu0 %v10665_v49 }
 0x5a5   : > { %v3769_v0 = vpop.xlane.xlu0 %3768 }
 0x5a6   : > { %v3773_v3 = vsub.f32 %v3764_v17, %v3769_v0  ;;  %v10671_v0 = vld [vmem:[%s12322_s22 + $0x24] ss:$16 sps:$4 sm:$0xff]  }
 0x5a7   : > { %v3772_v11 = vpop.xlane.xlu1 %3771 }
 0x5a8   : > { %v3775_v13 = vmul.f32 1.442695, %v3773_v3  ;;  %v3774_v42 = vsub.f32 %v3765_v21, %v3772_v11  ;;  %v10669_v3 = vld [vmem:[%s12322_s22 + $0x20] ss:$16 sps:$4 sm:$0xff]   ;;  %v10677_v11 = vld [vmem:[%s12322_s22 + $0x44] ss:$16 sps:$4 sm:$0xff]  }
 0x5aa   : > { %11439 = vpow2.f32 %v3775_v13  ;;  %v3777_v9 = vmul.f32 1.442695, %v3774_v42  ;;  %v10675_v13 = vld [vmem:[%s12322_s22 + $0x40] ss:$16 sps:$4 sm:$0xff]   ;;  %v10683_v42 = vld [vmem:[%s12322_s22 + $0x64] ss:$16 sps:$4 sm:$0xff]  }
 0x5ac   : > { %11441 = vpow2.f32 %v3777_v9  ;;  %v10681_v9 = vld [vmem:[%s12322_s22 + $0x60] ss:$16 sps:$4 sm:$0xff]  }
 0x5ad   : > { %v3886_v20 = vpop.xlane.xlu0 %3885 }
 0x5ae   : > { %v3890_v48 = vsub.f32 %v3882_v51, %v3886_v20  ;;  %v10689_v20 = vld [vmem:[%s12322_s22 + $0x84] ss:$16 sps:$4 sm:$0xff]  }
 0x5af   : > { %v3889_v22 = vpop.xlane.xlu1 %3888 }
 0x5b0   : > { %v3892_v23 = vmul.f32 1.442695, %v3890_v48  ;;  %v3891_v62 = vsub.f32 %v3883_v30, %v3889_v22  ;;  %v10687_v48 = vld [vmem:[%s12322_s22 + $0x80] ss:$16 sps:$4 sm:$0xff]   ;;  %v10695_v22 = vld [vmem:[%s12322_s22 + $0xa4] ss:$16 sps:$4 sm:$0xff]  }
 0x5b2   : > { %11443 = vpow2.f32 %v3892_v23  ;;  %v3894_v24 = vmul.f32 1.442695, %v3891_v62  ;;  %v10693_v23 = vld [vmem:[%s12322_s22 + $0xa0] ss:$16 sps:$4 sm:$0xff]   ;;  %v10701_v62 = vld [vmem:[%s12322_s22 + $0xc4] ss:$16 sps:$4 sm:$0xff]  }
 0x5b4   : > { %v12997_v15 = vpop.eup %11439  ;;  %11445 = vpow2.f32 %v3894_v24  ;;  %v10699_v24 = vld [vmem:[%s12322_s22 + $0xc0] ss:$16 sps:$4 sm:$0xff]  }
 0x5b5   : > { %v4003_v26 = vpop.xlane.xlu0 %4002  ;;  %v3779_v17 = vsel %vm3766_vm6, %v12997_v15, 0.0 }
 0x5b6   : > { %v13001_v27 = vpop.eup %11441  ;;  %v4007_v21 = vsub.f32 %v3999_v25, %v4003_v26  ;;  %3780 = vadd.xlane.f32.xlu0 %v3779_v17  ;;  %v10707_v26 = vld [vmem:[%s12322_s22 + $0xe4] ss:$16 sps:$4 sm:$0xff]   ;;  %v10705_v17 = vld [vmem:[%s12322_s22 + $0xe0] ss:$16 sps:$4 sm:$0xff]  }
 0x5b7   : > { %v4006_v28 = vpop.xlane.xlu1 %4005  ;;  %v3782_v51 = vsel %vm3766_vm6, %v13001_v27, 0.0 }
 0x5b8   : > { %v4009_v29 = vmul.f32 1.442695, %v4007_v21  ;;  %v4008_v31 = vsub.f32 %v4000_v5, %v4006_v28  ;;  %3783 = vadd.xlane.f32.xlu1 %v3782_v51  ;;  %v10713_v21 = vld [vmem:[%s12322_s22 + $0x104] ss:$16 sps:$4 sm:$0xff]   ;;  %v10711_v28 = vld [vmem:[%s12322_s22 + $0x100] ss:$16 sps:$4 sm:$0xff]  }
 0x5b9   : > { %v10719_v51 = vld [vmem:[%s12322_s22 + $0x124] ss:$16 sps:$4 sm:$0xff]  }
 0x5ba   : > { %11447 = vpow2.f32 %v4009_v29  ;;  %v4011_v30 = vmul.f32 1.442695, %v4008_v31  ;;  %v10717_v29 = vld [vmem:[%s12322_s22 + $0x120] ss:$16 sps:$4 sm:$0xff]   ;;  %v10725_v31 = vld [vmem:[%s12322_s22 + $0x144] ss:$16 sps:$4 sm:$0xff]  }
 0x5bc   : > { %v13005_v32 = vpop.eup %11443  ;;  %11449 = vpow2.f32 %v4011_v30  ;;  %v10723_v30 = vld [vmem:[%s12322_s22 + $0x140] ss:$16 sps:$4 sm:$0xff]  }
 0x5bd   : > { %v4120_v33 = vpop.xlane.xlu0 %4119  ;;  %v3896_v34 = vsel %vm3766_vm6, %v13005_v32, 0.0 }
 0x5be   : > { %v13009_v35 = vpop.eup %11445  ;;  %v4124_v47 = vsub.f32 %v4116_v45, %v4120_v33  ;;  %3897 = vadd.xlane.f32.xlu0 %v3896_v34  ;;  %v10731_v33 = vld [vmem:[%s12322_s22 + $0x164] ss:$16 sps:$4 sm:$0xff]   ;;  %v10729_v34 = vld [vmem:[%s12322_s22 + $0x160] ss:$16 sps:$4 sm:$0xff]  }
 0x5bf   : > { %v4123_v58 = vpop.xlane.xlu1 %4122  ;;  %v3899_v25 = vsel %vm3766_vm6, %v13009_v35, 0.0 }
 0x5c0   : > { %v4126_v41 = vmul.f32 1.442695, %v4124_v47  ;;  %v4125_v5 = vsub.f32 %v4117_v59, %v4123_v58  ;;  %3900 = vadd.xlane.f32.xlu1 %v3899_v25  ;;  %v10663_v59 = vld [vmem:[%s12322_s22] ss:$16 sps:$4 sm:$0xff]   ;;  %v10737_v47 = vld [vmem:[%s12322_s22 + $0x184] ss:$16 sps:$4 sm:$0xff]  }
 0x5c1   : > { %4984 = vmatpush1.bf16.msra.mxu0 %v10663_v59  ;;  %v10735_v58 = vld [vmem:[%s12322_s22 + $0x180] ss:$16 sps:$4 sm:$0xff]  }
 0x5c2   : > { %11451 = vpow2.f32 %v4126_v41  ;;  %v4128_v57 = vmul.f32 1.442695, %v4125_v5  ;;  %4985 = vmatprep.subr.bf16.mxu0 %v10671_v0 }
 0x5c4   : > { %v13013_v61 = vpop.eup %11447  ;;  %11453 = vpow2.f32 %v4128_v57 }
 0x5c5   : > { %v4013_v6 = vsel %vm3766_vm6, %v13013_v61, 0.0  ;;  %4986 = vmatpush1.bf16.msra.mxu0 %v10669_v3 }
 0x5c6   : > { %v13017_v38 = vpop.eup %11449  ;;  %4014 = vadd.xlane.f32.xlu0 %v4013_v6  ;;  %4987 = vmatprep.subr.bf16.mxu0 %v10677_v11 }
 0x5c7   : > { %v4016_v52 = vsel %vm3766_vm6, %v13017_v38, 0.0 }
 0x5c8   : > { %4017 = vadd.xlane.f32.xlu1 %v4016_v52 }
 0x5c9   : > { %4988 = vmatpush1.bf16.msra.mxu0 %v10675_v13 }
 0x5ca   : > { %4989 = vmatprep.subr.bf16.mxu0 %v10683_v42 }
 0x5cc   : > { %v13021_v18 = vpop.eup %11451 }
 0x5cd   : > { %v4130_v43 = vsel %vm3766_vm6, %v13021_v18, 0.0  ;;  %4990 = vmatpush1.bf16.msra.mxu0 %v10681_v9 }
 0x5ce   : > { %v13025_v45 = vpop.eup %11453  ;;  %4131 = vadd.xlane.f32.xlu0 %v4130_v43  ;;  %4991 = vmatprep.subr.bf16.mxu0 %v10689_v20 }
 0x5cf   : > { %v4133_v46 = vsel %vm3766_vm6, %v13025_v45, 0.0 }
 0x5d0   : > { %4134 = vadd.xlane.f32.xlu1 %v4133_v46 }
 0x5d1   : > { %4992 = vmatpush1.bf16.msra.mxu0 %v10687_v48 }
 0x5d2   : > { %4993 = vmatprep.subr.bf16.mxu0 %v10695_v22  ;;  %v10674_v22 = vld [vmem:[%s12322_s22 + $0x2c] ss:$16 sps:$4 sm:$0xff]  }
 0x5d5   : > { %4994 = vmatpush1.bf16.msra.mxu0 %v10693_v23  ;;  %v10690_v23 = vld [vmem:[%s12322_s22 + $0x88] ss:$16 sps:$4 sm:$0xff]  }
 0x5d6   : > { %4995 = vmatprep.subr.bf16.mxu0 %v10701_v62  ;;  %v10698_v62 = vld [vmem:[%s12322_s22 + $0xac] ss:$16 sps:$4 sm:$0xff]  }
 0x5d9   : > { %4996 = vmatpush1.bf16.msra.mxu0 %v10699_v24  ;;  %v10696_v24 = vld [vmem:[%s12322_s22 + $0xa8] ss:$16 sps:$4 sm:$0xff]  }
 0x5da   : > { %4997 = vmatprep.subr.bf16.mxu0 %v10707_v26  ;;  %v10704_v26 = vld [vmem:[%s12322_s22 + $0xcc] ss:$16 sps:$4 sm:$0xff]  }
 0x5dd   : > { %4998 = vmatpush1.bf16.msra.mxu0 %v10705_v17  ;;  %v10702_v17 = vld [vmem:[%s12322_s22 + $0xc8] ss:$16 sps:$4 sm:$0xff]  }
 0x5de   : > { %4999 = vmatprep.subr.bf16.mxu0 %v10713_v21  ;;  %v10710_v21 = vld [vmem:[%s12322_s22 + $0xec] ss:$16 sps:$4 sm:$0xff]  }
 0x5e1   : > { %5000 = vmatpush1.bf16.msra.mxu0 %v10711_v28  ;;  %v10708_v28 = vld [vmem:[%s12322_s22 + $0xe8] ss:$16 sps:$4 sm:$0xff]  }
 0x5e2   : > { %5001 = vmatprep.subr.bf16.mxu0 %v10719_v51  ;;  %v10716_v51 = vld [vmem:[%s12322_s22 + $0x10c] ss:$16 sps:$4 sm:$0xff]  }
 0x5e5   : > { %5002 = vmatpush1.bf16.msra.mxu0 %v10717_v29  ;;  %v10714_v29 = vld [vmem:[%s12322_s22 + $0x108] ss:$16 sps:$4 sm:$0xff]  }
 0x5e6   : > { %5003 = vmatprep.subr.bf16.mxu0 %v10725_v31  ;;  %v10722_v31 = vld [vmem:[%s12322_s22 + $0x12c] ss:$16 sps:$4 sm:$0xff]  }
 0x5e9   : > { %5004 = vmatpush1.bf16.msra.mxu0 %v10723_v30  ;;  %v10720_v30 = vld [vmem:[%s12322_s22 + $0x128] ss:$16 sps:$4 sm:$0xff]  }
 0x5ea   : > { %5005 = vmatprep.subr.bf16.mxu0 %v10731_v33  ;;  %v10728_v33 = vld [vmem:[%s12322_s22 + $0x14c] ss:$16 sps:$4 sm:$0xff]  }
 0x5ed   : > { %5006 = vmatpush1.bf16.msra.mxu0 %v10729_v34  ;;  %v10726_v34 = vld [vmem:[%s12322_s22 + $0x148] ss:$16 sps:$4 sm:$0xff]  }
 0x5ee   : > { %5007 = vmatprep.subr.bf16.mxu0 %v10737_v47  ;;  %v10734_v47 = vld [vmem:[%s12322_s22 + $0x16c] ss:$16 sps:$4 sm:$0xff]  }
 0x5f1   : > { %5008 = vmatpush1.bf16.msra.mxu0 %v10735_v58  ;;  %v10732_v58 = vld [vmem:[%s12322_s22 + $0x168] ss:$16 sps:$4 sm:$0xff]  }
 0x643   : > { %v3781_v25 = vpop.xlane.xlu0 %3780 }
 0x644   : > { %11455 = vrcp.f32 %v3781_v25  ;;  %v10740_v25 = vld [vmem:[%s12322_s22 + $0x18c] ss:$16 sps:$4 sm:$0xff]  }
 0x645   : > { %v3784_v41 = vpop.xlane.xlu1 %3783 }
 0x646   : > { %11457 = vrcp.f32 %v3784_v41  ;;  %v10738_v41 = vld [vmem:[%s12322_s22 + $0x188] ss:$16 sps:$4 sm:$0xff]  }
 0x64b   : > { %v3898_v5 = vpop.xlane.xlu0 %3897 }
 0x64c   : > { %11459 = vrcp.f32 %v3898_v5  ;;  %v10741_v5 = vld [vmem:[%s12322_s22 + $0x1a0] ss:$16 sps:$4 sm:$0xff]  }
 0x64d   : > { %v3901_v57 = vpop.xlane.xlu1 %3900 }
 0x64e   : > { %v11456_v6 = vpop.eup %11455  ;;  %11461 = vrcp.f32 %v3901_v57  ;;  %v10743_v57 = vld [vmem:[%s12322_s22 + $0x1a4] ss:$16 sps:$4 sm:$0xff]  }
 0x64f   : > { %v3786_v43 = vmul.f32 %v11456_v6, %v12997_v15  ;;  %v10744_v6 = vld [vmem:[%s12322_s22 + $0x1a8] ss:$16 sps:$4 sm:$0xff]   ;;  %5009 = vmatprep.subr.bf16.mxu0 %v10743_v57  ;;  %v10794_v57 = vld [vmem:[%s12322_s22 + $0x2ac] ss:$16 sps:$4 sm:$0xff]  }
 0x650   : > { %v11458_v52 = vpop.eup %11457  ;;  %5010 = vmatpush1.bf16.msra.mxu0 %v10741_v5  ;;  %v10791_v5 = vld [vmem:[%s12322_s22 + $0x2a4] ss:$16 sps:$4 sm:$0xff]  }
 0x651   : > { %v3788_v46 = vmul.f32 %v11458_v52, %v13001_v27  ;;  %v10746_v52 = vld [vmem:[%s12322_s22 + $0x1ac] ss:$16 sps:$4 sm:$0xff]  }
 0x653   : > { %v4015_v59 = vpop.xlane.xlu0 %4014  ;;  %v3789_v49 = vpack.c.bf16 %v3788_v46, %v3786_v43  ;;  %v10749_v43 = vld [vmem:[%s12322_s22 + $0x1c4] ss:$16 sps:$4 sm:$0xff]   ;;  %v10747_v46 = vld [vmem:[%s12322_s22 + $0x1c0] ss:$16 sps:$4 sm:$0xff]  }
 0x654   : > { %11463 = vrcp.f32 %v4015_v59  ;;  %v10752_v59 = vld [vmem:[%s12322_s22 + $0x1cc] ss:$16 sps:$4 sm:$0xff]   ;;  %5011 = vmatprep.subr.bf16.mxu0 %v10749_v43  ;;  %v10797_v43 = vld [vmem:[%s12322_s22 + $0x2c4] ss:$16 sps:$4 sm:$0xff]  }
 0x655   : > { %9832 = vmatmul.mubr.msk.bf16.vlgmr.msra.gmra.mrb[12].mxu1 %vm3766_vm6, %v3789_v49  ;;  %v4018_v0 = vpop.xlane.xlu1 %4017  ;;  %v10750_v49 = vld [vmem:[%s12322_s22 + $0x1c8] ss:$16 sps:$4 sm:$0xff]   ;;  %5012 = vmatpush1.bf16.msra.mxu0 %v10747_v46  ;;  %v10800_v46 = vld [vmem:[%s12322_s22 + $0x2cc] ss:$16 sps:$4 sm:$0xff]  }
 0x656   : > { %v11460_v3 = vpop.eup %11459  ;;  %11465 = vrcp.f32 %v4018_v0  ;;  %9842 = vmatpush3.bf16.msra.mxu1 %v3838_v56  ;;  %9843 = vmatprep.mubr.msk.bf16.mxu1 %vm11860_vm5, %v11859_v1  ;;  %v10753_v0 = vld [vmem:[%s12322_s22 + $0x1e0] ss:$16 sps:$4 sm:$0xff]  }
 0x657   : > { %9853 = vmatprep.subr.bf16.mxu1 %v11859_v1  ;;  %v3903_v27 = vmul.f32 %v11460_v3, %v13005_v32  ;;  %v10755_v3 = vld [vmem:[%s12322_s22 + $0x1e4] ss:$16 sps:$4 sm:$0xff]  }
 0x658   : > { %v11462_v15 = vpop.eup %11461  ;;  %5013 = vmatprep.subr.bf16.mxu0 %v10755_v3  ;;  %v10806_v3 = vld [vmem:[%s12322_s22 + $0x2ec] ss:$16 sps:$4 sm:$0xff]  }
 0x659   : > { %v3905_v11 = vmul.f32 %v11462_v15, %v13009_v35  ;;  %v10668_v35 = vld [vmem:[%s12322_s22 + $0xc] ss:$16 sps:$4 sm:$0xff]   ;;  %v10756_v15 = vld [vmem:[%s12322_s22 + $0x1e8] ss:$16 sps:$4 sm:$0xff]   ;;  %5014 = vmatpush1.bf16.msra.mxu0 %v10753_v0  ;;  %v10803_v0 = vld [vmem:[%s12322_s22 + $0x2e4] ss:$16 sps:$4 sm:$0xff]  }
 0x65b   : > { %v4132_v13 = vpop.xlane.xlu0 %4131  ;;  %v3906_v42 = vpack.c.bf16 %v3905_v11, %v3903_v27  ;;  %v10758_v27 = vld [vmem:[%s12322_s22 + $0x1ec] ss:$16 sps:$4 sm:$0xff]   ;;  %v10761_v11 = vld [vmem:[%s12322_s22 + $0x204] ss:$16 sps:$4 sm:$0xff]  }
 0x65c   : > { %11467 = vrcp.f32 %v4132_v13  ;;  %v10764_v13 = vld [vmem:[%s12322_s22 + $0x20c] ss:$16 sps:$4 sm:$0xff]   ;;  %5026 = vmatprep.subr.bf16.mxu0 %v10761_v11  ;;  %v10809_v11 = vld [vmem:[%s12322_s22 + $0x304] ss:$16 sps:$4 sm:$0xff]  }
 0x65d   : > { %v4135_v9 = vpop.xlane.xlu1 %4134  ;;  %9844 = vmatmul.mubr.msk.bf16.vlgmr.msra.gmra.mrb[16].mxu1 %vm3766_vm6, %v3906_v42 }
 0x65e   : > { %v11464_v20 = vpop.eup %11463  ;;  %11469 = vrcp.f32 %v4135_v9  ;;  %9854 = vmatpush3.bf16.msra.mxu1 %v3955_v55  ;;  %9855 = vmatprep.mubr.msk.bf16.mxu1 %vm11860_vm5, %v11859_v1 }
 0x65f   : > { %9865 = vmatprep.subr.bf16.mxu1 %v11859_v1  ;;  %v4020_v50 = vmul.f32 %v11464_v20, %v13013_v61 }
 0x660   : > { %v11466_v36 = vpop.eup %11465 }
 0x661   : > { %v4022_v56 = vmul.f32 %v11466_v36, %v13017_v38  ;;  %v10666_v38 = vld [vmem:[%s12322_s22 + $0x8] ss:$16 sps:$4 sm:$0xff]  }
 0x663   : > { %v4023_v32 = vpack.c.bf16 %v4022_v56, %v4020_v50 }
 0x665   : > { %9856 = vmatmul.mubr.msk.bf16.vlgmr.msra.gmra.mrb[20].mxu1 %vm3766_vm6, %v4023_v32 }
 0x666   : > { %v11468_v8 = vpop.eup %11467  ;;  %9866 = vmatpush3.bf16.msra.mxu1 %v4072_v63  ;;  %9867 = vmatprep.mubr.msk.bf16.mxu1 %vm11860_vm5, %v11859_v1  ;;  %v10680_v1 = vld [vmem:[%s12322_s22 + $0x4c] ss:$16 sps:$4 sm:$0xff]  }
 0x667   : > { %5069 = vmatprep.subr.bf16.mxu1 %v10668_v35  ;;  %v4137_v55 = vmul.f32 %v11468_v8, %v13021_v18  ;;  %v10686_v63 = vld [vmem:[%s12322_s22 + $0x6c] ss:$16 sps:$4 sm:$0xff]   ;;  %v10684_v18 = vld [vmem:[%s12322_s22 + $0x68] ss:$16 sps:$4 sm:$0xff]  }
 0x668   : > { %v11470_v54 = vpop.eup %11469 }
 0x669   : > { %v4139_v61 = vmul.f32 %v11470_v54, %v13025_v45  ;;  %v10692_v45 = vld [vmem:[%s12322_s22 + $0x8c] ss:$16 sps:$4 sm:$0xff]  }
 0x66b   : > { %v4140_v48 = vpack.c.bf16 %v4139_v61, %v4137_v55  ;;  %v10759_v55 = vld [vmem:[%s12322_s22 + $0x200] ss:$16 sps:$4 sm:$0xff]   ;;  %v10762_v61 = vld [vmem:[%s12322_s22 + $0x208] ss:$16 sps:$4 sm:$0xff]  }
 0x66d   : > { %9868 = vmatmul.mubr.msk.bf16.vlgmr.msra.gmra.mrb[24].mxu1 %vm3766_vm6, %v4140_v48  ;;  %v10770_v48 = vld [vmem:[%s12322_s22 + $0x22c] ss:$16 sps:$4 sm:$0xff]  }
 0x66e   : > { %5070 = vmatpush1.bf16.msra.mxu1 %v10666_v38  ;;  %v10767_v38 = vld [vmem:[%s12322_s22 + $0x224] ss:$16 sps:$4 sm:$0xff]  }
 0x66f   : > { %5071 = vmatprep.subr.bf16.mxu1 %v10674_v22  ;;  %v10765_v22 = vld [vmem:[%s12322_s22 + $0x220] ss:$16 sps:$4 sm:$0xff]  }
 0x672   : > { %5072 = vmatpush1.bf16.msra.mxu1 %v10672_v10  ;;  %v10768_v10 = vld [vmem:[%s12322_s22 + $0x228] ss:$16 sps:$4 sm:$0xff]  }
 0x673   : > { %5073 = vmatprep.subr.bf16.mxu1 %v10680_v1 }
 0x676   : > { %5074 = vmatpush1.bf16.msra.mxu1 %v10678_v53  ;;  %v10773_v53 = vld [vmem:[%s12322_s22 + $0x244] ss:$16 sps:$4 sm:$0xff]  }
 0x677   : > { %5075 = vmatprep.subr.bf16.mxu1 %v10686_v63  ;;  %v10776_v63 = vld [vmem:[%s12322_s22 + $0x24c] ss:$16 sps:$4 sm:$0xff]  }
 0x67a   : > { %5076 = vmatpush1.bf16.msra.mxu1 %v10684_v18 }
 0x67b   : > { %5077 = vmatprep.subr.bf16.mxu1 %v10692_v45 }
 0x67e   : > { %5078 = vmatpush1.bf16.msra.mxu1 %v10690_v23 }
 0x67f   : > { %5079 = vmatprep.subr.bf16.mxu1 %v10698_v62 }
 0x682   : > { %5080 = vmatpush1.bf16.msra.mxu1 %v10696_v24  ;;  %v10771_v24 = vld [vmem:[%s12322_s22 + $0x240] ss:$16 sps:$4 sm:$0xff]  }
 0x683   : > { %5081 = vmatprep.subr.bf16.mxu1 %v10704_v26  ;;  %v10774_v26 = vld [vmem:[%s12322_s22 + $0x248] ss:$16 sps:$4 sm:$0xff]  }
 0x686   : > { %5082 = vmatpush1.bf16.msra.mxu1 %v10702_v17  ;;  %v10779_v17 = vld [vmem:[%s12322_s22 + $0x264] ss:$16 sps:$4 sm:$0xff]  }
 0x687   : > { %5083 = vmatprep.subr.bf16.mxu1 %v10710_v21  ;;  %v10782_v21 = vld [vmem:[%s12322_s22 + $0x26c] ss:$16 sps:$4 sm:$0xff]  }
 0x68a   : > { %5084 = vmatpush1.bf16.msra.mxu1 %v10708_v28  ;;  %v10777_v28 = vld [vmem:[%s12322_s22 + $0x260] ss:$16 sps:$4 sm:$0xff]  }
 0x68b   : > { %5085 = vmatprep.subr.bf16.mxu1 %v10716_v51  ;;  %v10780_v51 = vld [vmem:[%s12322_s22 + $0x268] ss:$16 sps:$4 sm:$0xff]  }
 0x68e   : > { %5086 = vmatpush1.bf16.msra.mxu1 %v10714_v29 }
 0x68f   : > { %5087 = vmatprep.subr.bf16.mxu1 %v10722_v31  ;;  %v10785_v31 = vld [vmem:[%s12322_s22 + $0x284] ss:$16 sps:$4 sm:$0xff]  }
 0x692   : > { %5088 = vmatpush1.bf16.msra.mxu1 %v10720_v30  ;;  %v10788_v30 = vld [vmem:[%s12322_s22 + $0x28c] ss:$16 sps:$4 sm:$0xff]  }
 0x693   : > { %5089 = vmatprep.subr.bf16.mxu1 %v10728_v33 }
 0x696   : > { %5090 = vmatpush1.bf16.msra.mxu1 %v10726_v34 }
 0x697   : > { %5091 = vmatprep.subr.bf16.mxu1 %v10734_v47 }
 0x69a   : > { %5092 = vmatpush1.bf16.msra.mxu1 %v10732_v58 }
 0x69b   : > { %5093 = vmatprep.subr.bf16.mxu1 %v10740_v25  ;;  %v10783_v25 = vld [vmem:[%s12322_s22 + $0x280] ss:$16 sps:$4 sm:$0xff]  }
 0x69e   : > { %5094 = vmatpush1.bf16.msra.mxu1 %v10738_v41  ;;  %v10786_v41 = vld [vmem:[%s12322_s22 + $0x288] ss:$16 sps:$4 sm:$0xff]  }
 0x69f   : > { %5095 = vmatprep.subr.bf16.mxu1 %v10746_v52  ;;  %v10792_v52 = vld [vmem:[%s12322_s22 + $0x2a8] ss:$16 sps:$4 sm:$0xff]  }
 0x6a2   : > { %5096 = vmatpush1.bf16.msra.mxu1 %v10744_v6  ;;  %v10789_v6 = vld [vmem:[%s12322_s22 + $0x2a0] ss:$16 sps:$4 sm:$0xff]  }
 0x6a3   : > { %5097 = vmatprep.subr.bf16.mxu1 %v10752_v59  ;;  %v10795_v59 = vld [vmem:[%s12322_s22 + $0x2c0] ss:$16 sps:$4 sm:$0xff]  }
 0x6a6   : > { %5098 = vmatpush1.bf16.msra.mxu1 %v10750_v49  ;;  %v10798_v49 = vld [vmem:[%s12322_s22 + $0x2c8] ss:$16 sps:$4 sm:$0xff]  }
 0x6a7   : > { %5099 = vmatprep.subr.bf16.mxu1 %v10758_v27  ;;  %v10804_v27 = vld [vmem:[%s12322_s22 + $0x2e8] ss:$16 sps:$4 sm:$0xff]  }
 0x6aa   : > { %5100 = vmatpush1.bf16.msra.mxu1 %v10756_v15  ;;  %v10801_v15 = vld [vmem:[%s12322_s22 + $0x2e0] ss:$16 sps:$4 sm:$0xff]  }
 0x6ab   : > { %5112 = vmatprep.subr.bf16.mxu1 %v10764_v13  ;;  %v10812_v13 = vld [vmem:[%s12322_s22 + $0x30c] ss:$16 sps:$4 sm:$0xff]  }
 0x728   : > { %v3827_v42 = vpop.f32.mrb[12].mxu1 }
 0x729   : > { %v9833_v9 = vpop.f32.mrb[13].mxu1 }
 0x72a   : > { %v3830_v20 = vpop.f32.mrb[14].mxu1  ;;  %v10810_v9 = vld [vmem:[%s12322_s22 + $0x308] ss:$16 sps:$4 sm:$0xff]  }
 0x72b   : > { %v4195_v36 = vpack.c.bf16 %v3830_v20, %v3827_v42  ;;  %v9834_v50 = vpop.f32.mrb[15].mxu1  ;;  %v10807_v42 = vld [vmem:[%s12322_s22 + $0x300] ss:$16 sps:$4 sm:$0xff]   ;;  %v10815_v20 = vld [vmem:[%s12322_s22 + $0x324] ss:$16 sps:$4 sm:$0xff]  }
 0x72c   : > { %v10813_v50 = vld [vmem:[%s12322_s22 + $0x320] ss:$16 sps:$4 sm:$0xff]  }
 0x730   : > { %v3944_v56 = vpop.f32.mrb[16].mxu1 }
 0x731   : > { %v9845_v32 = vpop.f32.mrb[17].mxu1 }
 0x732   : > { %v3947_v35 = vpop.f32.mrb[18].mxu1  ;;  %v10821_v32 = vld [vmem:[%s12322_s22 + $0x344] ss:$16 sps:$4 sm:$0xff]  }
 0x733   : > { %v4196_v8 = vpack.c.bf16 %v3947_v35, %v3944_v56  ;;  %v9846_v54 = vpop.f32.mrb[19].mxu1  ;;  %v10816_v56 = vld [vmem:[%s12322_s22 + $0x328] ss:$16 sps:$4 sm:$0xff]   ;;  %v10824_v35 = vld [vmem:[%s12322_s22 + $0x34c] ss:$16 sps:$4 sm:$0xff]  }
 0x734   : > { %v10822_v54 = vld [vmem:[%s12322_s22 + $0x348] ss:$16 sps:$4 sm:$0xff]  }
 0x735   : > { %5015 = vmatprep.mubr.bf16.mxu0 %v4196_v8  ;;  %5101 = vmatprep.mubr.bf16.mxu1 %v4196_v8  ;;  %v10819_v8 = vld [vmem:[%s12322_s22 + $0x340] ss:$16 sps:$4 sm:$0xff]  }
 0x736   : > { %5016 = vmatmul.mubr.bf16.vlgmr.msra.gmra.mrb[28].mxu0 %v4195_v36  ;;  %5102 = vmatmul.mubr.bf16.vlgmr.msra.gmra.mrb[28].mxu1 %v4195_v36  ;;  %v10818_v36 = vld [vmem:[%s12322_s22 + $0x32c] ss:$16 sps:$4 sm:$0xff]  }
 0x737   : > { %5027 = vmatpush1.bf16.msra.mxu0 %v10759_v55  ;;  %5113 = vmatpush1.bf16.msra.mxu1 %v10762_v61  ;;  %v10827_v55 = vld [vmem:[%s12322_s22 + $0x364] ss:$16 sps:$4 sm:$0xff]   ;;  %v10830_v61 = vld [vmem:[%s12322_s22 + $0x36c] ss:$16 sps:$4 sm:$0xff]  }
 0x738   : > { %v4061_v1 = vpop.f32.mrb[20].mxu1  ;;  %5028 = vmatprep.subr.bf16.mxu0 %v10767_v38  ;;  %5114 = vmatprep.subr.bf16.mxu1 %v10770_v48  ;;  %v10825_v38 = vld [vmem:[%s12322_s22 + $0x360] ss:$16 sps:$4 sm:$0xff]   ;;  %v10828_v48 = vld [vmem:[%s12322_s22 + $0x368] ss:$16 sps:$4 sm:$0xff]  }
 0x739   : > { %v9857_v18 = vpop.f32.mrb[21].mxu1 }
 0x73a   : > { %v4064_v45 = vpop.f32.mrb[22].mxu1  ;;  %v10842_v18 = vld [vmem:[%s12322_s22 + $0x3ac] ss:$16 sps:$4 sm:$0xff]  }
 0x73b   : > { %v13132_v23 = vpack.c.bf16 %v4064_v45, %v4061_v1  ;;  %5029 = vmatpush1.bf16.msra.mxu0 %v10765_v22  ;;  %5115 = vmatpush1.bf16.msra.mxu1 %v10768_v10  ;;  %v9858_v62 = vpop.f32.mrb[23].mxu1  ;;  %v10833_v22 = vld [vmem:[%s12322_s22 + $0x384] ss:$16 sps:$4 sm:$0xff]   ;;  %v10836_v10 = vld [vmem:[%s12322_s22 + $0x38c] ss:$16 sps:$4 sm:$0xff]  }
 0x73c   : > { %5030 = vmatprep.subr.bf16.mxu0 %v10773_v53  ;;  %5116 = vmatprep.subr.bf16.mxu1 %v10776_v63  ;;  %v10831_v1 = vld [vmem:[%s12322_s22 + $0x380] ss:$16 sps:$4 sm:$0xff]   ;;  %v10834_v53 = vld [vmem:[%s12322_s22 + $0x388] ss:$16 sps:$4 sm:$0xff]   ;;  %v10839_v63 = vld [vmem:[%s12322_s22 + $0x3a4] ss:$16 sps:$4 sm:$0xff]  }
 0x73d   : > { %v10837_v45 = vld [vmem:[%s12322_s22 + $0x3a0] ss:$16 sps:$4 sm:$0xff]   ;;  %v10840_v62 = vld [vmem:[%s12322_s22 + $0x3a8] ss:$16 sps:$4 sm:$0xff]  }
 0x73f   : > { %5031 = vmatpush1.bf16.msra.mxu0 %v10771_v24  ;;  %5117 = vmatpush1.bf16.msra.mxu1 %v10774_v26  ;;  %v10845_v24 = vld [vmem:[%s12322_s22 + $0x3c4] ss:$16 sps:$4 sm:$0xff]   ;;  %v10848_v26 = vld [vmem:[%s12322_s22 + $0x3cc] ss:$16 sps:$4 sm:$0xff]  }
 0x740   : > { %v4178_v29 = vpop.f32.mrb[24].mxu1  ;;  %5032 = vmatprep.subr.bf16.mxu0 %v10779_v17  ;;  %5118 = vmatprep.subr.bf16.mxu1 %v10782_v21  ;;  %v10843_v17 = vld [vmem:[%s12322_s22 + $0x3c0] ss:$16 sps:$4 sm:$0xff]   ;;  %v10846_v21 = vld [vmem:[%s12322_s22 + $0x3c8] ss:$16 sps:$4 sm:$0xff]  }
 0x741   : > { %v9869_v33 = vpop.f32.mrb[25].mxu1 }
 0x742   : > { %v4181_v34 = vpop.f32.mrb[26].mxu1  ;;  %v13192_v33 = vld [vmem:[%s12330_s26] sm:$0xff] }
 0x743   : > { %v4198_v47 = vpack.c.bf16 %v4181_v34, %v4178_v29  ;;  %5033 = vmatpush1.bf16.msra.mxu0 %v10777_v28  ;;  %5119 = vmatpush1.bf16.msra.mxu1 %v10780_v51  ;;  %v9870_v58 = vpop.f32.mrb[27].mxu1  ;;  %v10851_v28 = vld [vmem:[%s12322_s22 + $0x3e4] ss:$16 sps:$4 sm:$0xff]   ;;  %v10854_v51 = vld [vmem:[%s12322_s22 + $0x3ec] ss:$16 sps:$4 sm:$0xff]  }
 0x744   : > { %5034 = vmatprep.subr.bf16.mxu0 %v10785_v31  ;;  %5120 = vmatprep.subr.bf16.mxu1 %v10788_v30  ;;  %v10849_v29 = vld [vmem:[%s12322_s22 + $0x3e0] ss:$16 sps:$4 sm:$0xff]   ;;  %v10852_v31 = vld [vmem:[%s12322_s22 + $0x3e8] ss:$16 sps:$4 sm:$0xff]   ;;  %v4329_v30 = vsub.s32 7, %v12474_v14 }
 0x745   : > { %5058 = vmatprep.mubr.bf16.mxu0 %v4198_v47  ;;  %5144 = vmatprep.mubr.bf16.mxu1 %v4198_v47  ;;  %v13197_v58 = vld [vmem:[%s12330_s26 + $0x8] sm:$0xff] }
 0x746   : > { %v4330_v34 = vrot.slane %v13192_v33, %v4329_v30  ;;  %v4338_v47 = vrot.slane %v12939_v12, %v4329_v30 }
 0x747   : > { %5035 = vmatpush1.bf16.msra.mxu0 %v10783_v25  ;;  %5121 = vmatpush1.bf16.msra.mxu1 %v10786_v41  ;;  %v4334_v25 = vrot.slane %v13197_v58, %v4329_v30 }
 0x748   : > { %5036 = vmatprep.subr.bf16.mxu0 %v10791_v5  ;;  %5122 = vmatprep.subr.bf16.mxu1 %v10794_v57  ;;  %v13201_v57 = vld [vmem:[%s12330_s26 + $0x18] sm:$0xff] }
 0x74b   : > { %5037 = vmatpush1.bf16.msra.mxu0 %v10789_v6  ;;  %5123 = vmatpush1.bf16.msra.mxu1 %v10792_v52  ;;  %v4342_v6 = vrot.slane %v13201_v57, %v4329_v30  ;;  %v10888_v30 = vld [vmem:[%s12324_s7 + $0xa8] ss:$16 sps:$4 sm:$0xff]  }
 0x74c   : > { %5038 = vmatprep.subr.bf16.mxu0 %v10797_v43  ;;  %5124 = vmatprep.subr.bf16.mxu1 %v10800_v46 }
 0x74f   : > { %5039 = vmatpush1.bf16.msra.mxu0 %v10795_v59  ;;  %5125 = vmatpush1.bf16.msra.mxu1 %v10798_v49 }
 0x750   : > { %5040 = vmatprep.subr.bf16.mxu0 %v10803_v0  ;;  %5126 = vmatprep.subr.bf16.mxu1 %v10806_v3 }
 0x753   : > { %5041 = vmatpush1.bf16.msra.mxu0 %v10801_v15  ;;  %5127 = vmatpush1.bf16.msra.mxu1 %v10804_v27 }
 0x754   : > { %5042 = vmatprep.subr.bf16.mxu0 %v10809_v11  ;;  %5128 = vmatprep.subr.bf16.mxu1 %v10812_v13 }
 0x757   : > { %5043 = vmatpush1.bf16.msra.mxu0 %v10807_v42  ;;  %5129 = vmatpush1.bf16.msra.mxu1 %v10810_v9 }
 0x758   : > { %5044 = vmatprep.subr.bf16.mxu0 %v10815_v20  ;;  %5130 = vmatprep.subr.bf16.mxu1 %v10818_v36 }
 0x75b   : > { %5045 = vmatpush1.bf16.msra.mxu0 %v10813_v50  ;;  %5131 = vmatpush1.bf16.msra.mxu1 %v10816_v56 }
 0x75c   : > { %5046 = vmatprep.subr.bf16.mxu0 %v10821_v32  ;;  %5132 = vmatprep.subr.bf16.mxu1 %v10824_v35 }
 0x75f   : > { %5047 = vmatpush1.bf16.msra.mxu0 %v10819_v8  ;;  %5133 = vmatpush1.bf16.msra.mxu1 %v10822_v54  ;;  %v10857_v54 = vld [vmem:[%s12324_s7 + $0x4] ss:$16 sps:$4 sm:$0xff]  }
 0x760   : > { %5048 = vmatprep.subr.bf16.mxu0 %v10827_v55  ;;  %5134 = vmatprep.subr.bf16.mxu1 %v10830_v61  ;;  %v10858_v55 = vld [vmem:[%s12324_s7 + $0x8] ss:$16 sps:$4 sm:$0xff]   ;;  %v10860_v61 = vld [vmem:[%s12324_s7 + $0xc] ss:$16 sps:$4 sm:$0xff]  }
 0x763   : > { %5049 = vmatpush1.bf16.msra.mxu0 %v10825_v38  ;;  %5135 = vmatpush1.bf16.msra.mxu1 %v10828_v48  ;;  %v10863_v38 = vld [vmem:[%s12324_s7 + $0x24] ss:$16 sps:$4 sm:$0xff]   ;;  %v10861_v48 = vld [vmem:[%s12324_s7 + $0x20] ss:$16 sps:$4 sm:$0xff]  }
 0x764   : > { %5050 = vmatprep.subr.bf16.mxu0 %v10833_v22  ;;  %5136 = vmatprep.subr.bf16.mxu1 %v10836_v10  ;;  %v10864_v22 = vld [vmem:[%s12324_s7 + $0x28] ss:$16 sps:$4 sm:$0xff]   ;;  %v10869_v10 = vld [vmem:[%s12324_s7 + $0x44] ss:$16 sps:$4 sm:$0xff]  }
 0x767   : > { %5051 = vmatpush1.bf16.msra.mxu0 %v10831_v1  ;;  %5137 = vmatpush1.bf16.msra.mxu1 %v10834_v53  ;;  %v10872_v1 = vld [vmem:[%s12324_s7 + $0x4c] ss:$16 sps:$4 sm:$0xff]   ;;  %v10867_v53 = vld [vmem:[%s12324_s7 + $0x40] ss:$16 sps:$4 sm:$0xff]  }
 0x768   : > { %5052 = vmatprep.subr.bf16.mxu0 %v10839_v63  ;;  %5138 = vmatprep.subr.bf16.mxu1 %v10842_v18  ;;  %v10870_v63 = vld [vmem:[%s12324_s7 + $0x48] ss:$16 sps:$4 sm:$0xff]   ;;  %v10875_v18 = vld [vmem:[%s12324_s7 + $0x64] ss:$16 sps:$4 sm:$0xff]  }
 0x76b   : > { %5053 = vmatpush1.bf16.msra.mxu0 %v10837_v45  ;;  %5139 = vmatpush1.bf16.msra.mxu1 %v10840_v62  ;;  %v10878_v45 = vld [vmem:[%s12324_s7 + $0x6c] ss:$16 sps:$4 sm:$0xff]   ;;  %v10873_v62 = vld [vmem:[%s12324_s7 + $0x60] ss:$16 sps:$4 sm:$0xff]  }
 0x76c   : > { %5054 = vmatprep.subr.bf16.mxu0 %v10845_v24  ;;  %5140 = vmatprep.subr.bf16.mxu1 %v10848_v26  ;;  %v10876_v24 = vld [vmem:[%s12324_s7 + $0x68] ss:$16 sps:$4 sm:$0xff]   ;;  %v10881_v26 = vld [vmem:[%s12324_s7 + $0x84] ss:$16 sps:$4 sm:$0xff]  }
 0x76f   : > { %5055 = vmatpush1.bf16.msra.mxu0 %v10843_v17  ;;  %5141 = vmatpush1.bf16.msra.mxu1 %v10846_v21  ;;  %v10884_v17 = vld [vmem:[%s12324_s7 + $0x8c] ss:$16 sps:$4 sm:$0xff]   ;;  %v10879_v21 = vld [vmem:[%s12324_s7 + $0x80] ss:$16 sps:$4 sm:$0xff]  }
 0x770   : > { %5056 = vmatprep.subr.bf16.mxu0 %v10851_v28  ;;  %5142 = vmatprep.subr.bf16.mxu1 %v10854_v51  ;;  %v10882_v28 = vld [vmem:[%s12324_s7 + $0x88] ss:$16 sps:$4 sm:$0xff]   ;;  %v10887_v51 = vld [vmem:[%s12324_s7 + $0xa4] ss:$16 sps:$4 sm:$0xff]  }
 0x773   : > { %5057 = vmatpush1.bf16.msra.mxu0 %v10849_v29  ;;  %5143 = vmatpush1.bf16.msra.mxu1 %v10852_v31  ;;  %v10890_v29 = vld [vmem:[%s12324_s7 + $0xac] ss:$16 sps:$4 sm:$0xff]   ;;  %v10885_v31 = vld [vmem:[%s12324_s7 + $0xa0] ss:$16 sps:$4 sm:$0xff]  }
 0x774   : > { %6065 = vmatprep.subr.bf16.mxu0 %v10857_v54  ;;  %6151 = vmatprep.subr.bf16.mxu1 %v10860_v61  ;;  %v10896_v54 = vld [vmem:[%s12324_s7 + $0xcc] ss:$16 sps:$4 sm:$0xff]   ;;  %v10894_v61 = vld [vmem:[%s12324_s7 + $0xc8] ss:$16 sps:$4 sm:$0xff]  }
 0x776   : > { %5059 = vmatmul.mubr.bf16.vlgmr.msra.gmra.mrb[28].mxu0 %v13132_v23  ;;  %5145 = vmatmul.mubr.bf16.vlgmr.msra.gmra.mrb[28].mxu1 %v13132_v23 }
 0x777   : > { %6152 = vmatpush1.bf16.msra.mxu1 %v10858_v55  ;;  %v10891_v55 = vld [vmem:[%s12324_s7 + $0xc0] ss:$16 sps:$4 sm:$0xff]  }
 0x849   : > { %v5060_v41 = vpop.f32.mrb[28].mxu0  ;;  %v5146_v5 = vpop.f32.mrb[28].mxu1 }
 0x84a   : > { %v9887_v52 = vadd.f32 %v5060_v41, %v4330_v34  ;;  %v5062_v23 = vpop.f32.mrb[29].mxu0  ;;  %v5148_v43 = vpop.f32.mrb[29].mxu1  ;;  %v9891_v46 = vadd.f32 %v5146_v5, %v4338_v47 }
 0x84b   : > { %v9888_v59 = vadd.f32 %v5062_v23, %v4334_v25  ;;  %v5064_v49 = vpop.f32.mrb[30].mxu0  ;;  %v5150_v0 = vpop.f32.mrb[30].mxu1  ;;  %v9892_v13 = vadd.f32 %v5148_v43, %v4342_v6 }
 0x84c   : > { %v13205_v3 = vadd.f32 %v9887_v52, %v12513_v39  ;;  %v9889_v12 = vadd.f32 %v5064_v49, %v4330_v34  ;;  %v5066_v15 = vpop.f32.mrb[31].mxu0  ;;  %v5152_v27 = vpop.f32.mrb[31].mxu1  ;;  %v9893_v42 = vadd.f32 %v5150_v0, %v4338_v47  ;;  %v13214_v36 = vadd.f32 %v9891_v46, %v12614_v7 }
 0x84d   : > { %v13208_v11 = vadd.f32 %v9888_v59, %v12507_v37  ;;  %v9890_v9 = vadd.f32 %v5066_v15, %v4334_v25  ;;  %v9894_v50 = vadd.f32 %v5152_v27, %v4342_v6  ;;  %v13222_v56 = vadd.f32 %v9892_v13, %v12528_v44 }
 0x84e   : > { %v13211_v20 = vadd.f32 %v9889_v12, %v12515_v2  ;;  %v13225_v2 = vadd.f32 %v9893_v42, %v12610_v4  ;;  %v10855_v4 = vld [vmem:[%s12324_s7] ss:$16 sps:$4 sm:$0xff]  }
 0x84f   : > { %v13217_v39 = vadd.f32 %v9890_v9, %v12509_v60  ;;  %v5163_v37 = vadd.f32 %v13208_v11, %v13205_v3  ;;  %v13231_v60 = vadd.f32 %v9894_v50, %v12517_v40  ;;  %v10866_v40 = vld [vmem:[%s12324_s7 + $0x2c] ss:$16 sps:$4 sm:$0xff]   ;;  %6066 = vmatpush1.bf16.msra.mxu0 %v10855_v4  ;;  %v10893_v4 = vld [vmem:[%s12324_s7 + $0xc4] ss:$16 sps:$4 sm:$0xff]  }
 0x850   : > { %6067 = vmatprep.subr.bf16.mxu0 %v10863_v38  ;;  %6153 = vmatprep.subr.bf16.mxu1 %v10866_v40  ;;  %v10899_v38 = vld [vmem:[%s12324_s7 + $0xe4] ss:$16 sps:$4 sm:$0xff]   ;;  %v10902_v40 = vld [vmem:[%s12324_s7 + $0xec] ss:$16 sps:$4 sm:$0xff]  }
 0x851   : > { %v5164_v7 = vadd.f32 %v5163_v37, %v13214_v36  ;;  %v5168_v32 = vadd.f32 %v13217_v39, %v13211_v20  ;;  %6154 = vmatpush1.bf16.msra.mxu1 %v10864_v22  ;;  %v10900_v22 = vld [vmem:[%s12324_s7 + $0xe8] ss:$16 sps:$4 sm:$0xff]  }
 0x852   : > { %6155 = vmatprep.subr.bf16.mxu1 %v10872_v1  ;;  %v10908_v1 = vld [vmem:[%s12324_s7 + $0x10c] ss:$16 sps:$4 sm:$0xff]  }
 0x853   : > { %v5165_v35 = vadd.f32 %v5164_v7, %v13222_v56  ;;  %v5169_v8 = vadd.f32 %v5168_v32, %v13225_v2  ;;  %6068 = vmatpush1.bf16.msra.mxu0 %v10861_v48  ;;  %v10897_v48 = vld [vmem:[%s12324_s7 + $0xe0] ss:$16 sps:$4 sm:$0xff]  }
 0x854   : > { %6069 = vmatprep.subr.bf16.mxu0 %v10869_v10  ;;  %v10905_v10 = vld [vmem:[%s12324_s7 + $0x104] ss:$16 sps:$4 sm:$0xff]  }
 0x855   : > { %5166 = vadd.xlane.f32.xlu0 %v5165_v35  ;;  %v5170_v44 = vadd.f32 %v5169_v8, %v13231_v60  ;;  %6156 = vmatpush1.bf16.msra.mxu1 %v10870_v63  ;;  %v10906_v63 = vld [vmem:[%s12324_s7 + $0x108] ss:$16 sps:$4 sm:$0xff]  }
 0x856   : > { %6157 = vmatprep.subr.bf16.mxu1 %v10878_v45  ;;  %v10914_v45 = vld [vmem:[%s12324_s7 + $0x12c] ss:$16 sps:$4 sm:$0xff]  }
 0x857   : > { %5171 = vadd.xlane.f32.xlu1 %v5170_v44  ;;  %6070 = vmatpush1.bf16.msra.mxu0 %v10867_v53  ;;  %v10903_v53 = vld [vmem:[%s12324_s7 + $0x100] ss:$16 sps:$4 sm:$0xff]  }
 0x858   : > { %6071 = vmatprep.subr.bf16.mxu0 %v10875_v18  ;;  %v10911_v18 = vld [vmem:[%s12324_s7 + $0x124] ss:$16 sps:$4 sm:$0xff]  }
 0x859   : > { %6158 = vmatpush1.bf16.msra.mxu1 %v10876_v24  ;;  %v10912_v24 = vld [vmem:[%s12324_s7 + $0x128] ss:$16 sps:$4 sm:$0xff]  }
 0x85a   : > { %6159 = vmatprep.subr.bf16.mxu1 %v10884_v17  ;;  %v10920_v17 = vld [vmem:[%s12324_s7 + $0x14c] ss:$16 sps:$4 sm:$0xff]  }
 0x85b   : > { %6072 = vmatpush1.bf16.msra.mxu0 %v10873_v62  ;;  %v10909_v62 = vld [vmem:[%s12324_s7 + $0x120] ss:$16 sps:$4 sm:$0xff]  }
 0x85c   : > { %6073 = vmatprep.subr.bf16.mxu0 %v10881_v26  ;;  %v10917_v26 = vld [vmem:[%s12324_s7 + $0x144] ss:$16 sps:$4 sm:$0xff]  }
 0x85d   : > { %6160 = vmatpush1.bf16.msra.mxu1 %v10882_v28  ;;  %v10918_v28 = vld [vmem:[%s12324_s7 + $0x148] ss:$16 sps:$4 sm:$0xff]  }
 0x85e   : > { %6161 = vmatprep.subr.bf16.mxu1 %v10890_v29  ;;  %v10926_v29 = vld [vmem:[%s12324_s7 + $0x16c] ss:$16 sps:$4 sm:$0xff]  }
 0x85f   : > { %6074 = vmatpush1.bf16.msra.mxu0 %v10879_v21  ;;  %v10915_v21 = vld [vmem:[%s12324_s7 + $0x140] ss:$16 sps:$4 sm:$0xff]  }
 0x860   : > { %6075 = vmatprep.subr.bf16.mxu0 %v10887_v51  ;;  %v10923_v51 = vld [vmem:[%s12324_s7 + $0x164] ss:$16 sps:$4 sm:$0xff]  }
 0x861   : > { %6162 = vmatpush1.bf16.msra.mxu1 %v10888_v30  ;;  %v10924_v30 = vld [vmem:[%s12324_s7 + $0x168] ss:$16 sps:$4 sm:$0xff]  }
 0x862   : > { %6163 = vmatprep.subr.bf16.mxu1 %v10896_v54 }
 0x863   : > { %6076 = vmatpush1.bf16.msra.mxu0 %v10885_v31  ;;  %v10921_v31 = vld [vmem:[%s12324_s7 + $0x160] ss:$16 sps:$4 sm:$0xff]  }
 0x864   : > { %6077 = vmatprep.subr.bf16.mxu0 %v10893_v4 }
 0x865   : > { %6164 = vmatpush1.bf16.msra.mxu1 %v10894_v61 }
 0x866   : > { %6165 = vmatprep.subr.bf16.mxu1 %v10902_v40 }
 0x867   : > { %6078 = vmatpush1.bf16.msra.mxu0 %v10891_v55 }
 0x868   : > { %6079 = vmatprep.subr.bf16.mxu0 %v10899_v38 }
 0x869   : > { %6166 = vmatpush1.bf16.msra.mxu1 %v10900_v22 }
 0x86a   : > { %6167 = vmatprep.subr.bf16.mxu1 %v10908_v1 }
 0x86b   : > { %6080 = vmatpush1.bf16.msra.mxu0 %v10897_v48 }
 0x86c   : > { %6081 = vmatprep.subr.bf16.mxu0 %v10905_v10 }
 0x86d   : > { %6168 = vmatpush1.bf16.msra.mxu1 %v10906_v63 }
 0x86e   : > { %6169 = vmatprep.subr.bf16.mxu1 %v10914_v45 }
 0x86f   : > { %6082 = vmatpush1.bf16.msra.mxu0 %v10903_v53 }
 0x870   : > { %6083 = vmatprep.subr.bf16.mxu0 %v10911_v18 }
 0x871   : > { %6170 = vmatpush1.bf16.msra.mxu1 %v10912_v24 }
 0x872   : > { %6171 = vmatprep.subr.bf16.mxu1 %v10920_v17  ;;  %v13346_v17 = vsub.s32 3, %v12474_v14 }
 0x873   : > { %6084 = vmatpush1.bf16.msra.mxu0 %v10909_v62 }
 0x874   : > { %6085 = vmatprep.subr.bf16.mxu0 %v10917_v26  ;;  %v13343_v26 = vsub.s32 2, %v12474_v14  ;;  %v5260_v14 = vrot.slane %v13197_v58, %v13346_v17 }
 0x875   : > { %6172 = vmatpush1.bf16.msra.mxu1 %v10918_v28 }
 0x876   : > { %6173 = vmatprep.subr.bf16.mxu1 %v10926_v29  ;;  %v5232_v28 = vrot.slane %v13192_v33, %v13343_v26 }
 0x877   : > { %6086 = vmatpush1.bf16.msra.mxu0 %v10915_v21  ;;  %v5236_v21 = vrot.slane %v13197_v58, %v13343_v26 }
 0x878   : > { %6087 = vmatprep.subr.bf16.mxu0 %v10923_v51  ;;  %v11499_v51 = vld [vmem:[%s12330_s26 + $0x10] sm:$0xff] }
 0x879   : > { %6174 = vmatpush1.bf16.msra.mxu1 %v10924_v30  ;;  %v5240_v29 = vrot.slane %v11499_v51, %v13343_v26 }
 0x87b   : > { %6088 = vmatpush1.bf16.msra.mxu0 %v10921_v31 }
 0x8e2   : > { %v5167_v34 = vpop.xlane.xlu0 %5166 }
 0x8e3   : > { %v5173_v47 = vmul.f32 0.001953125, %v5167_v34  ;;  %v10927_v34 = vld [vmem:[%s12324_s7 + $0x180] ss:$16 sps:$4 sm:$0xff]  }
 0x8e4   : > { %v5172_v25 = vpop.xlane.xlu1 %5171 }
 0x8e5   : > { %v13261_v41 = vsub.f32 %v13205_v3, %v5173_v47  ;;  %v13264_v5 = vsub.f32 %v13208_v11, %v5173_v47  ;;  %v5174_v6 = vmul.f32 0.001953125, %v5172_v25  ;;  %v13267_v52 = vsub.f32 %v13214_v36, %v5173_v47  ;;  %v10930_v25 = vld [vmem:[%s12324_s7 + $0x188] ss:$16 sps:$4 sm:$0xff]  }
 0x8e6   : > { %v13270_v23 = vsub.f32 %v13222_v56, %v5173_v47  ;;  %v10929_v47 = vld [vmem:[%s12324_s7 + $0x184] ss:$16 sps:$4 sm:$0xff]  }
 0x8e7   : > { %v13273_v43 = vsub.f32 %v13211_v20, %v5174_v6  ;;  %v13276_v46 = vsub.f32 %v13217_v39, %v5174_v6  ;;  %v5183_v59 = vmul.f32 %v13261_v41, %v13261_v41  ;;  %v5184_v49 = vmul.f32 %v13264_v5, %v13264_v5  ;;  %6089 = vmatprep.subr.bf16.mxu0 %v10929_v47 }
 0x8e8   : > { %v5185_v0 = vmul.f32 %v13267_v52, %v13267_v52  ;;  %v13285_v12 = vsub.f32 %v13225_v2, %v5174_v6  ;;  %v13288_v27 = vsub.f32 %v13231_v60, %v5174_v6  ;;  %v5186_v9 = vmul.f32 %v13270_v23, %v13270_v23  ;;  %v10932_v6 = vld [vmem:[%s12324_s7 + $0x18c] ss:$16 sps:$4 sm:$0xff]   ;;  %6090 = vmatpush1.bf16.msra.mxu0 %v10927_v34 }
 0x8e9   : > { %v5191_v15 = vadd.f32 %v5184_v49, %v5183_v59  ;;  %v5187_v13 = vmul.f32 %v13273_v43, %v13273_v43  ;;  %v5188_v42 = vmul.f32 %v13276_v46, %v13276_v46  ;;  %v10935_v59 = vld [vmem:[%s12324_s7 + $0x1a4] ss:$16 sps:$4 sm:$0xff]   ;;  %v10938_v49 = vld [vmem:[%s12324_s7 + $0x1ac] ss:$16 sps:$4 sm:$0xff]   ;;  %6175 = vmatprep.subr.bf16.mxu1 %v10932_v6  ;;  %v5244_v6 = vrot.slane %v13201_v57, %v13343_v26 }
 0x8ea   : > { %v5189_v37 = vmul.f32 %v13285_v12, %v13285_v12  ;;  %v5190_v35 = vmul.f32 %v13288_v27, %v13288_v27  ;;  %6176 = vmatpush1.bf16.msra.mxu1 %v10930_v25  ;;  %6091 = vmatprep.subr.bf16.mxu0 %v10935_v59  ;;  %v5256_v25 = vrot.slane %v13192_v33, %v13346_v17 }
 0x8eb   : > { %v5192_v50 = vadd.f32 %v5191_v15, %v5185_v0  ;;  %v5196_v7 = vadd.f32 %v5188_v42, %v5187_v13  ;;  %v10933_v0 = vld [vmem:[%s12324_s7 + $0x1a0] ss:$16 sps:$4 sm:$0xff]   ;;  %v10936_v15 = vld [vmem:[%s12324_s7 + $0x1a8] ss:$16 sps:$4 sm:$0xff]   ;;  %6177 = vmatprep.subr.bf16.mxu1 %v10938_v49  ;;  %v10941_v13 = vld [vmem:[%s12324_s7 + $0x1c4] ss:$16 sps:$4 sm:$0xff]   ;;  %v5264_v59 = vrot.slane %v11499_v51, %v13346_v17 }
 0x8ec   : > { %v10944_v42 = vld [vmem:[%s12324_s7 + $0x1cc] ss:$16 sps:$4 sm:$0xff]   ;;  %6092 = vmatpush1.bf16.msra.mxu0 %v10933_v0 }
 0x8ed   : > { %v5193_v32 = vadd.f32 %v5192_v50, %v5186_v9  ;;  %v5197_v8 = vadd.f32 %v5196_v7, %v5189_v37  ;;  %v10939_v9 = vld [vmem:[%s12324_s7 + $0x1c0] ss:$16 sps:$4 sm:$0xff]   ;;  %v10942_v50 = vld [vmem:[%s12324_s7 + $0x1c8] ss:$16 sps:$4 sm:$0xff]   ;;  %6093 = vmatprep.subr.bf16.mxu0 %v10941_v13  ;;  %v10947_v37 = vld [vmem:[%s12324_s7 + $0x1e4] ss:$16 sps:$4 sm:$0xff]  }
 0x8ee   : > { %6178 = vmatpush1.bf16.msra.mxu1 %v10936_v15  ;;  %v10950_v7 = vld [vmem:[%s12324_s7 + $0x1ec] ss:$16 sps:$4 sm:$0xff]  }
 0x8ef   : > { %5194 = vadd.xlane.f32.xlu0 %v5193_v32  ;;  %v5198_v44 = vadd.f32 %v5197_v8, %v5190_v35  ;;  %6179 = vmatprep.subr.bf16.mxu1 %v10944_v42  ;;  %v10945_v32 = vld [vmem:[%s12324_s7 + $0x1e0] ss:$16 sps:$4 sm:$0xff]   ;;  %v10948_v35 = vld [vmem:[%s12324_s7 + $0x1e8] ss:$16 sps:$4 sm:$0xff]   ;;  %v10953_v8 = vld [vmem:[%s12324_s7 + $0x204] ss:$16 sps:$4 sm:$0xff]  }
 0x8f0   : > { %6094 = vmatpush1.bf16.msra.mxu0 %v10939_v9  ;;  %v10980_v51 = vld [vmem:[%s12324_s7 + $0x28c] ss:$16 sps:$4 sm:$0xff]  }
 0x8f1   : > { %5199 = vadd.xlane.f32.xlu1 %v5198_v44  ;;  %6095 = vmatprep.subr.bf16.mxu0 %v10947_v37  ;;  %v10956_v44 = vld [vmem:[%s12324_s7 + $0x20c] ss:$16 sps:$4 sm:$0xff]  }
 0x8f2   : > { %6180 = vmatpush1.bf16.msra.mxu1 %v10942_v50 }
 0x8f3   : > { %6181 = vmatprep.subr.bf16.mxu1 %v10950_v7 }
 0x8f4   : > { %6096 = vmatpush1.bf16.msra.mxu0 %v10945_v32 }
 0x8f5   : > { %6108 = vmatprep.subr.bf16.mxu0 %v10953_v8 }
 0x8f6   : > { %6182 = vmatpush1.bf16.msra.mxu1 %v10948_v35 }
 0x8f7   : > { %6194 = vmatprep.subr.bf16.mxu1 %v10956_v44 }
 0x97c   : > { %v5195_v4 = vpop.xlane.xlu0 %5194 }
 0x97d   : > { %v5201_v54 = vmul.f32 0.0019569471, %v5195_v4  ;;  %v10951_v4 = vld [vmem:[%s12324_s7 + $0x200] ss:$16 sps:$4 sm:$0xff]  }
 0x97e   : > { %v5200_v55 = vpop.xlane.xlu1 %5199 }
 0x97f   : > { %11471 = vrsqrt.f32 %v5201_v54  ;;  %v5202_v61 = vmul.f32 0.0019569471, %v5200_v55  ;;  %vm5205_vm7 = vcmp.eq.f32.partialorder %v5201_v54, inf  ;;  %v5208_v48 = vand.u32 2147483648, %v5201_v54 }
 0x980   : > { %vm5207_vm8 = vcmp.eq.f32.partialorder %v5201_v54, 0.0 }
 0x981   : > { %11473 = vrsqrt.f32 %v5202_v61  ;;  %vm5212_vm9 = vcmp.eq.f32.partialorder %v5202_v61, inf  ;;  %v5215_v18 = vand.u32 2147483648, %v5202_v61  ;;  %vm5214_vm10 = vcmp.eq.f32.partialorder %v5202_v61, 0.0 }
 0x989   : > { %v11472_v38 = vpop.eup %11471 }
 0x98a   : > { %v5204_v40 = vmul.f32 %v11472_v38, %v5201_v54 }
 0x98b   : > { %v11474_v22 = vpop.eup %11473 }
 0x98c   : > { %v5206_v10 = vsel %vm5205_vm7, %v5201_v54, %v5204_v40  ;;  %v5211_v53 = vmul.f32 %v11474_v22, %v5202_v61  ;;  %v10954_v54 = vld [vmem:[%s12324_s7 + $0x208] ss:$16 sps:$4 sm:$0xff]   ;;  %v10959_v40 = vld [vmem:[%s12324_s7 + $0x224] ss:$16 sps:$4 sm:$0xff]   ;;  %v10957_v22 = vld [vmem:[%s12324_s7 + $0x220] ss:$16 sps:$4 sm:$0xff]  }
 0x98d   : > { %v5209_v1 = vsel %vm5207_vm8, %v5208_v48, %v5206_v10  ;;  %v10960_v10 = vld [vmem:[%s12324_s7 + $0x228] ss:$16 sps:$4 sm:$0xff]  }
 0x98e   : > { %v5217_v63 = vadd.f32 1e-06, %v5209_v1  ;;  %v5213_v45 = vsel %vm5212_vm9, %v5202_v61, %v5211_v53  ;;  %v10965_v1 = vld [vmem:[%s12324_s7 + $0x244] ss:$16 sps:$4 sm:$0xff]   ;;  %v10968_v53 = vld [vmem:[%s12324_s7 + $0x24c] ss:$16 sps:$4 sm:$0xff]  }
 0x98f   : > { %v5216_v62 = vsel %vm5214_vm10, %v5215_v18, %v5213_v45  ;;  %v10966_v18 = vld [vmem:[%s12324_s7 + $0x248] ss:$16 sps:$4 sm:$0xff]   ;;  %v10971_v45 = vld [vmem:[%s12324_s7 + $0x264] ss:$16 sps:$4 sm:$0xff]  }
 0x990   : > { %11475 = vrcp.f32 %v5217_v63  ;;  %v5218_v24 = vadd.f32 1e-06, %v5216_v62  ;;  %v10963_v63 = vld [vmem:[%s12324_s7 + $0x240] ss:$16 sps:$4 sm:$0xff]   ;;  %v10974_v62 = vld [vmem:[%s12324_s7 + $0x26c] ss:$16 sps:$4 sm:$0xff]  }
 0x992   : > { %11477 = vrcp.f32 %v5218_v24  ;;  %v10969_v24 = vld [vmem:[%s12324_s7 + $0x260] ss:$16 sps:$4 sm:$0xff]  }
 0x99a   : > { %v11476_v31 = vpop.eup %11475 }
 0x99b   : > { %v5221_v30 = vmul.f32 %v11476_v31, %v13264_v5  ;;  %v5220_v34 = vmul.f32 %v11476_v31, %v13261_v41  ;;  %v5222_v47 = vmul.f32 %v11476_v31, %v13267_v52  ;;  %v5223_v5 = vmul.f32 %v11476_v31, %v13270_v23  ;;  %v10978_v31 = vld [vmem:[%s12324_s7 + $0x288] ss:$16 sps:$4 sm:$0xff]  }
 0x99c   : > { %v11478_v49 = vpop.eup %11477  ;;  %v5268_v23 = vrot.slane %v13201_v57, %v13346_v17  ;;  %v10962_v57 = vld [vmem:[%s12324_s7 + $0x22c] ss:$16 sps:$4 sm:$0xff]  }
 0x99d   : > { %v5246_v0 = vmul.f32 %v5236_v21, %v5221_v30  ;;  %v5245_v15 = vmul.f32 %v5232_v28, %v5220_v34  ;;  %v5247_v13 = vmul.f32 %v5240_v29, %v5222_v47  ;;  %v5226_v41 = vmul.f32 %v11478_v49, %v13276_v46  ;;  %v10983_v30 = vld [vmem:[%s12324_s7 + $0x2a4] ss:$16 sps:$4 sm:$0xff]   ;;  %v10986_v34 = vld [vmem:[%s12324_s7 + $0x2ac] ss:$16 sps:$4 sm:$0xff]   ;;  %v10981_v47 = vld [vmem:[%s12324_s7 + $0x2a0] ss:$16 sps:$4 sm:$0xff]  }
 0x99e   : > { %v5225_v52 = vmul.f32 %v11478_v49, %v13273_v43  ;;  %v5228_v58 = vmul.f32 %v11478_v49, %v13288_v27  ;;  %v5227_v33 = vmul.f32 %v11478_v49, %v13285_v12  ;;  %v5248_v35 = vmul.f32 %v5244_v6, %v5223_v5  ;;  %v10990_v49 = vld [vmem:[%s12324_s7 + $0x2c8] ss:$16 sps:$4 sm:$0xff]   ;;  %v10993_v5 = vld [vmem:[%s12324_s7 + $0x2e0] ss:$16 sps:$4 sm:$0xff]  }
 0x99f   : > { %v5250_v42 = vmul.f32 %v5236_v21, %v5226_v41  ;;  %v5270_v7 = vadd.f32 %v5260_v14, %v5246_v0  ;;  %v5269_v32 = vadd.f32 %v5256_v25, %v5245_v15  ;;  %v5271_v8 = vadd.f32 %v5264_v59, %v5247_v13  ;;  %v10972_v21 = vld [vmem:[%s12324_s7 + $0x268] ss:$16 sps:$4 sm:$0xff]   ;;  %v10995_v0 = vld [vmem:[%s12324_s7 + $0x2e4] ss:$16 sps:$4 sm:$0xff]   ;;  %v10998_v15 = vld [vmem:[%s12324_s7 + $0x2ec] ss:$16 sps:$4 sm:$0xff]  }
 0x9a0   : > { %v5249_v9 = vmul.f32 %v5232_v28, %v5225_v52  ;;  %v5252_v50 = vmul.f32 %v5244_v6, %v5228_v58  ;;  %v5251_v37 = vmul.f32 %v5240_v29, %v5227_v33  ;;  %v5272_v38 = vadd.f32 %v5268_v23, %v5248_v35  ;;  %v10977_v28 = vld [vmem:[%s12324_s7 + $0x284] ss:$16 sps:$4 sm:$0xff]   ;;  %v10975_v29 = vld [vmem:[%s12324_s7 + $0x280] ss:$16 sps:$4 sm:$0xff]   ;;  %v10992_v6 = vld [vmem:[%s12324_s7 + $0x2cc] ss:$16 sps:$4 sm:$0xff]  }
 0x9a1   : > { %v5274_v46 = vadd.f32 %v5260_v14, %v5250_v42  ;;  %v10984_v14 = vld [vmem:[%s12324_s7 + $0x2a8] ss:$16 sps:$4 sm:$0xff]   ;;  %v11001_v41 = vld [vmem:[%s12324_s7 + $0x304] ss:$16 sps:$4 sm:$0xff]   ;;  %v11004_v52 = vld [vmem:[%s12324_s7 + $0x30c] ss:$16 sps:$4 sm:$0xff]  }
 0x9a2   : > { %v5273_v43 = vadd.f32 %v5256_v25, %v5249_v9  ;;  %v5275_v27 = vadd.f32 %v5264_v59, %v5251_v37  ;;  %v5276_v44 = vadd.f32 %v5268_v23, %v5252_v50  ;;  %v10989_v25 = vld [vmem:[%s12324_s7 + $0x2c4] ss:$16 sps:$4 sm:$0xff]   ;;  %v10987_v59 = vld [vmem:[%s12324_s7 + $0x2c0] ss:$16 sps:$4 sm:$0xff]   ;;  %v10996_v13 = vld [vmem:[%s12324_s7 + $0x2e8] ss:$16 sps:$4 sm:$0xff]  }
 0x9a3   : > { %v5278_v12 = vpack.c.bf16 %v5274_v46, %v5270_v7  ;;  %v10999_v58 = vld [vmem:[%s12324_s7 + $0x300] ss:$16 sps:$4 sm:$0xff]   ;;  %v11002_v33 = vld [vmem:[%s12324_s7 + $0x308] ss:$16 sps:$4 sm:$0xff]   ;;  %v11007_v42 = vld [vmem:[%s12324_s7 + $0x324] ss:$16 sps:$4 sm:$0xff]  }
 0x9a4   : > { %v5277_v55 = vpack.c.bf16 %v5273_v43, %v5269_v32  ;;  %v13373_v61 = vpack.c.bf16 %v5275_v27, %v5271_v8  ;;  %v5280_v48 = vpack.c.bf16 %v5276_v44, %v5272_v38  ;;  %v11010_v9 = vld [vmem:[%s12324_s7 + $0x32c] ss:$16 sps:$4 sm:$0xff]   ;;  %v11005_v50 = vld [vmem:[%s12324_s7 + $0x320] ss:$16 sps:$4 sm:$0xff]   ;;  %v11008_v37 = vld [vmem:[%s12324_s7 + $0x328] ss:$16 sps:$4 sm:$0xff]  }
 0x9a5   : > { %6097 = vmatprep.mubr.bf16.mxu0 %v5278_v12  ;;  %6183 = vmatprep.mubr.bf16.mxu1 %v5278_v12  ;;  %v11013_v7 = vld [vmem:[%s12324_s7 + $0x344] ss:$16 sps:$4 sm:$0xff]   ;;  %v11016_v32 = vld [vmem:[%s12324_s7 + $0x34c] ss:$16 sps:$4 sm:$0xff]   ;;  %v11011_v35 = vld [vmem:[%s12324_s7 + $0x340] ss:$16 sps:$4 sm:$0xff]  }
 0x9a6   : > { %6098 = vmatmul.mubr.bf16.vlgmr.msra.gmra.mrb[32].mxu0 %v5277_v55  ;;  %6184 = vmatmul.mubr.bf16.vlgmr.msra.gmra.mrb[32].mxu1 %v5277_v55  ;;  %v11014_v23 = vld [vmem:[%s12324_s7 + $0x348] ss:$16 sps:$4 sm:$0xff]   ;;  %v11019_v46 = vld [vmem:[%s12324_s7 + $0x364] ss:$16 sps:$4 sm:$0xff]   ;;  %v11022_v43 = vld [vmem:[%s12324_s7 + $0x36c] ss:$16 sps:$4 sm:$0xff]  }
 0x9a7   : > { %6109 = vmatpush1.bf16.msra.mxu0 %v10951_v4  ;;  %6195 = vmatpush1.bf16.msra.mxu1 %v10954_v54  ;;  %v11017_v8 = vld [vmem:[%s12324_s7 + $0x360] ss:$16 sps:$4 sm:$0xff]   ;;  %v11020_v27 = vld [vmem:[%s12324_s7 + $0x368] ss:$16 sps:$4 sm:$0xff]   ;;  %v11025_v44 = vld [vmem:[%s12324_s7 + $0x384] ss:$16 sps:$4 sm:$0xff]  }
 0x9a8   : > { %6140 = vmatprep.mubr.bf16.mxu0 %v5280_v48  ;;  %6226 = vmatprep.mubr.bf16.mxu1 %v5280_v48  ;;  %v11028_v12 = vld [vmem:[%s12324_s7 + $0x38c] ss:$16 sps:$4 sm:$0xff]   ;;  %v11023_v4 = vld [vmem:[%s12324_s7 + $0x380] ss:$16 sps:$4 sm:$0xff]   ;;  %v11026_v54 = vld [vmem:[%s12324_s7 + $0x388] ss:$16 sps:$4 sm:$0xff]  }
 0x9a9   : > { %6110 = vmatprep.subr.bf16.mxu0 %v10959_v40  ;;  %6196 = vmatprep.subr.bf16.mxu1 %v10962_v57  ;;  %v11031_v55 = vld [vmem:[%s12324_s7 + $0x3a4] ss:$16 sps:$4 sm:$0xff]   ;;  %v11034_v38 = vld [vmem:[%s12324_s7 + $0x3ac] ss:$16 sps:$4 sm:$0xff]   ;;  %v11029_v40 = vld [vmem:[%s12324_s7 + $0x3a0] ss:$16 sps:$4 sm:$0xff]  }
 0x9aa   : > { %v11032_v57 = vld [vmem:[%s12324_s7 + $0x3a8] ss:$16 sps:$4 sm:$0xff]   ;;  %v11037_v48 = vld [vmem:[%s12324_s7 + $0x3c4] ss:$16 sps:$4 sm:$0xff]  }
 0x9ab   : > { %6111 = vmatpush1.bf16.msra.mxu0 %v10957_v22  ;;  %6197 = vmatpush1.bf16.msra.mxu1 %v10960_v10  ;;  %v11040_v22 = vld [vmem:[%s12324_s7 + $0x3cc] ss:$16 sps:$4 sm:$0xff]   ;;  %v11035_v10 = vld [vmem:[%s12324_s7 + $0x3c0] ss:$16 sps:$4 sm:$0xff]  }
 0x9ac   : > { %6112 = vmatprep.subr.bf16.mxu0 %v10965_v1  ;;  %6198 = vmatprep.subr.bf16.mxu1 %v10968_v53  ;;  %v11038_v1 = vld [vmem:[%s12324_s7 + $0x3c8] ss:$16 sps:$4 sm:$0xff]   ;;  %v11043_v53 = vld [vmem:[%s12324_s7 + $0x3e4] ss:$16 sps:$4 sm:$0xff]  }
 0x9af   : > { %6113 = vmatpush1.bf16.msra.mxu0 %v10963_v63  ;;  %6199 = vmatpush1.bf16.msra.mxu1 %v10966_v18  ;;  %v11046_v63 = vld [vmem:[%s12324_s7 + $0x3ec] ss:$16 sps:$4 sm:$0xff]   ;;  %v11041_v18 = vld [vmem:[%s12324_s7 + $0x3e0] ss:$16 sps:$4 sm:$0xff]  }
 0x9b0   : > { %6114 = vmatprep.subr.bf16.mxu0 %v10971_v45  ;;  %6200 = vmatprep.subr.bf16.mxu1 %v10974_v62  ;;  %v11044_v45 = vld [vmem:[%s12324_s7 + $0x3e8] ss:$16 sps:$4 sm:$0xff]   ;;  %v11049_v62 = vld [vmem:[%s12326_s23 + $0x4] ss:$16 sps:$4 sm:$0xff]  }
 0x9b3   : > { %6115 = vmatpush1.bf16.msra.mxu0 %v10969_v24  ;;  %6201 = vmatpush1.bf16.msra.mxu1 %v10972_v21  ;;  %v11052_v24 = vld [vmem:[%s12326_s23 + $0xc] ss:$16 sps:$4 sm:$0xff]   ;;  %v11047_v21 = vld [vmem:[%s12326_s23] ss:$16 sps:$4 sm:$0xff]  }
 0x9b4   : > { %6116 = vmatprep.subr.bf16.mxu0 %v10977_v28  ;;  %6202 = vmatprep.subr.bf16.mxu1 %v10980_v51  ;;  %v11050_v28 = vld [vmem:[%s12326_s23 + $0x8] ss:$16 sps:$4 sm:$0xff]   ;;  %v11055_v51 = vld [vmem:[%s12326_s23 + $0x24] ss:$16 sps:$4 sm:$0xff]  }
 0x9b7   : > { %6117 = vmatpush1.bf16.msra.mxu0 %v10975_v29  ;;  %6203 = vmatpush1.bf16.msra.mxu1 %v10978_v31  ;;  %v11058_v29 = vld [vmem:[%s12326_s23 + $0x2c] ss:$16 sps:$4 sm:$0xff]   ;;  %v11053_v31 = vld [vmem:[%s12326_s23 + $0x20] ss:$16 sps:$4 sm:$0xff]  }
 0x9b8   : > { %6118 = vmatprep.subr.bf16.mxu0 %v10983_v30  ;;  %6204 = vmatprep.subr.bf16.mxu1 %v10986_v34  ;;  %v11056_v30 = vld [vmem:[%s12326_s23 + $0x28] ss:$16 sps:$4 sm:$0xff]   ;;  %v11061_v34 = vld [vmem:[%s12326_s23 + $0x44] ss:$16 sps:$4 sm:$0xff]  }
 0x9bb   : > { %6119 = vmatpush1.bf16.msra.mxu0 %v10981_v47  ;;  %6205 = vmatpush1.bf16.msra.mxu1 %v10984_v14  ;;  %v11064_v47 = vld [vmem:[%s12326_s23 + $0x4c] ss:$16 sps:$4 sm:$0xff]   ;;  %v11059_v14 = vld [vmem:[%s12326_s23 + $0x40] ss:$16 sps:$4 sm:$0xff]  }
 0x9bc   : > { %6120 = vmatprep.subr.bf16.mxu0 %v10989_v25  ;;  %6206 = vmatprep.subr.bf16.mxu1 %v10992_v6  ;;  %v11062_v25 = vld [vmem:[%s12326_s23 + $0x48] ss:$16 sps:$4 sm:$0xff]   ;;  %v11070_v6 = vld [vmem:[%s12326_s23 + $0x6c] ss:$16 sps:$4 sm:$0xff]  }
 0x9bf   : > { %6121 = vmatpush1.bf16.msra.mxu0 %v10987_v59  ;;  %6207 = vmatpush1.bf16.msra.mxu1 %v10990_v49  ;;  %v11065_v59 = vld [vmem:[%s12326_s23 + $0x60] ss:$16 sps:$4 sm:$0xff]   ;;  %v11068_v49 = vld [vmem:[%s12326_s23 + $0x68] ss:$16 sps:$4 sm:$0xff]  }
 0x9c0   : > { %6122 = vmatprep.subr.bf16.mxu0 %v10995_v0  ;;  %6208 = vmatprep.subr.bf16.mxu1 %v10998_v15  ;;  %v11073_v0 = vld [vmem:[%s12326_s23 + $0x84] ss:$16 sps:$4 sm:$0xff]   ;;  %v11076_v15 = vld [vmem:[%s12326_s23 + $0x8c] ss:$16 sps:$4 sm:$0xff]  }
 0x9c3   : > { %6123 = vmatpush1.bf16.msra.mxu0 %v10993_v5  ;;  %6209 = vmatpush1.bf16.msra.mxu1 %v10996_v13  ;;  %v11071_v5 = vld [vmem:[%s12326_s23 + $0x80] ss:$16 sps:$4 sm:$0xff]   ;;  %v11074_v13 = vld [vmem:[%s12326_s23 + $0x88] ss:$16 sps:$4 sm:$0xff]  }
 0x9c4   : > { %6124 = vmatprep.subr.bf16.mxu0 %v11001_v41  ;;  %6210 = vmatprep.subr.bf16.mxu1 %v11004_v52  ;;  %v11079_v41 = vld [vmem:[%s12326_s23 + $0xa4] ss:$16 sps:$4 sm:$0xff]   ;;  %v11082_v52 = vld [vmem:[%s12326_s23 + $0xac] ss:$16 sps:$4 sm:$0xff]  }
 0x9c7   : > { %6125 = vmatpush1.bf16.msra.mxu0 %v10999_v58  ;;  %6211 = vmatpush1.bf16.msra.mxu1 %v11002_v33  ;;  %v11077_v58 = vld [vmem:[%s12326_s23 + $0xa0] ss:$16 sps:$4 sm:$0xff]   ;;  %v11080_v33 = vld [vmem:[%s12326_s23 + $0xa8] ss:$16 sps:$4 sm:$0xff]  }
 0x9c8   : > { %6126 = vmatprep.subr.bf16.mxu0 %v11007_v42  ;;  %6212 = vmatprep.subr.bf16.mxu1 %v11010_v9  ;;  %v11085_v42 = vld [vmem:[%s12326_s23 + $0xc4] ss:$16 sps:$4 sm:$0xff]   ;;  %v11088_v9 = vld [vmem:[%s12326_s23 + $0xcc] ss:$16 sps:$4 sm:$0xff]  }
 0x9cb   : > { %6127 = vmatpush1.bf16.msra.mxu0 %v11005_v50  ;;  %6213 = vmatpush1.bf16.msra.mxu1 %v11008_v37  ;;  %v11083_v50 = vld [vmem:[%s12326_s23 + $0xc0] ss:$16 sps:$4 sm:$0xff]   ;;  %v11086_v37 = vld [vmem:[%s12326_s23 + $0xc8] ss:$16 sps:$4 sm:$0xff]  }
 0x9cc   : > { %6128 = vmatprep.subr.bf16.mxu0 %v11013_v7  ;;  %6214 = vmatprep.subr.bf16.mxu1 %v11016_v32  ;;  %v11091_v7 = vld [vmem:[%s12326_s23 + $0xe4] ss:$16 sps:$4 sm:$0xff]   ;;  %v11094_v32 = vld [vmem:[%s12326_s23 + $0xec] ss:$16 sps:$4 sm:$0xff]  }
 0x9cf   : > { %6129 = vmatpush1.bf16.msra.mxu0 %v11011_v35  ;;  %6215 = vmatpush1.bf16.msra.mxu1 %v11014_v23  ;;  %v11089_v35 = vld [vmem:[%s12326_s23 + $0xe0] ss:$16 sps:$4 sm:$0xff]   ;;  %v11092_v23 = vld [vmem:[%s12326_s23 + $0xe8] ss:$16 sps:$4 sm:$0xff]  }
 0x9d0   : > { %6130 = vmatprep.subr.bf16.mxu0 %v11019_v46  ;;  %6216 = vmatprep.subr.bf16.mxu1 %v11022_v43  ;;  %v11097_v46 = vld [vmem:[%s12326_s23 + $0x104] ss:$16 sps:$4 sm:$0xff]   ;;  %v11100_v43 = vld [vmem:[%s12326_s23 + $0x10c] ss:$16 sps:$4 sm:$0xff]  }
 0x9d3   : > { %6131 = vmatpush1.bf16.msra.mxu0 %v11017_v8  ;;  %6217 = vmatpush1.bf16.msra.mxu1 %v11020_v27  ;;  %v11095_v8 = vld [vmem:[%s12326_s23 + $0x100] ss:$16 sps:$4 sm:$0xff]   ;;  %v11098_v27 = vld [vmem:[%s12326_s23 + $0x108] ss:$16 sps:$4 sm:$0xff]  }
 0x9d4   : > { %6132 = vmatprep.subr.bf16.mxu0 %v11025_v44  ;;  %6218 = vmatprep.subr.bf16.mxu1 %v11028_v12  ;;  %v11103_v44 = vld [vmem:[%s12326_s23 + $0x124] ss:$16 sps:$4 sm:$0xff]   ;;  %v11106_v12 = vld [vmem:[%s12326_s23 + $0x12c] ss:$16 sps:$4 sm:$0xff]  }
 0x9d7   : > { %6133 = vmatpush1.bf16.msra.mxu0 %v11023_v4  ;;  %6219 = vmatpush1.bf16.msra.mxu1 %v11026_v54  ;;  %v11101_v4 = vld [vmem:[%s12326_s23 + $0x120] ss:$16 sps:$4 sm:$0xff]   ;;  %v11104_v54 = vld [vmem:[%s12326_s23 + $0x128] ss:$16 sps:$4 sm:$0xff]  }
 0x9d8   : > { %6134 = vmatprep.subr.bf16.mxu0 %v11031_v55  ;;  %6220 = vmatprep.subr.bf16.mxu1 %v11034_v38  ;;  %v11109_v55 = vld [vmem:[%s12326_s23 + $0x144] ss:$16 sps:$4 sm:$0xff]   ;;  %v11112_v38 = vld [vmem:[%s12326_s23 + $0x14c] ss:$16 sps:$4 sm:$0xff]  }
 0x9db   : > { %6135 = vmatpush1.bf16.msra.mxu0 %v11029_v40  ;;  %6221 = vmatpush1.bf16.msra.mxu1 %v11032_v57  ;;  %v11107_v40 = vld [vmem:[%s12326_s23 + $0x140] ss:$16 sps:$4 sm:$0xff]   ;;  %v11110_v57 = vld [vmem:[%s12326_s23 + $0x148] ss:$16 sps:$4 sm:$0xff]  }
 0x9dc   : > { %6136 = vmatprep.subr.bf16.mxu0 %v11037_v48  ;;  %6222 = vmatprep.subr.bf16.mxu1 %v11040_v22  ;;  %v11115_v48 = vld [vmem:[%s12326_s23 + $0x164] ss:$16 sps:$4 sm:$0xff]   ;;  %v11118_v22 = vld [vmem:[%s12326_s23 + $0x16c] ss:$16 sps:$4 sm:$0xff]  }
 0x9df   : > { %6137 = vmatpush1.bf16.msra.mxu0 %v11035_v10  ;;  %6223 = vmatpush1.bf16.msra.mxu1 %v11038_v1  ;;  %v11113_v10 = vld [vmem:[%s12326_s23 + $0x160] ss:$16 sps:$4 sm:$0xff]   ;;  %v11116_v1 = vld [vmem:[%s12326_s23 + $0x168] ss:$16 sps:$4 sm:$0xff]  }
 0x9e0   : > { %6138 = vmatprep.subr.bf16.mxu0 %v11043_v53  ;;  %6224 = vmatprep.subr.bf16.mxu1 %v11046_v63  ;;  %v11121_v53 = vld [vmem:[%s12326_s23 + $0x184] ss:$16 sps:$4 sm:$0xff]   ;;  %v11124_v63 = vld [vmem:[%s12326_s23 + $0x18c] ss:$16 sps:$4 sm:$0xff]  }
 0x9e3   : > { %6139 = vmatpush1.bf16.msra.mxu0 %v11041_v18  ;;  %6225 = vmatpush1.bf16.msra.mxu1 %v11044_v45  ;;  %v11119_v18 = vld [vmem:[%s12326_s23 + $0x180] ss:$16 sps:$4 sm:$0xff]   ;;  %v11122_v45 = vld [vmem:[%s12326_s23 + $0x188] ss:$16 sps:$4 sm:$0xff]  }
 0x9e4   : > { %7017 = vmatprep.subr.bf16.mxu0 %v11049_v62  ;;  %7103 = vmatprep.subr.bf16.mxu1 %v11052_v24  ;;  %v11127_v62 = vld [vmem:[%s12326_s23 + $0x1a4] ss:$16 sps:$4 sm:$0xff]   ;;  %v11130_v24 = vld [vmem:[%s12326_s23 + $0x1ac] ss:$16 sps:$4 sm:$0xff]  }
 0x9e6   : > { %6141 = vmatmul.mubr.bf16.vlgmr.msra.gmra.mrb[32].mxu0 %v13373_v61  ;;  %6227 = vmatmul.mubr.bf16.vlgmr.msra.gmra.mrb[32].mxu1 %v13373_v61  ;;  %v11067_v61 = vld [vmem:[%s12326_s23 + $0x64] ss:$16 sps:$4 sm:$0xff]  }
 0x9e7   : > { %7018 = vmatpush1.bf16.msra.mxu0 %v11047_v21  ;;  %7104 = vmatpush1.bf16.msra.mxu1 %v11050_v28  ;;  %v11125_v21 = vld [vmem:[%s12326_s23 + $0x1a0] ss:$16 sps:$4 sm:$0xff]   ;;  %v11128_v28 = vld [vmem:[%s12326_s23 + $0x1a8] ss:$16 sps:$4 sm:$0xff]  }
 0x9e8   : > { %7019 = vmatprep.subr.bf16.mxu0 %v11055_v51  ;;  %7105 = vmatprep.subr.bf16.mxu1 %v11058_v29  ;;  %v11133_v51 = vld [vmem:[%s12326_s23 + $0x1c4] ss:$16 sps:$4 sm:$0xff]   ;;  %v11136_v29 = vld [vmem:[%s12326_s23 + $0x1cc] ss:$16 sps:$4 sm:$0xff]  }
 0x9eb   : > { %7020 = vmatpush1.bf16.msra.mxu0 %v11053_v31  ;;  %7106 = vmatpush1.bf16.msra.mxu1 %v11056_v30  ;;  %v11131_v31 = vld [vmem:[%s12326_s23 + $0x1c0] ss:$16 sps:$4 sm:$0xff]   ;;  %v11134_v30 = vld [vmem:[%s12326_s23 + $0x1c8] ss:$16 sps:$4 sm:$0xff]  }
 0x9ec   : > { %7021 = vmatprep.subr.bf16.mxu0 %v11061_v34  ;;  %7107 = vmatprep.subr.bf16.mxu1 %v11064_v47  ;;  %v11139_v34 = vld [vmem:[%s12326_s23 + $0x1e4] ss:$16 sps:$4 sm:$0xff]   ;;  %v11142_v47 = vld [vmem:[%s12326_s23 + $0x1ec] ss:$16 sps:$4 sm:$0xff]  }
 0x9ef   : > { %7022 = vmatpush1.bf16.msra.mxu0 %v11059_v14  ;;  %7108 = vmatpush1.bf16.msra.mxu1 %v11062_v25  ;;  %v11137_v14 = vld [vmem:[%s12326_s23 + $0x1e0] ss:$16 sps:$4 sm:$0xff]   ;;  %v11140_v25 = vld [vmem:[%s12326_s23 + $0x1e8] ss:$16 sps:$4 sm:$0xff]  }
 0x9f0   : > { %7023 = vmatprep.subr.bf16.mxu0 %v11067_v61  ;;  %7109 = vmatprep.subr.bf16.mxu1 %v11070_v6  ;;  %v11145_v61 = vld [vmem:[%s12326_s23 + $0x204] ss:$16 sps:$4 sm:$0xff]   ;;  %v11148_v6 = vld [vmem:[%s12326_s23 + $0x20c] ss:$16 sps:$4 sm:$0xff]  }
 0x9f3   : > { %7024 = vmatpush1.bf16.msra.mxu0 %v11065_v59  ;;  %7110 = vmatpush1.bf16.msra.mxu1 %v11068_v49  ;;  %v13504_v59 = vld [vmem:[%s12330_s26 + $0x20] sm:$0xff]  ;;  %v13507_v49 = vld [vmem:[%s12330_s26 + $0x30] sm:$0xff] }
 0x9f4   : > { %7025 = vmatprep.subr.bf16.mxu0 %v11073_v0  ;;  %7111 = vmatprep.subr.bf16.mxu1 %v11076_v15  ;;  %v13510_v0 = vld [vmem:[%s12330_s26 + $0x28] sm:$0xff]  ;;  %v13513_v15 = vld [vmem:[%s12330_s26 + $0x38] sm:$0xff] }
 0x9f7   : > { %7026 = vmatpush1.bf16.msra.mxu0 %v11071_v5  ;;  %7112 = vmatpush1.bf16.msra.mxu1 %v11074_v13  ;;  %v5412_v5 = vrot.slane %v13504_v59, %v12478_v16  ;;  %v5420_v13 = vrot.slane %v13507_v49, %v12478_v16 }
 0x9f8   : > { %7027 = vmatprep.subr.bf16.mxu0 %v11079_v41  ;;  %7113 = vmatprep.subr.bf16.mxu1 %v11082_v52  ;;  %v5416_v41 = vrot.slane %v13510_v0, %v12478_v16  ;;  %v5424_v52 = vrot.slane %v13513_v15, %v12478_v16 }
 0x9fb   : > { %7028 = vmatpush1.bf16.msra.mxu0 %v11077_v58  ;;  %7114 = vmatpush1.bf16.msra.mxu1 %v11080_v33 }
 0x9fc   : > { %7029 = vmatprep.subr.bf16.mxu0 %v11085_v42  ;;  %7115 = vmatprep.subr.bf16.mxu1 %v11088_v9 }
 0x9ff   : > { %7030 = vmatpush1.bf16.msra.mxu0 %v11083_v50  ;;  %7116 = vmatpush1.bf16.msra.mxu1 %v11086_v37 }
 0xa00   : > { %7031 = vmatprep.subr.bf16.mxu0 %v11091_v7  ;;  %7117 = vmatprep.subr.bf16.mxu1 %v11094_v32 }
 0xa03   : > { %7032 = vmatpush1.bf16.msra.mxu0 %v11089_v35  ;;  %7118 = vmatpush1.bf16.msra.mxu1 %v11092_v23 }
 0xa04   : > { %7033 = vmatprep.subr.bf16.mxu0 %v11097_v46  ;;  %7119 = vmatprep.subr.bf16.mxu1 %v11100_v43 }
 0xa07   : > { %7034 = vmatpush1.bf16.msra.mxu0 %v11095_v8  ;;  %7120 = vmatpush1.bf16.msra.mxu1 %v11098_v27 }
 0xa08   : > { %7035 = vmatprep.subr.bf16.mxu0 %v11103_v44  ;;  %7121 = vmatprep.subr.bf16.mxu1 %v11106_v12 }
 0xa0b   : > { %7036 = vmatpush1.bf16.msra.mxu0 %v11101_v4  ;;  %7122 = vmatpush1.bf16.msra.mxu1 %v11104_v54 }
 0xa0c   : > { %7037 = vmatprep.subr.bf16.mxu0 %v11109_v55  ;;  %7123 = vmatprep.subr.bf16.mxu1 %v11112_v38 }
 0xa0f   : > { %7038 = vmatpush1.bf16.msra.mxu0 %v11107_v40  ;;  %7124 = vmatpush1.bf16.msra.mxu1 %v11110_v57 }
 0xa10   : > { %7039 = vmatprep.subr.bf16.mxu0 %v11115_v48  ;;  %7125 = vmatprep.subr.bf16.mxu1 %v11118_v22 }
 0xa13   : > { %7040 = vmatpush1.bf16.msra.mxu0 %v11113_v10  ;;  %7126 = vmatpush1.bf16.msra.mxu1 %v11116_v1 }
 0xa14   : > { %7041 = vmatprep.subr.bf16.mxu0 %v11121_v53  ;;  %7127 = vmatprep.subr.bf16.mxu1 %v11124_v63  ;;  %v11143_v63 = vld [vmem:[%s12326_s23 + $0x200] ss:$16 sps:$4 sm:$0xff]  }
 0xa17   : > { %7042 = vmatpush1.bf16.msra.mxu0 %v11119_v18  ;;  %7128 = vmatpush1.bf16.msra.mxu1 %v11122_v45  ;;  %v11146_v18 = vld [vmem:[%s12326_s23 + $0x208] ss:$16 sps:$4 sm:$0xff]   ;;  %v11151_v45 = vld [vmem:[%s12326_s23 + $0x224] ss:$16 sps:$4 sm:$0xff]  }
 0xa18   : > { %7043 = vmatprep.subr.bf16.mxu0 %v11127_v62  ;;  %7129 = vmatprep.subr.bf16.mxu1 %v11130_v24  ;;  %v11154_v62 = vld [vmem:[%s12326_s23 + $0x22c] ss:$16 sps:$4 sm:$0xff]   ;;  %v11149_v24 = vld [vmem:[%s12326_s23 + $0x220] ss:$16 sps:$4 sm:$0xff]  }
 0xa1b   : > { %7044 = vmatpush1.bf16.msra.mxu0 %v11125_v21  ;;  %7130 = vmatpush1.bf16.msra.mxu1 %v11128_v28  ;;  %v11152_v21 = vld [vmem:[%s12326_s23 + $0x228] ss:$16 sps:$4 sm:$0xff]   ;;  %v11157_v28 = vld [vmem:[%s12326_s23 + $0x244] ss:$16 sps:$4 sm:$0xff]  }
 0xa1c   : > { %7045 = vmatprep.subr.bf16.mxu0 %v11133_v51  ;;  %7131 = vmatprep.subr.bf16.mxu1 %v11136_v29  ;;  %v11160_v51 = vld [vmem:[%s12326_s23 + $0x24c] ss:$16 sps:$4 sm:$0xff]   ;;  %v11155_v29 = vld [vmem:[%s12326_s23 + $0x240] ss:$16 sps:$4 sm:$0xff]  }
 0xa1f   : > { %7046 = vmatpush1.bf16.msra.mxu0 %v11131_v31  ;;  %7132 = vmatpush1.bf16.msra.mxu1 %v11134_v30  ;;  %v11158_v31 = vld [vmem:[%s12326_s23 + $0x248] ss:$16 sps:$4 sm:$0xff]   ;;  %v11163_v30 = vld [vmem:[%s12326_s23 + $0x264] ss:$16 sps:$4 sm:$0xff]  }
 0xa20   : > { %7047 = vmatprep.subr.bf16.mxu0 %v11139_v34  ;;  %7133 = vmatprep.subr.bf16.mxu1 %v11142_v47  ;;  %v11166_v34 = vld [vmem:[%s12326_s23 + $0x26c] ss:$16 sps:$4 sm:$0xff]   ;;  %v11161_v47 = vld [vmem:[%s12326_s23 + $0x260] ss:$16 sps:$4 sm:$0xff]  }
 0xa23   : > { %7048 = vmatpush1.bf16.msra.mxu0 %v11137_v14  ;;  %7134 = vmatpush1.bf16.msra.mxu1 %v11140_v25  ;;  %v11164_v14 = vld [vmem:[%s12326_s23 + $0x268] ss:$16 sps:$4 sm:$0xff]   ;;  %v11169_v25 = vld [vmem:[%s12326_s23 + $0x284] ss:$16 sps:$4 sm:$0xff]  }
 0xa24   : > { %7060 = vmatprep.subr.bf16.mxu0 %v11145_v61  ;;  %7146 = vmatprep.subr.bf16.mxu1 %v11148_v6  ;;  %v11172_v61 = vld [vmem:[%s12326_s23 + $0x28c] ss:$16 sps:$4 sm:$0xff]   ;;  %v11167_v6 = vld [vmem:[%s12326_s23 + $0x280] ss:$16 sps:$4 sm:$0xff]  }
 0xab9   : > { %v6142_v58 = vpop.f32.mrb[32].mxu0  ;;  %v6228_v33 = vpop.f32.mrb[32].mxu1 }
 0xaba   : > { %v9895_v42 = vadd.f32 %v6142_v58, %v5412_v5  ;;  %v9899_v9 = vadd.f32 %v6228_v33, %v5420_v13  ;;  %v6144_v50 = vpop.f32.mrb[33].mxu0  ;;  %v6230_v37 = vpop.f32.mrb[33].mxu1  ;;  %v11176_v58 = vld [vmem:[%s12326_s23 + $0x2a8] ss:$16 sps:$4 sm:$0xff]   ;;  %v11181_v33 = vld [vmem:[%s12326_s23 + $0x2c4] ss:$16 sps:$4 sm:$0xff]  }
 0xabb   : > { %v9896_v7 = vadd.f32 %v6144_v50, %v5416_v41  ;;  %v9900_v32 = vadd.f32 %v6230_v37, %v5424_v52  ;;  %v6146_v35 = vpop.f32.mrb[34].mxu0  ;;  %v6232_v23 = vpop.f32.mrb[34].mxu1  ;;  %v11182_v50 = vld [vmem:[%s12326_s23 + $0x2c8] ss:$16 sps:$4 sm:$0xff]   ;;  %v11187_v37 = vld [vmem:[%s12326_s23 + $0x2e4] ss:$16 sps:$4 sm:$0xff]  }
 0xabc   : > { %v9897_v46 = vadd.f32 %v6146_v35, %v5412_v5  ;;  %v9901_v43 = vadd.f32 %v6232_v23, %v5420_v13  ;;  %v6148_v8 = vpop.f32.mrb[35].mxu0  ;;  %v6234_v27 = vpop.f32.mrb[35].mxu1  ;;  %v6237_v4 = vmax.f32 %v9895_v42, 0.0  ;;  %v6239_v16 = vmax.f32 %v9899_v9, 0.0  ;;  %v11170_v5 = vld [vmem:[%s12326_s23 + $0x288] ss:$16 sps:$4 sm:$0xff]  }
 0xabd   : > { %v9898_v44 = vadd.f32 %v6148_v8, %v5416_v41  ;;  %v9902_v12 = vadd.f32 %v6234_v27, %v5424_v52  ;;  %v6238_v38 = vmax.f32 %v9896_v7, 0.0  ;;  %v6240_v40 = vmax.f32 %v9900_v32, 0.0  ;;  %v11175_v13 = vld [vmem:[%s12326_s23 + $0x2a4] ss:$16 sps:$4 sm:$0xff]   ;;  %v11178_v41 = vld [vmem:[%s12326_s23 + $0x2ac] ss:$16 sps:$4 sm:$0xff]  }
 0xabe   : > { %v6241_v54 = vmax.f32 %v9897_v46, 0.0  ;;  %v6243_v55 = vmax.f32 %v9901_v43, 0.0  ;;  %v11173_v52 = vld [vmem:[%s12326_s23 + $0x2a0] ss:$16 sps:$4 sm:$0xff]   ;;  %v11184_v42 = vld [vmem:[%s12326_s23 + $0x2cc] ss:$16 sps:$4 sm:$0xff]  }
 0xabf   : > { %v6242_v57 = vmax.f32 %v9898_v44, 0.0  ;;  %v6244_v48 = vmax.f32 %v9902_v12, 0.0  ;;  %v11179_v9 = vld [vmem:[%s12326_s23 + $0x2c0] ss:$16 sps:$4 sm:$0xff]   ;;  %v11190_v7 = vld [vmem:[%s12326_s23 + $0x2ec] ss:$16 sps:$4 sm:$0xff]  }
 0xac0   : > { %v6245_v22 = vpack.c.bf16 %v6241_v54, %v6237_v4  ;;  %v13523_v10 = vpack.c.bf16 %v6243_v55, %v6239_v16  ;;  %v11185_v32 = vld [vmem:[%s12326_s23 + $0x2e0] ss:$16 sps:$4 sm:$0xff]   ;;  %v11188_v35 = vld [vmem:[%s12326_s23 + $0x2e8] ss:$16 sps:$4 sm:$0xff]   ;;  %v11193_v23 = vld [vmem:[%s12326_s23 + $0x304] ss:$16 sps:$4 sm:$0xff]  }
 0xac1   : > { %v6246_v1 = vpack.c.bf16 %v6242_v57, %v6238_v38  ;;  %v6248_v53 = vpack.c.bf16 %v6244_v48, %v6240_v40  ;;  %v11196_v46 = vld [vmem:[%s12326_s23 + $0x30c] ss:$16 sps:$4 sm:$0xff]   ;;  %v11191_v43 = vld [vmem:[%s12326_s23 + $0x300] ss:$16 sps:$4 sm:$0xff]   ;;  %v11194_v8 = vld [vmem:[%s12326_s23 + $0x308] ss:$16 sps:$4 sm:$0xff]  }
 0xac2   : > { %v11199_v27 = vld [vmem:[%s12326_s23 + $0x324] ss:$16 sps:$4 sm:$0xff]   ;;  %v11202_v44 = vld [vmem:[%s12326_s23 + $0x32c] ss:$16 sps:$4 sm:$0xff]   ;;  %v11197_v12 = vld [vmem:[%s12326_s23 + $0x320] ss:$16 sps:$4 sm:$0xff]  }
 0xac3   : > { %7049 = vmatprep.mubr.bf16.mxu0 %v6246_v1  ;;  %7135 = vmatprep.mubr.bf16.mxu1 %v6246_v1  ;;  %v11200_v4 = vld [vmem:[%s12326_s23 + $0x328] ss:$16 sps:$4 sm:$0xff]   ;;  %v11205_v16 = vld [vmem:[%s12326_s23 + $0x344] ss:$16 sps:$4 sm:$0xff]   ;;  %v11208_v54 = vld [vmem:[%s12326_s23 + $0x34c] ss:$16 sps:$4 sm:$0xff]  }
 0xac4   : > { %7050 = vmatmul.mubr.bf16.vlgmr.msra.gmra.mrb[36].mxu0 %v6245_v22  ;;  %7136 = vmatmul.mubr.bf16.vlgmr.msra.gmra.mrb[36].mxu1 %v6245_v22  ;;  %v11203_v55 = vld [vmem:[%s12326_s23 + $0x340] ss:$16 sps:$4 sm:$0xff]   ;;  %v11206_v38 = vld [vmem:[%s12326_s23 + $0x348] ss:$16 sps:$4 sm:$0xff]   ;;  %v11211_v40 = vld [vmem:[%s12326_s23 + $0x364] ss:$16 sps:$4 sm:$0xff]  }
 0xac5   : > { %7061 = vmatpush1.bf16.msra.mxu0 %v11143_v63  ;;  %7147 = vmatpush1.bf16.msra.mxu1 %v11146_v18  ;;  %v11214_v57 = vld [vmem:[%s12326_s23 + $0x36c] ss:$16 sps:$4 sm:$0xff]   ;;  %v11209_v48 = vld [vmem:[%s12326_s23 + $0x360] ss:$16 sps:$4 sm:$0xff]   ;;  %v11212_v22 = vld [vmem:[%s12326_s23 + $0x368] ss:$16 sps:$4 sm:$0xff]  }
 0xac6   : > { %7092 = vmatprep.mubr.bf16.mxu0 %v6248_v53  ;;  %7178 = vmatprep.mubr.bf16.mxu1 %v6248_v53  ;;  %v11217_v1 = vld [vmem:[%s12326_s23 + $0x384] ss:$16 sps:$4 sm:$0xff]   ;;  %v11220_v53 = vld [vmem:[%s12326_s23 + $0x38c] ss:$16 sps:$4 sm:$0xff]   ;;  %v11215_v63 = vld [vmem:[%s12326_s23 + $0x380] ss:$16 sps:$4 sm:$0xff]  }
 0xac7   : > { %7062 = vmatprep.subr.bf16.mxu0 %v11151_v45  ;;  %7148 = vmatprep.subr.bf16.mxu1 %v11154_v62  ;;  %v11218_v18 = vld [vmem:[%s12326_s23 + $0x388] ss:$16 sps:$4 sm:$0xff]   ;;  %v11223_v45 = vld [vmem:[%s12326_s23 + $0x3a4] ss:$16 sps:$4 sm:$0xff]   ;;  %v11226_v62 = vld [vmem:[%s12326_s23 + $0x3ac] ss:$16 sps:$4 sm:$0xff]  }
 0xac9   : > { %7063 = vmatpush1.bf16.msra.mxu0 %v11149_v24  ;;  %7149 = vmatpush1.bf16.msra.mxu1 %v11152_v21  ;;  %v11221_v24 = vld [vmem:[%s12326_s23 + $0x3a0] ss:$16 sps:$4 sm:$0xff]   ;;  %v11224_v21 = vld [vmem:[%s12326_s23 + $0x3a8] ss:$16 sps:$4 sm:$0xff]  }
 0xaca   : > { %7064 = vmatprep.subr.bf16.mxu0 %v11157_v28  ;;  %7150 = vmatprep.subr.bf16.mxu1 %v11160_v51  ;;  %v11229_v28 = vld [vmem:[%s12326_s23 + $0x3c4] ss:$16 sps:$4 sm:$0xff]   ;;  %v11232_v51 = vld [vmem:[%s12326_s23 + $0x3cc] ss:$16 sps:$4 sm:$0xff]  }
 0xacd   : > { %7065 = vmatpush1.bf16.msra.mxu0 %v11155_v29  ;;  %7151 = vmatpush1.bf16.msra.mxu1 %v11158_v31  ;;  %v11227_v29 = vld [vmem:[%s12326_s23 + $0x3c0] ss:$16 sps:$4 sm:$0xff]   ;;  %v11230_v31 = vld [vmem:[%s12326_s23 + $0x3c8] ss:$16 sps:$4 sm:$0xff]  }
 0xace   : > { %7066 = vmatprep.subr.bf16.mxu0 %v11163_v30  ;;  %7152 = vmatprep.subr.bf16.mxu1 %v11166_v34  ;;  %v11235_v30 = vld [vmem:[%s12326_s23 + $0x3e4] ss:$16 sps:$4 sm:$0xff]   ;;  %v11238_v34 = vld [vmem:[%s12326_s23 + $0x3ec] ss:$16 sps:$4 sm:$0xff]  }
 0xad1   : > { %7067 = vmatpush1.bf16.msra.mxu0 %v11161_v47  ;;  %7153 = vmatpush1.bf16.msra.mxu1 %v11164_v14  ;;  %v11233_v47 = vld [vmem:[%s12326_s23 + $0x3e0] ss:$16 sps:$4 sm:$0xff]   ;;  %v11236_v14 = vld [vmem:[%s12326_s23 + $0x3e8] ss:$16 sps:$4 sm:$0xff]  }
 0xad2   : > { %7068 = vmatprep.subr.bf16.mxu0 %v11169_v25  ;;  %7154 = vmatprep.subr.bf16.mxu1 %v11172_v61  ;;  %v7311_v25 = vrot.slane %v13510_v0, 4  ;;  %v704_v61 = vld [vmem:[%s12330_s26 + $0x40] sm:$0xff] }
 0xad5   : > { %7069 = vmatpush1.bf16.msra.mxu0 %v11167_v6  ;;  %7155 = vmatpush1.bf16.msra.mxu1 %v11170_v5  ;;  %v7313_v6 = vrot.slane %v13513_v15, 4  ;;  %v7310_v5 = vrot.slane %v13504_v59, 4 }
 0xad6   : > { %7070 = vmatprep.subr.bf16.mxu0 %v11175_v13  ;;  %7156 = vmatprep.subr.bf16.mxu1 %v11178_v41  ;;  %v694_v13 = vld [vmem:[%s13895_s27] sm:$0xff]  ;;  %v7312_v41 = vrot.slane %v13507_v49, 4 }
 0xad9   : > { %7071 = vmatpush1.bf16.msra.mxu0 %v11173_v52  ;;  %7157 = vmatpush1.bf16.msra.mxu1 %v11176_v58  ;;  %v695_v52 = vld [vmem:[%s13895_s27 + $0x8] sm:$0xff] }
 0xada   : > { %7072 = vmatprep.subr.bf16.mxu0 %v11181_v33  ;;  %7158 = vmatprep.subr.bf16.mxu1 %v11184_v42  ;;  %v11244_v58 = vld [vmem:[%s12328_s30 + $0xc] ss:$16 sps:$4 sm:$0xff]   ;;  %v7200_v33 = vrot.slane %v13504_v59, %v12484_v19  ;;  %v7208_v42 = vrot.slane %v13507_v49, %v12484_v19 }
 0xadd   : > { %7073 = vmatpush1.bf16.msra.mxu0 %v11179_v9  ;;  %7159 = vmatpush1.bf16.msra.mxu1 %v11182_v50 }
 0xade   : > { %7074 = vmatprep.subr.bf16.mxu0 %v11187_v37  ;;  %7160 = vmatprep.subr.bf16.mxu1 %v11190_v7  ;;  %v7204_v37 = vrot.slane %v13510_v0, %v12484_v19  ;;  %v7212_v7 = vrot.slane %v13513_v15, %v12484_v19  ;;  %v7481_v19 = vrot.slane %v13510_v0, %v13343_v26  ;;  %v11239_v0 = vld [vmem:[%s12328_s30] ss:$16 sps:$4 sm:$0xff]  }
 0xae1   : > { %7075 = vmatpush1.bf16.msra.mxu0 %v11185_v32  ;;  %7161 = vmatpush1.bf16.msra.mxu1 %v11188_v35 }
 0xae2   : > { %7076 = vmatprep.subr.bf16.mxu0 %v11193_v23  ;;  %7162 = vmatprep.subr.bf16.mxu1 %v11196_v46 }
 0xae5   : > { %7077 = vmatpush1.bf16.msra.mxu0 %v11191_v43  ;;  %7163 = vmatpush1.bf16.msra.mxu1 %v11194_v8  ;;  %v7477_v43 = vrot.slane %v13504_v59, %v13343_v26 }
 0xae6   : > { %7078 = vmatprep.subr.bf16.mxu0 %v11199_v27  ;;  %7164 = vmatprep.subr.bf16.mxu1 %v11202_v44 }
 0xae9   : > { %7079 = vmatpush1.bf16.msra.mxu0 %v11197_v12  ;;  %7165 = vmatpush1.bf16.msra.mxu1 %v11200_v4 }
 0xaea   : > { %7080 = vmatprep.subr.bf16.mxu0 %v11205_v16  ;;  %7166 = vmatprep.subr.bf16.mxu1 %v11208_v54 }
 0xaed   : > { %7081 = vmatpush1.bf16.msra.mxu0 %v11203_v55  ;;  %7167 = vmatpush1.bf16.msra.mxu1 %v11206_v38 }
 0xaee   : > { %7082 = vmatprep.subr.bf16.mxu0 %v11211_v40  ;;  %7168 = vmatprep.subr.bf16.mxu1 %v11214_v57  ;;  %v11242_v57 = vld [vmem:[%s12328_s30 + $0x8] ss:$16 sps:$4 sm:$0xff]  }
 0xaf1   : > { %7083 = vmatpush1.bf16.msra.mxu0 %v11209_v48  ;;  %7169 = vmatpush1.bf16.msra.mxu1 %v11212_v22 }
 0xaf2   : > { %7084 = vmatprep.subr.bf16.mxu0 %v11217_v1  ;;  %7170 = vmatprep.subr.bf16.mxu1 %v11220_v53 }
 0xaf5   : > { %7085 = vmatpush1.bf16.msra.mxu0 %v11215_v63  ;;  %7171 = vmatpush1.bf16.msra.mxu1 %v11218_v18 }
 0xaf6   : > { %7086 = vmatprep.subr.bf16.mxu0 %v11223_v45  ;;  %7172 = vmatprep.subr.bf16.mxu1 %v11226_v62  ;;  %v11248_v45 = vld [vmem:[%s12328_s30 + $0x28] ss:$16 sps:$4 sm:$0xff]  }
 0xaf9   : > { %7087 = vmatpush1.bf16.msra.mxu0 %v11221_v24  ;;  %7173 = vmatpush1.bf16.msra.mxu1 %v11224_v21 }
 0xafa   : > { %7088 = vmatprep.subr.bf16.mxu0 %v11229_v28  ;;  %7174 = vmatprep.subr.bf16.mxu1 %v11232_v51 }
 0xafd   : > { %7089 = vmatpush1.bf16.msra.mxu0 %v11227_v29  ;;  %7175 = vmatpush1.bf16.msra.mxu1 %v11230_v31  ;;  %v11253_v31 = vld [vmem:[%s12328_s30 + $0x4c] ss:$16 sps:$4 sm:$0xff]  }
 0xafe   : > { %7090 = vmatprep.subr.bf16.mxu0 %v11235_v30  ;;  %7176 = vmatprep.subr.bf16.mxu1 %v11238_v34 }
 0xb01   : > { %7091 = vmatpush1.bf16.msra.mxu0 %v11233_v47  ;;  %7177 = vmatpush1.bf16.msra.mxu1 %v11236_v14  ;;  %v11256_v14 = vld [vmem:[%s12328_s30 + $0x44] ss:$16 sps:$4 sm:$0xff]  }
 0xb02   : > { %9871 = vmatprep.subr.msk.mxu0 %vm7221_vm11, %v704_v61  ;;  %7318 = vmatprep.subr.mxu1 %v7311_v25  ;;  %v11251_v25 = vld [vmem:[%s12328_s30 + $0x48] ss:$16 sps:$4 sm:$0xff]  }
 0xb04   : > { %7093 = vmatmul.mubr.bf16.vlgmr.msra.gmra.mrb[36].mxu0 %v13523_v10  ;;  %7179 = vmatmul.mubr.bf16.vlgmr.msra.gmra.mrb[36].mxu1 %v13523_v10  ;;  %v11241_v10 = vld [vmem:[%s12328_s30 + $0x4] ss:$16 sps:$4 sm:$0xff]  }
 0xb05   : > { %9873 = vmatprep.mubr.msk.f32.mxu0 %vm7221_vm11, %v694_v13 }
 0xb0a   : > { %9872 = vmatpush3.xpose.msk.msra.mxu0 %vm7221_vm11, %v704_v61  ;;  %7319 = vmatpush1.xpose.msra.mxu1 %v7310_v5 }
 0xb0b   : > { %7393 = vmatprep.subr.mxu0 %v7313_v6  ;;  %8284 = vmatprep.subr.bf16.mxu1 %v11241_v10  ;;  %v11254_v6 = vld [vmem:[%s12328_s30 + $0x40] ss:$16 sps:$4 sm:$0xff]   ;;  %v11262_v10 = vld [vmem:[%s12328_s30 + $0x6c] ss:$16 sps:$4 sm:$0xff]  }
 0xb0d   : > { %9874 = vmatmul.mubr.msk.f32.vlgmr.msra.gmra.mrb[40].mxu0 %vm7221_vm11, %v695_v52 }
 0xb0e   : > { %7394 = vmatpush1.xpose.msra.mxu0 %v7312_v41  ;;  %v11259_v41 = vld [vmem:[%s12328_s30 + $0x64] ss:$16 sps:$4 sm:$0xff]  }
 0xb0f   : > { %8370 = vmatprep.subr.bf16.mxu0 %v11244_v58  ;;  %v11257_v58 = vld [vmem:[%s12328_s30 + $0x60] ss:$16 sps:$4 sm:$0xff]  }
 0xbd7   : > { %v7094_v9 = vpop.f32.mrb[36].mxu0  ;;  %v7180_v50 = vpop.f32.mrb[36].mxu1 }
 0xbd8   : > { %v7189_v32 = vadd.f32 %v7094_v9, %v13205_v3  ;;  %v7191_v35 = vadd.f32 %v7180_v50, %v13214_v36  ;;  %v7096_v23 = vpop.f32.mrb[37].mxu0  ;;  %v7182_v46 = vpop.f32.mrb[37].mxu1  ;;  %v7485_v3 = vrot.slane %v13507_v49, %v13343_v26  ;;  %v11268_v9 = vld [vmem:[%s12328_s30 + $0x8c] ss:$16 sps:$4 sm:$0xff]   ;;  %v11263_v50 = vld [vmem:[%s12328_s30 + $0x80] ss:$16 sps:$4 sm:$0xff]  }
 0xbd9   : > { %v7190_v8 = vadd.f32 %v7096_v23, %v13208_v11  ;;  %v7192_v27 = vadd.f32 %v7182_v46, %v13222_v56  ;;  %v7098_v44 = vpop.f32.mrb[38].mxu0  ;;  %v7184_v12 = vpop.f32.mrb[38].mxu1  ;;  %v11272_v23 = vld [vmem:[%s12328_s30 + $0xa8] ss:$16 sps:$4 sm:$0xff]   ;;  %v11277_v46 = vld [vmem:[%s12328_s30 + $0xc4] ss:$16 sps:$4 sm:$0xff]  }
 0xbda   : > { %v7213_v36 = vadd.f32 %v7200_v33, %v7189_v32  ;;  %v7215_v4 = vadd.f32 %v7208_v42, %v7191_v35  ;;  %v7193_v16 = vadd.f32 %v7098_v44, %v13211_v20  ;;  %v7195_v59 = vadd.f32 %v7184_v12, %v13225_v2  ;;  %v7100_v54 = vpop.f32.mrb[39].mxu0  ;;  %v7186_v11 = vpop.f32.mrb[39].mxu1  ;;  %v11274_v32 = vld [vmem:[%s12328_s30 + $0xac] ss:$16 sps:$4 sm:$0xff]   ;;  %v11269_v35 = vld [vmem:[%s12328_s30 + $0xa0] ss:$16 sps:$4 sm:$0xff]  }
 0xbdb   : > { %v7214_v55 = vadd.f32 %v7204_v37, %v7190_v8  ;;  %v7216_v38 = vadd.f32 %v7212_v7, %v7192_v27  ;;  %v7194_v56 = vadd.f32 %v7100_v54, %v13217_v39  ;;  %v7196_v40 = vadd.f32 %v7186_v11, %v13231_v60  ;;  %v11247_v39 = vld [vmem:[%s12328_s30 + $0x24] ss:$16 sps:$4 sm:$0xff]   ;;  %v11250_v60 = vld [vmem:[%s12328_s30 + $0x2c] ss:$16 sps:$4 sm:$0xff]   ;;  %v11275_v8 = vld [vmem:[%s12328_s30 + $0xc0] ss:$16 sps:$4 sm:$0xff]  }
 0xbdc   : > { %8671 = vst [vmem:[#allocation2] sm:$0xff] %v7213_v36  ;;  %8673 = vst [vmem:[#allocation2 + $0x10] sm:$0xff] %v7215_v4  ;;  %v7217_v49 = vadd.f32 %v7200_v33, %v7193_v16  ;;  %v7219_v48 = vadd.f32 %v7208_v42, %v7195_v59  ;;  %v7489_v20 = vrot.slane %v13513_v15, %v13343_v26  ;;  %v11245_v15 = vld [vmem:[%s12328_s30 + $0x20] ss:$16 sps:$4 sm:$0xff]   ;;  %v11260_v33 = vld [vmem:[%s12328_s30 + $0x68] ss:$16 sps:$4 sm:$0xff]  }
 0xbdd   : > { %v7490_v2 = vmul.f32 %v7477_v43, %v7213_v36  ;;  %8672 = vst [vmem:[#allocation2 + $0x8] sm:$0xff] %v7214_v55  ;;  %8674 = vst [vmem:[#allocation2 + $0x18] sm:$0xff] %v7216_v38  ;;  %v7218_v22 = vadd.f32 %v7204_v37, %v7194_v56  ;;  %v7220_v1 = vadd.f32 %v7212_v7, %v7196_v40  ;;  %7382 = vmatprep.mubr.f32.mxu1 %v7214_v55  ;;  %v11265_v42 = vld [vmem:[%s12328_s30 + $0x84] ss:$16 sps:$4 sm:$0xff]   ;;  %v11266_v37 = vld [vmem:[%s12328_s30 + $0x88] ss:$16 sps:$4 sm:$0xff]  }
 0xbde   : > { %7457 = vmatprep.mubr.f32.mxu0 %v7216_v38  ;;  %v7491_v53 = vmul.f32 %v7481_v19, %v7214_v55  ;;  %v13634_v63 = vpack.c.bf16 %v7217_v49, %v7213_v36  ;;  %8675 = vst [vmem:[#allocation2 + $0x20] sm:$0xff] %v7217_v49  ;;  %8677 = vst [vmem:[#allocation2 + $0x30] sm:$0xff] %v7219_v48  ;;  %7383 = vmatmul.mubr.f32.vlgmr.msra.gmra.mrb[40].mxu1 %v7213_v36  ;;  %v11271_v7 = vld [vmem:[%s12328_s30 + $0xa4] ss:$16 sps:$4 sm:$0xff]   ;;  %v11278_v27 = vld [vmem:[%s12328_s30 + $0xc8] ss:$16 sps:$4 sm:$0xff]  }
 0xbdf   : > { %7458 = vmatmul.mubr.f32.vlgmr.msra.gmra.mrb[42].mxu0 %v7215_v4  ;;  %v7492_v18 = vmul.f32 %v7485_v3, %v7215_v4  ;;  %v7494_v26 = vmul.f32 %v7477_v43, %v7217_v49  ;;  %8676 = vst [vmem:[#allocation2 + $0x28] sm:$0xff] %v7218_v22  ;;  %8678 = vst [vmem:[#allocation2 + $0x38] sm:$0xff] %v7220_v1  ;;  %8285 = vmatpush1.bf16.msra.mxu1 %v11239_v0  ;;  %v11280_v43 = vld [vmem:[%s12328_s30 + $0xcc] ss:$16 sps:$4 sm:$0xff]   ;;  %v11283_v44 = vld [vmem:[%s12328_s30 + $0xe4] ss:$16 sps:$4 sm:$0xff]  }
 0xbe0   : > { %8371 = vmatpush1.bf16.msra.mxu0 %v11242_v57  ;;  %v7513_v62 = vpack.c.bf16 %v7218_v22, %v7214_v55  ;;  %v7498_v24 = vadd.f32 %v7491_v53, %v7490_v2  ;;  %v7495_v21 = vmul.f32 %v7481_v19, %v7218_v22  ;;  %7387 = vmatprep.mubr.f32.mxu1 %v7218_v22  ;;  %v11286_v12 = vld [vmem:[%s12328_s30 + $0xec] ss:$16 sps:$4 sm:$0xff]   ;;  %v11281_v19 = vld [vmem:[%s12328_s30 + $0xe0] ss:$16 sps:$4 sm:$0xff]   ;;  %v11289_v36 = vld [vmem:[%s12328_s30 + $0x104] ss:$16 sps:$4 sm:$0xff]  }
 0xbe1   : > { %7462 = vmatprep.mubr.f32.mxu0 %v7220_v1  ;;  %v7493_v28 = vmul.f32 %v7489_v20, %v7216_v38  ;;  %v7496_v51 = vmul.f32 %v7485_v3, %v7219_v48  ;;  %v13638_v29 = vpack.c.bf16 %v7220_v1, %v7216_v38  ;;  %8286 = vmatprep.subr.bf16.mxu1 %v11247_v39  ;;  %v11284_v3 = vld [vmem:[%s12328_s30 + $0xe8] ss:$16 sps:$4 sm:$0xff]   ;;  %v11287_v16 = vld [vmem:[%s12328_s30 + $0x100] ss:$16 sps:$4 sm:$0xff]   ;;  %v11295_v54 = vld [vmem:[%s12328_s30 + $0x124] ss:$16 sps:$4 sm:$0xff]  }
 0xbe2   : > { %8372 = vmatprep.subr.bf16.mxu0 %v11250_v60  ;;  %v7499_v30 = vadd.f32 %v7498_v24, %v7492_v18  ;;  %v7503_v34 = vadd.f32 %v7495_v21, %v7494_v26  ;;  %v13641_v47 = vpack.c.bf16 %v7219_v48, %v7215_v4  ;;  %7388 = vmatmul.mubr.f32.gmra.mrb[42].mxu1 %v7217_v49  ;;  %v11292_v4 = vld [vmem:[%s12328_s30 + $0x10c] ss:$16 sps:$4 sm:$0xff]   ;;  %v11290_v59 = vld [vmem:[%s12328_s30 + $0x108] ss:$16 sps:$4 sm:$0xff]   ;;  %v11293_v55 = vld [vmem:[%s12328_s30 + $0x120] ss:$16 sps:$4 sm:$0xff]  }
 0xbe3   : > { %7463 = vmatmul.mubr.f32.gmra.mrb[44].mxu0 %v7219_v48  ;;  %8287 = vmatpush1.bf16.msra.mxu1 %v11245_v15  ;;  %v7497_v5 = vmul.f32 %v7489_v20, %v7220_v1  ;;  %v11298_v11 = vld [vmem:[%s12328_s30 + $0x12c] ss:$16 sps:$4 sm:$0xff]   ;;  %v11296_v38 = vld [vmem:[%s12328_s30 + $0x128] ss:$16 sps:$4 sm:$0xff]   ;;  %v11301_v56 = vld [vmem:[%s12328_s30 + $0x144] ss:$16 sps:$4 sm:$0xff]  }
 0xbe4   : > { %8373 = vmatpush1.bf16.msra.mxu0 %v11248_v45  ;;  %v7500_v61 = vadd.f32 %v7499_v30, %v7493_v28  ;;  %v7504_v13 = vadd.f32 %v7503_v34, %v7496_v51  ;;  %8316 = vmatprep.mubr.bf16.mxu1 %v7513_v62  ;;  %v11304_v40 = vld [vmem:[%s12328_s30 + $0x14c] ss:$16 sps:$4 sm:$0xff]   ;;  %v11299_v0 = vld [vmem:[%s12328_s30 + $0x140] ss:$16 sps:$4 sm:$0xff]   ;;  %v11302_v57 = vld [vmem:[%s12328_s30 + $0x148] ss:$16 sps:$4 sm:$0xff]  }
 0xbe5   : > { %8402 = vmatprep.mubr.bf16.mxu0 %v7513_v62  ;;  %8374 = vmatprep.subr.bf16.mxu0 %v11253_v31  ;;  %v11307_v49 = vld [vmem:[%s12328_s30 + $0x164] ss:$16 sps:$4 sm:$0xff]   ;;  %v11310_v48 = vld [vmem:[%s12328_s30 + $0x16c] ss:$16 sps:$4 sm:$0xff]   ;;  %v11305_v20 = vld [vmem:[%s12328_s30 + $0x160] ss:$16 sps:$4 sm:$0xff]  }
 0xbe6   : > { %7501 = vadd.xlane.f32.xlu0 %v7500_v61  ;;  %v7505_v52 = vadd.f32 %v7504_v13, %v7497_v5  ;;  %8288 = vmatprep.subr.bf16.mxu1 %v11256_v14  ;;  %v11308_v2 = vld [vmem:[%s12328_s30 + $0x168] ss:$16 sps:$4 sm:$0xff]   ;;  %v11313_v22 = vld [vmem:[%s12328_s30 + $0x184] ss:$16 sps:$4 sm:$0xff]   ;;  %v11316_v1 = vld [vmem:[%s12328_s30 + $0x18c] ss:$16 sps:$4 sm:$0xff]  }
 0xbe7   : > { %8289 = vmatpush1.bf16.msra.mxu1 %v11254_v6  ;;  %v11311_v39 = vld [vmem:[%s12328_s30 + $0x180] ss:$16 sps:$4 sm:$0xff]   ;;  %v11314_v60 = vld [vmem:[%s12328_s30 + $0x188] ss:$16 sps:$4 sm:$0xff]   ;;  %v11319_v53 = vld [vmem:[%s12328_s30 + $0x1a4] ss:$16 sps:$4 sm:$0xff]  }
 0xbe8   : > { %8375 = vmatpush1.bf16.msra.mxu0 %v11251_v25  ;;  %7506 = vadd.xlane.f32.xlu1 %v7505_v52  ;;  %v11322_v18 = vld [vmem:[%s12328_s30 + $0x1ac] ss:$16 sps:$4 sm:$0xff]   ;;  %v11317_v26 = vld [vmem:[%s12328_s30 + $0x1a0] ss:$16 sps:$4 sm:$0xff]   ;;  %v11320_v15 = vld [vmem:[%s12328_s30 + $0x1a8] ss:$16 sps:$4 sm:$0xff]  }
 0xbe9   : > { %8290 = vmatprep.subr.bf16.mxu1 %v11259_v41  ;;  %8376 = vmatprep.subr.bf16.mxu0 %v11262_v10  ;;  %v11325_v45 = vld [vmem:[%s12328_s30 + $0x1c4] ss:$16 sps:$4 sm:$0xff]   ;;  %v11328_v62 = vld [vmem:[%s12328_s30 + $0x1cc] ss:$16 sps:$4 sm:$0xff]   ;;  %v11323_v24 = vld [vmem:[%s12328_s30 + $0x1c0] ss:$16 sps:$4 sm:$0xff]  }
 0xbea   : > { %v11326_v21 = vld [vmem:[%s12328_s30 + $0x1c8] ss:$16 sps:$4 sm:$0xff]   ;;  %v11331_v28 = vld [vmem:[%s12328_s30 + $0x1e4] ss:$16 sps:$4 sm:$0xff]   ;;  %v11334_v51 = vld [vmem:[%s12328_s30 + $0x1ec] ss:$16 sps:$4 sm:$0xff]  }
 0xbeb   : > { %8291 = vmatpush1.bf16.msra.mxu1 %v11257_v58  ;;  %v11329_v31 = vld [vmem:[%s12328_s30 + $0x1e0] ss:$16 sps:$4 sm:$0xff]   ;;  %v11332_v30 = vld [vmem:[%s12328_s30 + $0x1e8] ss:$16 sps:$4 sm:$0xff]   ;;  %v11337_v34 = vld [vmem:[%s12328_s30 + $0x204] ss:$16 sps:$4 sm:$0xff]  }
 0xbec   : > { %8377 = vmatpush1.bf16.msra.mxu0 %v11260_v33  ;;  %8292 = vmatprep.subr.bf16.mxu1 %v11265_v42  ;;  %v11340_v14 = vld [vmem:[%s12328_s30 + $0x20c] ss:$16 sps:$4 sm:$0xff]   ;;  %v11335_v25 = vld [vmem:[%s12328_s30 + $0x200] ss:$16 sps:$4 sm:$0xff]   ;;  %v11338_v61 = vld [vmem:[%s12328_s30 + $0x208] ss:$16 sps:$4 sm:$0xff]  }
 0xbed   : > { %8378 = vmatprep.subr.bf16.mxu0 %v11268_v9  ;;  %v11343_v6 = vld [vmem:[%s12328_s30 + $0x224] ss:$16 sps:$4 sm:$0xff]   ;;  %v11346_v5 = vld [vmem:[%s12328_s30 + $0x22c] ss:$16 sps:$4 sm:$0xff]   ;;  %v11341_v13 = vld [vmem:[%s12328_s30 + $0x220] ss:$16 sps:$4 sm:$0xff]  }
 0xbee   : > { %v11344_v41 = vld [vmem:[%s12328_s30 + $0x228] ss:$16 sps:$4 sm:$0xff]   ;;  %v11349_v52 = vld [vmem:[%s12328_s30 + $0x244] ss:$16 sps:$4 sm:$0xff]   ;;  %v11352_v10 = vld [vmem:[%s12328_s30 + $0x24c] ss:$16 sps:$4 sm:$0xff]  }
 0xbef   : > { %8293 = vmatpush1.bf16.msra.mxu1 %v11263_v50  ;;  %v11350_v58 = vld [vmem:[%s12328_s30 + $0x248] ss:$16 sps:$4 sm:$0xff]   ;;  %v11355_v33 = vld [vmem:[%s12328_s30 + $0x264] ss:$16 sps:$4 sm:$0xff]   ;;  %v11358_v42 = vld [vmem:[%s12328_s30 + $0x26c] ss:$16 sps:$4 sm:$0xff]  }
 0xbf0   : > { %8379 = vmatpush1.bf16.msra.mxu0 %v11266_v37  ;;  %8294 = vmatprep.subr.bf16.mxu1 %v11271_v7  ;;  %v11356_v9 = vld [vmem:[%s12328_s30 + $0x268] ss:$16 sps:$4 sm:$0xff]   ;;  %v11361_v50 = vld [vmem:[%s12328_s30 + $0x284] ss:$16 sps:$4 sm:$0xff]   ;;  %v11364_v37 = vld [vmem:[%s12328_s30 + $0x28c] ss:$16 sps:$4 sm:$0xff]  }
 0xbf1   : > { %8380 = vmatprep.subr.bf16.mxu0 %v11274_v32  ;;  %v11359_v7 = vld [vmem:[%s12328_s30 + $0x280] ss:$16 sps:$4 sm:$0xff]   ;;  %v11362_v32 = vld [vmem:[%s12328_s30 + $0x288] ss:$16 sps:$4 sm:$0xff]  }
 0xbf3   : > { %8295 = vmatpush1.bf16.msra.mxu1 %v11269_v35  ;;  %v11367_v35 = vld [vmem:[%s12328_s30 + $0x2a4] ss:$16 sps:$4 sm:$0xff]  }
 0xbf4   : > { %8381 = vmatpush1.bf16.msra.mxu0 %v11272_v23  ;;  %8296 = vmatprep.subr.bf16.mxu1 %v11277_v46  ;;  %v11370_v23 = vld [vmem:[%s12328_s30 + $0x2ac] ss:$16 sps:$4 sm:$0xff]   ;;  %v13724_v46 = vpop.f32.mrb[40].mxu0 }
 0xbf5   : > { %8382 = vmatprep.subr.bf16.mxu0 %v11280_v43  ;;  %v13726_v43 = vpop.f32.mrb[41].mxu0 }
 0xbf7   : > { %8297 = vmatpush1.bf16.msra.mxu1 %v11275_v8  ;;  %v11365_v8 = vld [vmem:[%s12328_s30 + $0x2a0] ss:$16 sps:$4 sm:$0xff]  }
 0xbf8   : > { %8383 = vmatpush1.bf16.msra.mxu0 %v11278_v27  ;;  %8298 = vmatprep.subr.bf16.mxu1 %v11283_v44  ;;  %v11368_v27 = vld [vmem:[%s12328_s30 + $0x2a8] ss:$16 sps:$4 sm:$0xff]   ;;  %v11373_v44 = vld [vmem:[%s12328_s30 + $0x2c4] ss:$16 sps:$4 sm:$0xff]  }
 0xbf9   : > { %8384 = vmatprep.subr.bf16.mxu0 %v11286_v12  ;;  %v11376_v12 = vld [vmem:[%s12328_s30 + $0x2cc] ss:$16 sps:$4 sm:$0xff]  }
 0xbfb   : > { %8299 = vmatpush1.bf16.msra.mxu1 %v11281_v19  ;;  %v11371_v19 = vld [vmem:[%s12328_s30 + $0x2c0] ss:$16 sps:$4 sm:$0xff]  }
 0xbfc   : > { %8385 = vmatpush1.bf16.msra.mxu0 %v11284_v3  ;;  %8300 = vmatprep.subr.bf16.mxu1 %v11289_v36  ;;  %v11374_v3 = vld [vmem:[%s12328_s30 + $0x2c8] ss:$16 sps:$4 sm:$0xff]   ;;  %v11379_v36 = vld [vmem:[%s12328_s30 + $0x2e4] ss:$16 sps:$4 sm:$0xff]  }
 0xbfd   : > { %8386 = vmatprep.subr.bf16.mxu0 %v11292_v4  ;;  %v11382_v4 = vld [vmem:[%s12328_s30 + $0x2ec] ss:$16 sps:$4 sm:$0xff]  }
 0xbff   : > { %8301 = vmatpush1.bf16.msra.mxu1 %v11287_v16  ;;  %v11377_v16 = vld [vmem:[%s12328_s30 + $0x2e0] ss:$16 sps:$4 sm:$0xff]  }
 0xc00   : > { %8387 = vmatpush1.bf16.msra.mxu0 %v11290_v59  ;;  %8302 = vmatprep.subr.bf16.mxu1 %v11295_v54  ;;  %v11380_v59 = vld [vmem:[%s12328_s30 + $0x2e8] ss:$16 sps:$4 sm:$0xff]   ;;  %v11385_v54 = vld [vmem:[%s12328_s30 + $0x304] ss:$16 sps:$4 sm:$0xff]  }
 0xc01   : > { %8388 = vmatprep.subr.bf16.mxu0 %v11298_v11  ;;  %v11388_v11 = vld [vmem:[%s12328_s30 + $0x30c] ss:$16 sps:$4 sm:$0xff]  }
 0xc03   : > { %8303 = vmatpush1.bf16.msra.mxu1 %v11293_v55  ;;  %v11383_v55 = vld [vmem:[%s12328_s30 + $0x300] ss:$16 sps:$4 sm:$0xff]  }
 0xc04   : > { %8389 = vmatpush1.bf16.msra.mxu0 %v11296_v38  ;;  %8304 = vmatprep.subr.bf16.mxu1 %v11301_v56  ;;  %v11386_v38 = vld [vmem:[%s12328_s30 + $0x308] ss:$16 sps:$4 sm:$0xff]   ;;  %v11391_v56 = vld [vmem:[%s12328_s30 + $0x324] ss:$16 sps:$4 sm:$0xff]  }
 0xc05   : > { %8390 = vmatprep.subr.bf16.mxu0 %v11304_v40  ;;  %v11394_v40 = vld [vmem:[%s12328_s30 + $0x32c] ss:$16 sps:$4 sm:$0xff]  }
 0xc07   : > { %8305 = vmatpush1.bf16.msra.mxu1 %v11299_v0  ;;  %v11389_v0 = vld [vmem:[%s12328_s30 + $0x320] ss:$16 sps:$4 sm:$0xff]  }
 0xc08   : > { %8391 = vmatpush1.bf16.msra.mxu0 %v11302_v57  ;;  %8306 = vmatprep.subr.bf16.mxu1 %v11307_v49  ;;  %v11392_v57 = vld [vmem:[%s12328_s30 + $0x328] ss:$16 sps:$4 sm:$0xff]   ;;  %v11397_v49 = vld [vmem:[%s12328_s30 + $0x344] ss:$16 sps:$4 sm:$0xff]  }
 0xc09   : > { %8392 = vmatprep.subr.bf16.mxu0 %v11310_v48  ;;  %v11400_v48 = vld [vmem:[%s12328_s30 + $0x34c] ss:$16 sps:$4 sm:$0xff]  }
 0xc0b   : > { %8307 = vmatpush1.bf16.msra.mxu1 %v11305_v20  ;;  %v11395_v20 = vld [vmem:[%s12328_s30 + $0x340] ss:$16 sps:$4 sm:$0xff]  }
 0xc0c   : > { %8393 = vmatpush1.bf16.msra.mxu0 %v11308_v2  ;;  %8308 = vmatprep.subr.bf16.mxu1 %v11313_v22  ;;  %v11398_v2 = vld [vmem:[%s12328_s30 + $0x348] ss:$16 sps:$4 sm:$0xff]   ;;  %v11403_v22 = vld [vmem:[%s12328_s30 + $0x364] ss:$16 sps:$4 sm:$0xff]  }
 0xc0d   : > { %8394 = vmatprep.subr.bf16.mxu0 %v11316_v1  ;;  %v11406_v1 = vld [vmem:[%s12328_s30 + $0x36c] ss:$16 sps:$4 sm:$0xff]  }
 0xc0f   : > { %8309 = vmatpush1.bf16.msra.mxu1 %v11311_v39  ;;  %v11401_v39 = vld [vmem:[%s12328_s30 + $0x360] ss:$16 sps:$4 sm:$0xff]  }
 0xc10   : > { %8395 = vmatpush1.bf16.msra.mxu0 %v11314_v60  ;;  %8310 = vmatprep.subr.bf16.mxu1 %v11319_v53  ;;  %v11404_v60 = vld [vmem:[%s12328_s30 + $0x368] ss:$16 sps:$4 sm:$0xff]   ;;  %v11409_v53 = vld [vmem:[%s12328_s30 + $0x384] ss:$16 sps:$4 sm:$0xff]  }
 0xc11   : > { %8396 = vmatprep.subr.bf16.mxu0 %v11322_v18  ;;  %v11412_v18 = vld [vmem:[%s12328_s30 + $0x38c] ss:$16 sps:$4 sm:$0xff]  }
 0xc13   : > { %8311 = vmatpush1.bf16.msra.mxu1 %v11317_v26  ;;  %v11407_v26 = vld [vmem:[%s12328_s30 + $0x380] ss:$16 sps:$4 sm:$0xff]  }
 0xc14   : > { %8397 = vmatpush1.bf16.msra.mxu0 %v11320_v15  ;;  %8312 = vmatprep.subr.bf16.mxu1 %v11325_v45  ;;  %v11410_v15 = vld [vmem:[%s12328_s30 + $0x388] ss:$16 sps:$4 sm:$0xff]   ;;  %v11415_v45 = vld [vmem:[%s12328_s30 + $0x3a4] ss:$16 sps:$4 sm:$0xff]  }
 0xc15   : > { %8398 = vmatprep.subr.bf16.mxu0 %v11328_v62  ;;  %v11418_v62 = vld [vmem:[%s12328_s30 + $0x3ac] ss:$16 sps:$4 sm:$0xff]  }
 0xc17   : > { %8313 = vmatpush1.bf16.msra.mxu1 %v11323_v24  ;;  %v11413_v24 = vld [vmem:[%s12328_s30 + $0x3a0] ss:$16 sps:$4 sm:$0xff]  }
 0xc18   : > { %8399 = vmatpush1.bf16.msra.mxu0 %v11326_v21  ;;  %8314 = vmatprep.subr.bf16.mxu1 %v11331_v28  ;;  %v11416_v21 = vld [vmem:[%s12328_s30 + $0x3a8] ss:$16 sps:$4 sm:$0xff]   ;;  %v11421_v28 = vld [vmem:[%s12328_s30 + $0x3c4] ss:$16 sps:$4 sm:$0xff]  }
 0xc19   : > { %8400 = vmatprep.subr.bf16.mxu0 %v11334_v51  ;;  %v11424_v51 = vld [vmem:[%s12328_s30 + $0x3cc] ss:$16 sps:$4 sm:$0xff]  }
 0xc1b   : > { %8315 = vmatpush1.bf16.msra.mxu1 %v11329_v31  ;;  %v11419_v31 = vld [vmem:[%s12328_s30 + $0x3c0] ss:$16 sps:$4 sm:$0xff]  }
 0xc1c   : > { %8401 = vmatpush1.bf16.msra.mxu0 %v11332_v30  ;;  %8327 = vmatprep.subr.bf16.mxu1 %v11337_v34  ;;  %v11422_v30 = vld [vmem:[%s12328_s30 + $0x3c8] ss:$16 sps:$4 sm:$0xff]   ;;  %v11427_v34 = vld [vmem:[%s12328_s30 + $0x3e4] ss:$16 sps:$4 sm:$0xff]  }
 0xc1d   : > { %8413 = vmatprep.subr.bf16.mxu0 %v11340_v14  ;;  %v11430_v14 = vld [vmem:[%s12328_s30 + $0x3ec] ss:$16 sps:$4 sm:$0xff]  }
 0xc1e   : > { %8317 = vmatmul.mubr.bf16.vlgmr.msra.gmra.mrb[44].mxu1 %v13634_v63 }
 0xc1f   : > { %8403 = vmatmul.mubr.bf16.vlgmr.msra.gmra.mrb[48].mxu0 %v13634_v63  ;;  %8328 = vmatpush1.bf16.msra.mxu1 %v11335_v25  ;;  %v11347_v63 = vld [vmem:[%s12328_s30 + $0x240] ss:$16 sps:$4 sm:$0xff]  }
 0xc20   : > { %8359 = vmatprep.mubr.bf16.mxu1 %v13638_v29  ;;  %8414 = vmatpush1.bf16.msra.mxu0 %v11338_v61  ;;  %v11425_v25 = vld [vmem:[%s12328_s30 + $0x3e0] ss:$16 sps:$4 sm:$0xff]   ;;  %v11428_v61 = vld [vmem:[%s12328_s30 + $0x3e8] ss:$16 sps:$4 sm:$0xff]  }
 0xc21   : > { %8445 = vmatprep.mubr.bf16.mxu0 %v13638_v29  ;;  %8329 = vmatprep.subr.bf16.mxu1 %v11343_v6  ;;  %v11353_v29 = vld [vmem:[%s12328_s30 + $0x260] ss:$16 sps:$4 sm:$0xff]  }
 0xc22   : > { %8415 = vmatprep.subr.bf16.mxu0 %v11346_v5 }
 0xc23   : > { %8330 = vmatpush1.bf16.msra.mxu1 %v11341_v13 }
 0xc24   : > { %8416 = vmatpush1.bf16.msra.mxu0 %v11344_v41  ;;  %8331 = vmatprep.subr.bf16.mxu1 %v11349_v52 }
 0xc25   : > { %8417 = vmatprep.subr.bf16.mxu0 %v11352_v10 }
 0xc27   : > { %8332 = vmatpush1.bf16.msra.mxu1 %v11347_v63 }
 0xc28   : > { %8418 = vmatpush1.bf16.msra.mxu0 %v11350_v58  ;;  %8333 = vmatprep.subr.bf16.mxu1 %v11355_v33  ;;  %v11500_v33 = vld [vmem:[%s12330_s26 + $0x20] sm:$0xff] }
 0xc29   : > { %8419 = vmatprep.subr.bf16.mxu0 %v11358_v42  ;;  %v7471_v42 = vrot.slane %v11500_v33, %v13346_v17  ;;  %v8587_v33 = vld [vmem:[#allocation9 + $0x8] sm:$0xff] }
 0xc2b   : > { %8334 = vmatpush1.bf16.msra.mxu1 %v11353_v29 }
 0xc2c   : > { %8420 = vmatpush1.bf16.msra.mxu0 %v11356_v9  ;;  %8335 = vmatprep.subr.bf16.mxu1 %v11361_v50 }
 0xc2d   : > { %8421 = vmatprep.subr.bf16.mxu0 %v11364_v37 }
 0xc2f   : > { %8336 = vmatpush1.bf16.msra.mxu1 %v11359_v7 }
 0xc30   : > { %8422 = vmatpush1.bf16.msra.mxu0 %v11362_v32  ;;  %8337 = vmatprep.subr.bf16.mxu1 %v11367_v35 }
 0xc31   : > { %8423 = vmatprep.subr.bf16.mxu0 %v11370_v23 }
 0xc33   : > { %8338 = vmatpush1.bf16.msra.mxu1 %v11365_v8 }
 0xc34   : > { %8424 = vmatpush1.bf16.msra.mxu0 %v11368_v27  ;;  %8339 = vmatprep.subr.bf16.mxu1 %v11373_v44 }
 0xc35   : > { %8425 = vmatprep.subr.bf16.mxu0 %v11376_v12 }
 0xc37   : > { %8340 = vmatpush1.bf16.msra.mxu1 %v11371_v19 }
 0xc38   : > { %8426 = vmatpush1.bf16.msra.mxu0 %v11374_v3  ;;  %8341 = vmatprep.subr.bf16.mxu1 %v11379_v36 }
 0xc39   : > { %8427 = vmatprep.subr.bf16.mxu0 %v11382_v4 }
 0xc3b   : > { %8342 = vmatpush1.bf16.msra.mxu1 %v11377_v16 }
 0xc3c   : > { %8428 = vmatpush1.bf16.msra.mxu0 %v11380_v59  ;;  %8343 = vmatprep.subr.bf16.mxu1 %v11385_v54 }
 0xc3d   : > { %8429 = vmatprep.subr.bf16.mxu0 %v11388_v11 }
 0xc3f   : > { %8344 = vmatpush1.bf16.msra.mxu1 %v11383_v55 }
 0xc40   : > { %8430 = vmatpush1.bf16.msra.mxu0 %v11386_v38  ;;  %8345 = vmatprep.subr.bf16.mxu1 %v11391_v56 }
 0xc41   : > { %8431 = vmatprep.subr.bf16.mxu0 %v11394_v40  ;;  %v8546_v40 = vld [vmem:[#allocation8] sm:$0xff] }
 0xc43   : > { %8346 = vmatpush1.bf16.msra.mxu1 %v11389_v0 }
 0xc44   : > { %8432 = vmatpush1.bf16.msra.mxu0 %v11392_v57  ;;  %8347 = vmatprep.subr.bf16.mxu1 %v11397_v49 }
 0xc45   : > { %8433 = vmatprep.subr.bf16.mxu0 %v11400_v48 }
 0xc47   : > { %8348 = vmatpush1.bf16.msra.mxu1 %v11395_v20  ;;  %v8547_v20 = vld [vmem:[#allocation8 + $0x8] sm:$0xff] }
 0xc48   : > { %8434 = vmatpush1.bf16.msra.mxu0 %v11398_v2  ;;  %8349 = vmatprep.subr.bf16.mxu1 %v11403_v22 }
 0xc49   : > { %8435 = vmatprep.subr.bf16.mxu0 %v11406_v1 }
 0xc4b   : > { %8350 = vmatpush1.bf16.msra.mxu1 %v11401_v39 }
 0xc4c   : > { %8436 = vmatpush1.bf16.msra.mxu0 %v11404_v60  ;;  %8351 = vmatprep.subr.bf16.mxu1 %v11409_v53 }
 0xc4d   : > { %8437 = vmatprep.subr.bf16.mxu0 %v11412_v18  ;;  %v11861_v18 = vmov 0  }
 0xc4e   : > { %10085 = vset.pattern.permute.xlu0 %v11861_v18  ;;  %10086 = vset.pattern.permute.xlu1 %v11861_v18 }
 0xc4f   : > { %8352 = vmatpush1.bf16.msra.mxu1 %v11407_v26 }
 0xc50   : > { %8438 = vmatpush1.bf16.msra.mxu0 %v11410_v15  ;;  %8353 = vmatprep.subr.bf16.mxu1 %v11415_v45 }
 0xc51   : > { %8439 = vmatprep.subr.bf16.mxu0 %v11418_v62 }
 0xc53   : > { %8354 = vmatpush1.bf16.msra.mxu1 %v11413_v24 }
 0xc54   : > { %8440 = vmatpush1.bf16.msra.mxu0 %v11416_v21  ;;  %8355 = vmatprep.subr.bf16.mxu1 %v11421_v28 }
 0xc55   : > { %8441 = vmatprep.subr.bf16.mxu0 %v11424_v51 }
 0xc57   : > { %8356 = vmatpush1.bf16.msra.mxu1 %v11419_v31 }
 0xc58   : > { %8442 = vmatpush1.bf16.msra.mxu0 %v11422_v30  ;;  %8357 = vmatprep.subr.bf16.mxu1 %v11427_v34  ;;  %v8573_v34 = vld [vmem:[%s13896_s18 + $0x8] sm:$0xff] }
 0xc59   : > { %8443 = vmatprep.subr.bf16.mxu0 %v11430_v14  ;;  %v8572_v14 = vld [vmem:[%s13896_s18] sm:$0xff] }
 0xc5b   : > { %8358 = vmatpush1.bf16.msra.mxu1 %v11425_v25 }
 0xc5c   : > { %8444 = vmatpush1.bf16.msra.mxu0 %v11428_v61 }
 0xc5e   : > { %8360 = vmatmul.mubr.bf16.vlgmr.msra.gmra.mrb[44].mxu1 %v13641_v47 }
 0xc5f   : > { %8446 = vmatmul.mubr.bf16.vlgmr.msra.gmra.mrb[48].mxu0 %v13641_v47 }
 0xc73   : > { %v7502_v4 = vpop.xlane.xlu0 %7501 }
 0xc74   : > { %v7508_v59 = vmax.f32 %v7502_v4, 0.0 }
 0xc75   : > { %v7507_v16 = vpop.xlane.xlu1 %7506 }
 0xc76   : > { %v7509_v54 = vmax.f32 %v7507_v16, 0.0  ;;  %v7510_v11 = vadd.f32 0.01, %v7508_v59 }
 0xc78   : > { %v7511_v55 = vadd.f32 0.01, %v7509_v54  ;;  %11479 = vrcp.f32 %v7510_v11 }
 0xc7a   : > { %11481 = vrcp.f32 %v7511_v55 }
 0xc82   : > { %v11480_v38 = vpop.eup %11479 }
 0xc84   : > { %v11482_v49 = vpop.eup %11481 }
 0xcb1   : > { %v7384_v6 = vpop.f32.mrb[40].mxu1 }
 0xcb2   : > { %v7459_v5 = vpop.f32.mrb[42].mxu0  ;;  %v7385_v13 = vadd.f32 %v7384_v6, %v13726_v43  ;;  %v7386_v41 = vpop.f32.mrb[41].mxu1 }
 0xcb3   : > { %v7461_v52 = vpop.f32.mrb[43].mxu0 }
 0xcb4   : > { %v7460_v10 = vadd.f32 %v7459_v5, %v7385_v13  ;;  %v8586_v52 = vld [vmem:[#allocation9] sm:$0xff] }
 0xcb5   : > { %v7389_v63 = vpop.f32.mrb[42].mxu1 }
 0xcb6   : > { %v7464_v58 = vpop.f32.mrb[44].mxu0  ;;  %v7390_v29 = vadd.f32 %v13724_v46, %v7389_v63  ;;  %v7391_v9 = vpop.f32.mrb[43].mxu1  ;;  %v7472_v7 = vadd.f32 %v7471_v42, %v7460_v10 }
 0xcb7   : > { %v7466_v50 = vpop.f32.mrb[45].mxu0 }
 0xcb8   : > { %v7465_v37 = vadd.f32 %v7464_v58, %v7390_v29 }
 0xcba   : > { %v7473_v32 = vadd.f32 %v7471_v42, %v7465_v37 }
 0xcbc   : > { %v9883_v47 = vpack.c.bf16 %v7473_v32, %v7472_v7 }
 0xcbe   : > { %9884 = vmatprep.subr.bf16.mxu0 %v9883_v47 }
 0xcbf   : > { %9886 = vmatpush3.bf16.msra.mxu0 %v9883_v47 }
 0xd31   : > { %v8361_v35 = vpop.f32.mrb[44].mxu1 }
 0xd32   : > { %v8447_v23 = vpop.f32.mrb[48].mxu0  ;;  %v8363_v43 = vpop.f32.mrb[45].mxu1 }
 0xd33   : > { %v8449_v8 = vpop.f32.mrb[49].mxu0  ;;  %v8365_v27 = vpop.f32.mrb[46].mxu1 }
 0xd34   : > { %v8456_v44 = vpack.c.bf16 %v8365_v27, %v8361_v35  ;;  %v8451_v12 = vpop.f32.mrb[50].mxu0  ;;  %v8367_v19 = vpop.f32.mrb[47].mxu1 }
 0xd35   : > { %v8458_v3 = vpack.c.bf16 %v8451_v12, %v8447_v23  ;;  %v8457_v17 = vpack.c.bf16 %v8367_v19, %v8363_v43  ;;  %v8453_v36 = vpop.f32.mrb[51].mxu0 }
 0xd36   : > { %v8459_v46 = vpack.c.bf16 %v8453_v36, %v8449_v8 }
 0xd37   : > { %8460 = vmatprep.subr.bf16.mxu1 %v8457_v17  ;;  %8492 = vmatprep.mubr.bf16.mxu1 %v8457_v17 }
 0xd38   : > { %8461 = vmatpush1.bf16.xpose.msra.mxu1 %v8456_v44 }
 0xd39   : > { %8501 = vmatprep.subr.bf16.mxu1 %v8459_v46 }
 0xd3f   : > { %8493 = vmatmul.mubr.bf16.vlgmr.msra.gmra.mrb[48].mxu1 %v8456_v44 }
 0xd40   : > { %8502 = vmatpush1.bf16.xpose.msra.mxu1 %v8458_v3  ;;  %8533 = vmatprep.mubr.bf16.mxu1 %v8459_v46 }
 0xd4b   : > { %8534 = vmatmul.mubr.bf16.vlgmr.msra.gmra.mrb[48].mxu1 %v8458_v3 }
 0xe1e   : > { %v8535_v56 = vpop.f32.mrb[48].mxu1 }
 0xe1f   : > { %v8543_v0 = vmul.f32 %v11480_v38, %v8535_v56  ;;  %v8537_v57 = vpop.f32.mrb[49].mxu1 }
 0xe20   : > { %v8538_v48 = vpop.f32.mrb[50].mxu1 }
 0xe21   : > { %v8545_v2 = vmul.f32 %v11482_v49, %v8538_v48  ;;  %v8540_v22 = vpop.f32.mrb[51].mxu1  ;;  %v8548_v1 = vadd.f32 %v8546_v40, %v8543_v0 }
 0xe23   : > { %v8550_v39 = vsel %vm3766_vm6, %v8548_v1, -inf  ;;  %v8549_v60 = vadd.f32 %v8547_v20, %v8545_v2 }
 0xe24   : > { %8551 = vmax.xlane.f32.xlu0 %v8550_v39 }
 0xe25   : > { %v8553_v53 = vsel %vm3766_vm6, %v8549_v60, -inf }
 0xe26   : > { %8554 = vmax.xlane.f32.xlu1 %v8553_v53 }
 0xeb1   : > { %v8552_v26 = vpop.xlane.xlu0 %8551 }
 0xeb2   : > { %v8556_v15 = vsub.f32 %v8548_v1, %v8552_v26 }
 0xeb3   : > { %v8555_v45 = vpop.xlane.xlu1 %8554 }
 0xeb4   : > { %v8558_v62 = vmul.f32 1.442695, %v8556_v15  ;;  %v8557_v24 = vsub.f32 %v8549_v60, %v8555_v45 }
 0xeb6   : > { %11483 = vpow2.f32 %v8558_v62  ;;  %v8560_v21 = vmul.f32 1.442695, %v8557_v24 }
 0xeb8   : > { %11485 = vpow2.f32 %v8560_v21 }
 0xec0   : > { %v11484_v28 = vpop.eup %11483 }
 0xec1   : > { %v8562_v51 = vsel %vm3766_vm6, %v11484_v28, 0.0 }
 0xec2   : > { %v11486_v31 = vpop.eup %11485  ;;  %8563 = vadd.xlane.f32.xlu0 %v8562_v51 }
 0xec3   : > { %v8565_v30 = vsel %vm3766_vm6, %v11486_v31, 0.0 }
 0xec4   : > { %8566 = vadd.xlane.f32.xlu1 %v8565_v30 }
 0xed5   : > { %8581 = vperm.xlu1 %10086, %v8573_v34  }
 0xed8   : > { %8576 = vperm.xlu0 %10085, %v8572_v14  }
 0xf4f   : > { %v8564_v25 = vpop.xlane.xlu0 %8563 }
 0xf50   : > { %11487 = vrcp.f32 %v8564_v25 }
 0xf51   : > { %v8567_v61 = vpop.xlane.xlu1 %8566 }
 0xf52   : > { %11489 = vrcp.f32 %v8567_v61 }
 0xf55   : > { %v8582_v10 = vpop.permute.xlu1 %8581 }
 0xf57   : > { %v8577_v5 = vpop.permute.xlu0 %8576 }
 0xf5a   : > { %v11488_v6 = vpop.eup %11487 }
 0xf5b   : > { %v8569_v13 = vmul.f32 %v11488_v6, %v11484_v28 }
 0xf5c   : > { %v11490_v41 = vpop.eup %11489 }
 0xf5d   : > { %v8584_v63 = vmul.f32 %v8577_v5, %v8569_v13  ;;  %v8571_v58 = vmul.f32 %v11490_v41, %v11486_v31 }
 0xf5f   : > { %v8588_v42 = vadd.f32 %v8586_v52, %v8584_v63  ;;  %v8585_v29 = vmul.f32 %v8582_v10, %v8571_v58 }
 0xf61   : > { %v8589_v9 = vadd.f32 %v8587_v33, %v8585_v29  ;;  %9880 = vmatprep.mubr.msk.f32.mxu0 %vm3766_vm6, %v8588_v42 }
 0xf63   : > { %9881 = vmatmul.mubr.msk.f32.vlgmr.msra.gmra.mrb[46].mxu0 %vm3766_vm6, %v8589_v9 }
0x1036   : > { %v9882_v50 = vpop.f32.mrb[46].mxu0 }
0x1037   : > { %8680 = vst.msk [vmem:[%s13895_s27 + $0x8] sm:$0xff] %vm7221_vm11, %v9882_v50  ;;  %v8662_v37 = vpop.f32.mrb[47].mxu0 }
0x1038   : > { %8679 = vst.msk [vmem:[%s13895_s27] sm:$0xff] %vm7221_vm11, %v8662_v37 }
0x1039 PF: > { %s13897_s24 = sld [smem:[#allocation25_spill]]  ;;  %s13898_s21 = sld [smem:[#allocation21_spill]] }
0x103a   : > { %s13899_s22 = sld [smem:[#allocation22_spill]]  ;;  %s13900_s23 = sld [smem:[#allocation26_spill]] }
0x103f   : > { %p22_p5 = scmp.ge.s32.totalorder %s13897_s24, 4  }
0x1041   :  { %24 = sbr.rel (!%p22_p5) target bundleno = 12 (0xc), region = 178 }
0x1048   :  { %8692 = vsyncpa [#allocation5], 1 }
0x1049   :  { %8694 = vsyncpa [#allocation5 + $0x1], 1 }
0x104a   :  { %8695 = vsyncpa [#allocation7], 1 }
0x104b   :  { %8696 = vsyncpa [#allocation10], 1 }

</bundles_post_ra>
